<compile_context>
chip_gen: v6e
topology: v6e:2x2x1
jax: 0.10.0
libtpu: 0.0.40
codegen_flags: <defaults>
</compile_context>

<pallas_src>
import math

import numpy as np
import jax
import jax.numpy as jnp
from jax.experimental import pallas as pl
from jax.experimental.pallas import tpu as pltpu

# ----------------------------- config (small) -----------------------------
B, T = 2, 8          # batch, sequence
E = 16               # embedding_size
C = 32               # hidden_size
H = 4                # num_attention_heads
R = C // H           # attention_head_size
K = 3                # kernel_size
PAD_L = K // 2       # padding_l
I = 64               # intermediate_size
NUM_LAYERS = 2       # num_hidden_layers (1 hidden group, inner_group_num=1 -> shared params)
EPS = 1e-12          # layer_norm_eps
N = B * T
P = T + K - 1        # padded sequence length
HK = H * K
LANES = 128

assert (K + 1) * C <= LANES, "fused QV + tap-logit output must fit one 128-lane tile"
assert N % 8 == 0 and E % 8 == 0 and C % 8 == 0 and I % 8 == 0

HIGHEST = jax.lax.Precision.HIGHEST

# ---- packed weight-slab row offsets (all 8-aligned, lane offset 0) ----
R_EMBW = 0                   # (E, C)        embedding_hidden_mapping_in weight
R_QVE  = R_EMBW + E          # (C, (K+1)*C)  [wv | wq lane-expanded tap0 | tap1 | tap2]
R_WD   = R_QVE + C           # (C, C)        attention dense
R_W1   = R_WD + C            # (C, I)        ffn
R_W2   = R_W1 + C            # (I, C)        ffn_output
R_S    = R_W2 + I            # (K*N, N)      stacked unfold1d shift matrices
ROWS_W = R_S + K * N         # = 224

# ---- packed vector-slab rows ----
RV_EMBB, RV_BD, RV_LN1G, RV_LN1B, RV_B1, RV_B2, RV_LN2G, RV_LN2B = range(8)
RV_MB = 8                    # rows 8:8+N -> (N, 128) [bv | bq+mask tap0 | tap1 | tap2]
ROWS_V = RV_MB + N           # = 24


# ----------------------------- shared math helpers --------------------------
def _gelu_new(x):
    # config.hidden_act = "gelu_new" (tanh approximation)
    return 0.5 * x * (1.0 + jnp.tanh(math.sqrt(2.0 / math.pi) * (x + 0.044715 * x * x * x)))


# ----------------------------- fused Pallas kernel ---------------------------
def fused_kernel(x_ref, w_ref, v_ref, o_ref):
    """embedding mapping + NUM_LAYERS shared-weight ConvbertLayers, fully resident in VMEM."""

    def mm(a, b):
        return jnp.dot(a, b, preferred_element_type=jnp.float32, precision=HIGHEST)

    def layernorm(y, g_row, b_row):
        g = v_ref[g_row:g_row + 1, 0:C]          # (1, C) implicit broadcast on use
        b = v_ref[b_row:b_row + 1, 0:C]
        mu = jnp.mean(y, axis=-1, keepdims=True)
        yc = y - mu
        var = jnp.mean(yc * yc, axis=-1, keepdims=True)
        return yc * jax.lax.rsqrt(var + EPS) * g + b

    # ---- embedding_hidden_mapping_in ----
    x = mm(x_ref[...], w_ref[R_EMBW:R_EMBW + E, 0:C]) + v_ref[RV_EMBB:RV_EMBB + 1, 0:C]  # (N, C)

    # ---- NUM_LAYERS ConvbertLayers (ALBERT-style shared weights), unrolled ----
    for _ in range(NUM_LAYERS):
        # Fused V-projection + lane-expanded per-tap conv logits in ONE (N,128) full-tile
        # matmul; the (N,128) vec-slab add applies bv (lanes 0:C) and bq + attention mask
        # (tap slabs) in a single VPU add.
        qv = mm(x, w_ref[R_QVE:R_QVE + C, :]) + v_ref[RV_MB:RV_MB + N, :]       # (N, 128)
        v = qv[:, 0:C]                                                          # value proj + bv
        logit = [qv[:, (k + 1) * C:(k + 2) * C] for k in range(K)]              # K x (N, C)

        # per-head softmax over the K taps, done in the lane-expanded domain
        m = logit[0]
        for lk in logit[1:]:
            m = jnp.maximum(m, lk)                                              # exact per-head max
        e = [jnp.exp(lk - m) for lk in logit]
        den = e[0]
        for ek in e[1:]:
            den = den + ek

        # dynamic conv taps: one stacked shift matmul reproducing unfold1d's as_strided read
        # pattern exactly (including its cross-batch flat-stride quirk and zero padding)
        sv = mm(w_ref[R_S:R_S + K * N, 0:N], v)                                 # (K*N, C)
        acc = sv[0:N, :] * e[0]
        for k in range(1, K):
            acc = acc + sv[k * N:(k + 1) * N, :] * e[k]
        conv = acc * pl.reciprocal(den, approx=False)                           # EUP, off VALU path

        # dense projection (einsum 'bfnd,ndh->bfh' == flat matmul) + residual + LN
        proj = mm(conv, w_ref[R_WD:R_WD + C, 0:C]) + v_ref[RV_BD:RV_BD + 1, 0:C]
        attn = layernorm(x + proj, RV_LN1G, RV_LN1B)

        # feed-forward (gelu_new) + residual + LN
        h1 = _gelu_new(mm(attn, w_ref[R_W1:R_W1 + C, 0:I]) + v_ref[RV_B1:RV_B1 + 1, 0:I])
        h2 = mm(h1, w_ref[R_W2:R_W2 + I, 0:C]) + v_ref[RV_B2:RV_B2 + 1, 0:C]
        x = layernorm(h2 + attn, RV_LN2G, RV_LN2B)

    o_ref[...] = x


# ----------------------------- host-side constants ---------------------------
def _build_shift_stack():
    """K stacked (N, N) 0/1 matrices: row i of tap k reads flat padded row (i + k) of the
    zero-padded (B*P, C) value buffer (unfold1d's as_strided pattern, incl. its quirk)."""
    S = np.zeros((K * N, N), np.float32)
    for k in range(K):
        for i in range(N):
            r = i + k
            b_, off = divmod(r, P)
            if b_ < B and PAD_L <= off < PAD_L + T:
                S[k * N + i, b_ * T + off - PAD_L] = 1.0
    return S


_S_STACK = _build_shift_stack()
_HEAD_OF_LANE = np.arange(C) // R           # lane c belongs to head c // R


def unfold_mask(attention_mask):
    """ConvbertTransformer.unfold1d on the (B, T) additive mask (pad_value=-10000),
    including the module's as_strided flat-read quirk.  Returns (N, K)."""
    padded = jnp.full((B, P), -10000.0, dtype=jnp.float32)
    padded = padded.at[:, PAD_L:PAD_L + T].set(attention_mask.astype(jnp.float32))
    flat = padded.reshape(B * P)
    return jnp.stack([flat[k:k + N] for k in range(K)], axis=1)     # (N, K)


# ----------------------------- slab packing ----------------------------------
def _pad_lanes(a):
    return jnp.pad(a, ((0, 0), (0, LANES - a.shape[1])))


def _pack_weight_slab(p):
    """One lane-dense (ROWS_W, 128) f32 slab holding every weight + structural constant."""
    wq = p["wq"]                                                       # (C, HK)
    # column-duplicate wq so x @ wqe_k directly yields tap-k logits lane-expanded to (N, C)
    wqe = jnp.concatenate([wq[:, _HEAD_OF_LANE * K + k] for k in range(K)], axis=1)  # (C, K*C)
    w_qve = jnp.concatenate([p["wv"], wqe], axis=1)                    # (C, (K+1)*C)
    blocks = [
        _pad_lanes(p["emb_w"]),                                        # rows R_EMBW
        _pad_lanes(w_qve),                                             # rows R_QVE
        _pad_lanes(p["wd"]),                                           # rows R_WD
        _pad_lanes(p["w1"]),                                           # rows R_W1
        _pad_lanes(p["w2"]),                                           # rows R_W2
        _pad_lanes(jnp.asarray(_S_STACK)),                             # rows R_S
    ]
    slab = jnp.concatenate(blocks, axis=0)
    assert slab.shape == (ROWS_W, LANES)
    return slab


def _pack_vector_slab(p, mask_nk):
    """One (ROWS_V, 128) slab: biases / LN params (rows 0:8) and the per-row bias+mask
    expansion added to the fused QV matmul output (rows 8:8+N)."""
    mb_cols = [jnp.broadcast_to(p["bv"], (N, C))]                      # lanes 0:C -> value bias
    for k in range(K):
        bqk = p["bq"][0, _HEAD_OF_LANE * K + k]                        # (C,) tap-k query bias
        mb_cols.append(mask_nk[:, k:k + 1] + bqk[None, :])             # (N, C) tap-k bias + mask
    mb = jnp.concatenate(mb_cols, axis=1)                              # (N, (K+1)*C)
    rows = [
        _pad_lanes(p["emb_b"]), _pad_lanes(p["bd"]),
        _pad_lanes(p["ln1_g"]), _pad_lanes(p["ln1_b"]),
        _pad_lanes(p["b1"]), _pad_lanes(p["b2"]),
        _pad_lanes(p["ln2_g"]), _pad_lanes(p["ln2_b"]),
        _pad_lanes(mb),
    ]
    slab = jnp.concatenate(rows, axis=0)
    assert slab.shape == (ROWS_V, LANES)
    return slab


# ----------------------------- wrapper ----------------------------------------
@jax.jit
def convbert_transformer(hidden_states, attention_mask, params):
    """hidden_states: (B, T, E) f32; attention_mask: (B, T) additive mask (0 / -10000)."""
    x = hidden_states.reshape(N, E).astype(jnp.float32)
    mask_nk = unfold_mask(attention_mask)
    w_slab = _pack_weight_slab(params)
    v_slab = _pack_vector_slab(params, mask_nk)
    out = pl.pallas_call(
        fused_kernel,
        out_shape=jax.ShapeDtypeStruct((N, C), jnp.float32),
        in_specs=[pl.BlockSpec(memory_space=pltpu.MemorySpace.VMEM)] * 3,
        out_specs=pl.BlockSpec(memory_space=pltpu.MemorySpace.VMEM),
    )(x, w_slab, v_slab)
    return out.reshape(B, T, C)


# ----------------------------- pure-JAX reference ---------------------------
def _layernorm_ref(x, g, b):
    mu = jnp.mean(x, axis=-1, keepdims=True)
    xc = x - mu
    var = jnp.mean(xc * xc, axis=-1, keepdims=True)
    return xc * jax.lax.rsqrt(var + EPS) * g + b


def _ref_forward(hidden_states, attention_mask, p):
    dot = lambda a, b: jnp.dot(a, b, precision=HIGHEST)
    x = dot(hidden_states.reshape(N, E).astype(jnp.float32), p["emb_w"]) + p["emb_b"]
    mask_nk = unfold_mask(attention_mask)
    for _ in range(NUM_LAYERS):
        q = dot(x, p["wq"]) + p["bq"]
        v = dot(x, p["wv"]) + p["bv"]
        pad_v = jnp.zeros((B * P, C), jnp.float32)
        for b in range(B):
            pad_v = pad_v.at[b * P + PAD_L:b * P + PAD_L + T].set(v[b * T:(b + 1) * T])
        outs = []
        for h in range(H):
            w = jax.nn.softmax(q[:, h * K:(h + 1) * K] + mask_nk, axis=-1)
            acc = jnp.zeros((N, R), jnp.float32)
            for k in range(K):
                acc = acc + pad_v[k:k + N, h * R:(h + 1) * R] * w[:, k:k + 1]
            outs.append(acc)
        conv_out = jnp.concatenate(outs, axis=1)
        proj = dot(conv_out, p["wd"]) + p["bd"]
        attn = _layernorm_ref(x + proj, p["ln1_g"], p["ln1_b"])
        h1 = _gelu_new(dot(attn, p["w1"]) + p["b1"])
        h2 = dot(h1, p["w2"]) + p["b2"]
        x = _layernorm_ref(h2 + attn, p["ln2_g"], p["ln2_b"])
    return x.reshape(B, T, C)


# ----------------------------- params ---------------------------------------
def make_params(key):
    ks = jax.random.split(key, 12)
    f = lambda k, s: (0.02 * jax.random.normal(k, s)).astype(jnp.float32)
    return {
        "emb_w": f(ks[0], (E, C)), "emb_b": jnp.zeros((1, C), jnp.float32),
        "wq": f(ks[1], (C, HK)), "bq": f(ks[2], (1, HK)),
        "wv": f(ks[3], (C, C)), "bv": f(ks[4], (1, C)),
        "wd": f(ks[5], (C, C)), "bd": f(ks[6], (1, C)),
        "ln1_g": jnp.ones((1, C), jnp.float32), "ln1_b": jnp.zeros((1, C), jnp.float32),
        "w1": f(ks[7], (C, I)), "b1": f(ks[8], (1, I)),
        "w2": f(ks[9], (I, C)), "b2": f(ks[10], (1, C)),
        "ln2_g": jnp.ones((1, C), jnp.float32), "ln2_b": jnp.zeros((1, C), jnp.float32),
    }


# ----------------------------- main ------------------------------------------
if __name__ == "__main__":
    key = jax.random.PRNGKey(0)
    kx, kp = jax.random.split(key)
    hidden_states = jax.random.normal(kx, (B, T, E), dtype=jnp.float32)
    # additive attention mask: 0 = attend, -10000 = masked (last 2 tokens of batch 1)
    attention_mask = jnp.zeros((B, T), jnp.float32).at[1, T - 2:].set(-10000.0)

    params = make_params(kp)

    out = convbert_transformer(hidden_states, attention_mask, params)
    out = jax.block_until_ready(out)

    ref = _ref_forward(hidden_states, attention_mask, params)

    assert out.shape == (B, T, C)
    assert bool(jnp.all(jnp.isfinite(out)))
    assert bool(jnp.allclose(out, ref, rtol=2e-3, atol=2e-3)), "mismatch vs reference"

    print("KERNEL_OK")
</pallas_src>

<mosaic_0001>
module attributes {stable_mosaic.version = 11 : i64} {
  func.func @fused_kernel(%arg0: memref<16x16xf32, #tpu.memory_space<vmem>>, %arg1: memref<224x128xf32, #tpu.memory_space<vmem>>, %arg2: memref<24x128xf32, #tpu.memory_space<vmem>>, %arg3: memref<16x32xf32, #tpu.memory_space<vmem>>) attributes {dimension_semantics = [], scalar_prefetch = 0 : i64, scratch_operands = 0 : i64, tpu.core_type = #tpu.core_type<tc>} {
    %c0 = arith.constant 0 : index
    %c0_0 = arith.constant 0 : index
    %0 = vector.load %arg0[%c0, %c0_0] : memref<16x16xf32, #tpu.memory_space<vmem>>, vector<16x16xf32>
    %c0_1 = arith.constant 0 : index
    %c0_2 = arith.constant 0 : index
    %1 = vector.load %arg1[%c0_1, %c0_2] : memref<224x128xf32, #tpu.memory_space<vmem>>, vector<16x32xf32>
    %cst = arith.constant dense<0.000000e+00> : vector<16x32xf32>
    %2 = tpu.matmul %0, %1, %cst {dimension_numbers = #tpu.dot_dimension_numbers<[1], [0], [0], [1], [0, 0, 1, 1], [], []>, precision = #tpu.contract_precision<fp32>} : vector<16x16xf32>, vector<16x32xf32>, vector<16x32xf32> -> vector<16x32xf32>
    %c0_3 = arith.constant 0 : index
    %c0_4 = arith.constant 0 : index
    %3 = vector.load %arg2[%c0_3, %c0_4] : memref<24x128xf32, #tpu.memory_space<vmem>>, vector<1x32xf32>
    %4 = vector.broadcast %3 : vector<1x32xf32> to vector<16x32xf32>
    %5 = arith.addf %2, %4 : vector<16x32xf32>
    %c16 = arith.constant 16 : index
    %c0_5 = arith.constant 0 : index
    %6 = vector.load %arg1[%c16, %c0_5] : memref<224x128xf32, #tpu.memory_space<vmem>>, vector<32x128xf32>
    %cst_6 = arith.constant dense<0.000000e+00> : vector<16x128xf32>
    %7 = tpu.matmul %5, %6, %cst_6 {dimension_numbers = #tpu.dot_dimension_numbers<[1], [0], [0], [1], [0, 0, 1, 1], [], []>, precision = #tpu.contract_precision<fp32>} : vector<16x32xf32>, vector<32x128xf32>, vector<16x128xf32> -> vector<16x128xf32>
    %c8 = arith.constant 8 : index
    %c0_7 = arith.constant 0 : index
    %8 = vector.load %arg2[%c8, %c0_7] : memref<24x128xf32, #tpu.memory_space<vmem>>, vector<16x128xf32>
    %9 = arith.addf %7, %8 : vector<16x128xf32>
    %10 = vector.extract_strided_slice %9 {offsets = [0, 0], sizes = [16, 32], strides = [1, 1]} : vector<16x128xf32> to vector<16x32xf32>
    %11 = vector.extract_strided_slice %9 {offsets = [0, 32], sizes = [16, 32], strides = [1, 1]} : vector<16x128xf32> to vector<16x32xf32>
    %12 = vector.extract_strided_slice %9 {offsets = [0, 64], sizes = [16, 32], strides = [1, 1]} : vector<16x128xf32> to vector<16x32xf32>
    %13 = vector.extract_strided_slice %9 {offsets = [0, 96], sizes = [16, 32], strides = [1, 1]} : vector<16x128xf32> to vector<16x32xf32>
    %14 = arith.maximumf %11, %12 : vector<16x32xf32>
    %15 = arith.maximumf %14, %13 : vector<16x32xf32>
    %16 = arith.subf %11, %15 : vector<16x32xf32>
    %17 = math.exp %16 : vector<16x32xf32>
    %18 = arith.subf %12, %15 : vector<16x32xf32>
    %19 = math.exp %18 : vector<16x32xf32>
    %20 = arith.subf %13, %15 : vector<16x32xf32>
    %21 = math.exp %20 : vector<16x32xf32>
    %22 = arith.addf %17, %19 : vector<16x32xf32>
    %23 = arith.addf %22, %21 : vector<16x32xf32>
    %c176 = arith.constant 176 : index
    %c0_8 = arith.constant 0 : index
    %24 = vector.load %arg1[%c176, %c0_8] : memref<224x128xf32, #tpu.memory_space<vmem>>, vector<48x16xf32>
    %cst_9 = arith.constant dense<0.000000e+00> : vector<48x32xf32>
    %25 = tpu.matmul %24, %10, %cst_9 {dimension_numbers = #tpu.dot_dimension_numbers<[1], [0], [0], [1], [0, 0, 1, 1], [], []>, precision = #tpu.contract_precision<fp32>} : vector<48x16xf32>, vector<16x32xf32>, vector<48x32xf32> -> vector<48x32xf32>
    %26 = vector.extract_strided_slice %25 {offsets = [0, 0], sizes = [16, 32], strides = [1, 1]} : vector<48x32xf32> to vector<16x32xf32>
    %27 = arith.mulf %26, %17 : vector<16x32xf32>
    %28 = vector.extract_strided_slice %25 {offsets = [16, 0], sizes = [16, 32], strides = [1, 1]} : vector<48x32xf32> to vector<16x32xf32>
    %29 = arith.mulf %28, %19 : vector<16x32xf32>
    %30 = arith.addf %27, %29 : vector<16x32xf32>
    %31 = vector.extract_strided_slice %25 {offsets = [32, 0], sizes = [16, 32], strides = [1, 1]} : vector<48x32xf32> to vector<16x32xf32>
    %32 = arith.mulf %31, %21 : vector<16x32xf32>
    %33 = arith.addf %30, %32 : vector<16x32xf32>
    %34 = tpu.reciprocal %23 : vector<16x32xf32> -> vector<16x32xf32>
    %35 = arith.mulf %33, %34 : vector<16x32xf32>
    %c48 = arith.constant 48 : index
    %c0_10 = arith.constant 0 : index
    %36 = vector.load %arg1[%c48, %c0_10] : memref<224x128xf32, #tpu.memory_space<vmem>>, vector<32x32xf32>
    %cst_11 = arith.constant dense<0.000000e+00> : vector<16x32xf32>
    %37 = tpu.matmul %35, %36, %cst_11 {dimension_numbers = #tpu.dot_dimension_numbers<[1], [0], [0], [1], [0, 0, 1, 1], [], []>, precision = #tpu.contract_precision<fp32>} : vector<16x32xf32>, vector<32x32xf32>, vector<16x32xf32> -> vector<16x32xf32>
    %c1 = arith.constant 1 : index
    %c0_12 = arith.constant 0 : index
    %38 = vector.load %arg2[%c1, %c0_12] : memref<24x128xf32, #tpu.memory_space<vmem>>, vector<1x32xf32>
    %39 = vector.broadcast %38 : vector<1x32xf32> to vector<16x32xf32>
    %40 = arith.addf %37, %39 : vector<16x32xf32>
    %41 = arith.addf %5, %40 : vector<16x32xf32>
    %c2 = arith.constant 2 : index
    %c0_13 = arith.constant 0 : index
    %42 = vector.load %arg2[%c2, %c0_13] : memref<24x128xf32, #tpu.memory_space<vmem>>, vector<1x32xf32>
    %c3 = arith.constant 3 : index
    %c0_14 = arith.constant 0 : index
    %43 = vector.load %arg2[%c3, %c0_14] : memref<24x128xf32, #tpu.memory_space<vmem>>, vector<1x32xf32>
    %cst_15 = arith.constant dense<0.000000e+00> : vector<16xf32>
    %44 = vector.multi_reduction <add>, %41, %cst_15 [1] : vector<16x32xf32> to vector<16xf32>
    %45 = vector.shape_cast %44 : vector<16xf32> to vector<16x1xf32>
    %cst_16 = arith.constant 3.200000e+01 : f32
    %46 = vector.broadcast %cst_16 : f32 to vector<16x1xf32>
    %47 = arith.divf %45, %46 : vector<16x1xf32>
    %48 = vector.broadcast %47 : vector<16x1xf32> to vector<16x32xf32>
    %49 = arith.subf %41, %48 : vector<16x32xf32>
    %50 = arith.mulf %49, %49 : vector<16x32xf32>
    %cst_17 = arith.constant dense<0.000000e+00> : vector<16xf32>
    %51 = vector.multi_reduction <add>, %50, %cst_17 [1] : vector<16x32xf32> to vector<16xf32>
    %52 = vector.shape_cast %51 : vector<16xf32> to vector<16x1xf32>
    %cst_18 = arith.constant 3.200000e+01 : f32
    %53 = vector.broadcast %cst_18 : f32 to vector<16x1xf32>
    %54 = arith.divf %52, %53 : vector<16x1xf32>
    %cst_19 = arith.constant 9.99999996E-13 : f32
    %55 = vector.broadcast %cst_19 : f32 to vector<16x1xf32>
    %56 = arith.addf %54, %55 : vector<16x1xf32>
    %57 = math.rsqrt %56 : vector<16x1xf32>
    %58 = vector.broadcast %57 : vector<16x1xf32> to vector<16x32xf32>
    %59 = arith.mulf %49, %58 : vector<16x32xf32>
    %60 = vector.broadcast %42 : vector<1x32xf32> to vector<16x32xf32>
    %61 = arith.mulf %59, %60 : vector<16x32xf32>
    %62 = vector.broadcast %43 : vector<1x32xf32> to vector<16x32xf32>
    %63 = arith.addf %61, %62 : vector<16x32xf32>
    %c80 = arith.constant 80 : index
    %c0_20 = arith.constant 0 : index
    %64 = vector.load %arg1[%c80, %c0_20] : memref<224x128xf32, #tpu.memory_space<vmem>>, vector<32x64xf32>
    %cst_21 = arith.constant dense<0.000000e+00> : vector<16x64xf32>
    %65 = tpu.matmul %63, %64, %cst_21 {dimension_numbers = #tpu.dot_dimension_numbers<[1], [0], [0], [1], [0, 0, 1, 1], [], []>, precision = #tpu.contract_precision<fp32>} : vector<16x32xf32>, vector<32x64xf32>, vector<16x64xf32> -> vector<16x64xf32>
    %c4 = arith.constant 4 : index
    %c0_22 = arith.constant 0 : index
    %66 = vector.load %arg2[%c4, %c0_22] : memref<24x128xf32, #tpu.memory_space<vmem>>, vector<1x64xf32>
    %67 = vector.broadcast %66 : vector<1x64xf32> to vector<16x64xf32>
    %68 = arith.addf %65, %67 : vector<16x64xf32>
    %cst_23 = arith.constant 5.000000e-01 : f32
    %69 = vector.broadcast %cst_23 : f32 to vector<16x64xf32>
    %70 = arith.mulf %69, %68 : vector<16x64xf32>
    %cst_24 = arith.constant 4.471500e-02 : f32
    %71 = vector.broadcast %cst_24 : f32 to vector<16x64xf32>
    %72 = arith.mulf %71, %68 : vector<16x64xf32>
    %73 = arith.mulf %72, %68 : vector<16x64xf32>
    %74 = arith.mulf %73, %68 : vector<16x64xf32>
    %75 = arith.addf %68, %74 : vector<16x64xf32>
    %cst_25 = arith.constant 0.797884583 : f32
    %76 = vector.broadcast %cst_25 : f32 to vector<16x64xf32>
    %77 = arith.mulf %76, %75 : vector<16x64xf32>
    %78 = math.tanh %77 : vector<16x64xf32>
    %cst_26 = arith.constant 1.000000e+00 : f32
    %79 = vector.broadcast %cst_26 : f32 to vector<16x64xf32>
    %80 = arith.addf %79, %78 : vector<16x64xf32>
    %81 = arith.mulf %70, %80 : vector<16x64xf32>
    %c112 = arith.constant 112 : index
    %c0_27 = arith.constant 0 : index
    %82 = vector.load %arg1[%c112, %c0_27] : memref<224x128xf32, #tpu.memory_space<vmem>>, vector<64x32xf32>
    %cst_28 = arith.constant dense<0.000000e+00> : vector<16x32xf32>
    %83 = tpu.matmul %81, %82, %cst_28 {dimension_numbers = #tpu.dot_dimension_numbers<[1], [0], [0], [1], [0, 0, 1, 1], [], []>, precision = #tpu.contract_precision<fp32>} : vector<16x64xf32>, vector<64x32xf32>, vector<16x32xf32> -> vector<16x32xf32>
    %c5 = arith.constant 5 : index
    %c0_29 = arith.constant 0 : index
    %84 = vector.load %arg2[%c5, %c0_29] : memref<24x128xf32, #tpu.memory_space<vmem>>, vector<1x32xf32>
    %85 = vector.broadcast %84 : vector<1x32xf32> to vector<16x32xf32>
    %86 = arith.addf %83, %85 : vector<16x32xf32>
    %87 = arith.addf %86, %63 : vector<16x32xf32>
    %c6 = arith.constant 6 : index
    %c0_30 = arith.constant 0 : index
    %88 = vector.load %arg2[%c6, %c0_30] : memref<24x128xf32, #tpu.memory_space<vmem>>, vector<1x32xf32>
    %c7 = arith.constant 7 : index
    %c0_31 = arith.constant 0 : index
    %89 = vector.load %arg2[%c7, %c0_31] : memref<24x128xf32, #tpu.memory_space<vmem>>, vector<1x32xf32>
    %cst_32 = arith.constant dense<0.000000e+00> : vector<16xf32>
    %90 = vector.multi_reduction <add>, %87, %cst_32 [1] : vector<16x32xf32> to vector<16xf32>
    %91 = vector.shape_cast %90 : vector<16xf32> to vector<16x1xf32>
    %cst_33 = arith.constant 3.200000e+01 : f32
    %92 = vector.broadcast %cst_33 : f32 to vector<16x1xf32>
    %93 = arith.divf %91, %92 : vector<16x1xf32>
    %94 = vector.broadcast %93 : vector<16x1xf32> to vector<16x32xf32>
    %95 = arith.subf %87, %94 : vector<16x32xf32>
    %96 = arith.mulf %95, %95 : vector<16x32xf32>
    %cst_34 = arith.constant dense<0.000000e+00> : vector<16xf32>
    %97 = vector.multi_reduction <add>, %96, %cst_34 [1] : vector<16x32xf32> to vector<16xf32>
    %98 = vector.shape_cast %97 : vector<16xf32> to vector<16x1xf32>
    %cst_35 = arith.constant 3.200000e+01 : f32
    %99 = vector.broadcast %cst_35 : f32 to vector<16x1xf32>
    %100 = arith.divf %98, %99 : vector<16x1xf32>
    %cst_36 = arith.constant 9.99999996E-13 : f32
    %101 = vector.broadcast %cst_36 : f32 to vector<16x1xf32>
    %102 = arith.addf %100, %101 : vector<16x1xf32>
    %103 = math.rsqrt %102 : vector<16x1xf32>
    %104 = vector.broadcast %103 : vector<16x1xf32> to vector<16x32xf32>
    %105 = arith.mulf %95, %104 : vector<16x32xf32>
    %106 = vector.broadcast %88 : vector<1x32xf32> to vector<16x32xf32>
    %107 = arith.mulf %105, %106 : vector<16x32xf32>
    %108 = vector.broadcast %89 : vector<1x32xf32> to vector<16x32xf32>
    %109 = arith.addf %107, %108 : vector<16x32xf32>
    %c16_37 = arith.constant 16 : index
    %c0_38 = arith.constant 0 : index
    %110 = vector.load %arg1[%c16_37, %c0_38] : memref<224x128xf32, #tpu.memory_space<vmem>>, vector<32x128xf32>
    %cst_39 = arith.constant dense<0.000000e+00> : vector<16x128xf32>
    %111 = tpu.matmul %109, %110, %cst_39 {dimension_numbers = #tpu.dot_dimension_numbers<[1], [0], [0], [1], [0, 0, 1, 1], [], []>, precision = #tpu.contract_precision<fp32>} : vector<16x32xf32>, vector<32x128xf32>, vector<16x128xf32> -> vector<16x128xf32>
    %c8_40 = arith.constant 8 : index
    %c0_41 = arith.constant 0 : index
    %112 = vector.load %arg2[%c8_40, %c0_41] : memref<24x128xf32, #tpu.memory_space<vmem>>, vector<16x128xf32>
    %113 = arith.addf %111, %112 : vector<16x128xf32>
    %114 = vector.extract_strided_slice %113 {offsets = [0, 0], sizes = [16, 32], strides = [1, 1]} : vector<16x128xf32> to vector<16x32xf32>
    %115 = vector.extract_strided_slice %113 {offsets = [0, 32], sizes = [16, 32], strides = [1, 1]} : vector<16x128xf32> to vector<16x32xf32>
    %116 = vector.extract_strided_slice %113 {offsets = [0, 64], sizes = [16, 32], strides = [1, 1]} : vector<16x128xf32> to vector<16x32xf32>
    %117 = vector.extract_strided_slice %113 {offsets = [0, 96], sizes = [16, 32], strides = [1, 1]} : vector<16x128xf32> to vector<16x32xf32>
    %118 = arith.maximumf %115, %116 : vector<16x32xf32>
    %119 = arith.maximumf %118, %117 : vector<16x32xf32>
    %120 = arith.subf %115, %119 : vector<16x32xf32>
    %121 = math.exp %120 : vector<16x32xf32>
    %122 = arith.subf %116, %119 : vector<16x32xf32>
    %123 = math.exp %122 : vector<16x32xf32>
    %124 = arith.subf %117, %119 : vector<16x32xf32>
    %125 = math.exp %124 : vector<16x32xf32>
    %126 = arith.addf %121, %123 : vector<16x32xf32>
    %127 = arith.addf %126, %125 : vector<16x32xf32>
    %c176_42 = arith.constant 176 : index
    %c0_43 = arith.constant 0 : index
    %128 = vector.load %arg1[%c176_42, %c0_43] : memref<224x128xf32, #tpu.memory_space<vmem>>, vector<48x16xf32>
    %cst_44 = arith.constant dense<0.000000e+00> : vector<48x32xf32>
    %129 = tpu.matmul %128, %114, %cst_44 {dimension_numbers = #tpu.dot_dimension_numbers<[1], [0], [0], [1], [0, 0, 1, 1], [], []>, precision = #tpu.contract_precision<fp32>} : vector<48x16xf32>, vector<16x32xf32>, vector<48x32xf32> -> vector<48x32xf32>
    %130 = vector.extract_strided_slice %129 {offsets = [0, 0], sizes = [16, 32], strides = [1, 1]} : vector<48x32xf32> to vector<16x32xf32>
    %131 = arith.mulf %130, %121 : vector<16x32xf32>
    %132 = vector.extract_strided_slice %129 {offsets = [16, 0], sizes = [16, 32], strides = [1, 1]} : vector<48x32xf32> to vector<16x32xf32>
    %133 = arith.mulf %132, %123 : vector<16x32xf32>
    %134 = arith.addf %131, %133 : vector<16x32xf32>
    %135 = vector.extract_strided_slice %129 {offsets = [32, 0], sizes = [16, 32], strides = [1, 1]} : vector<48x32xf32> to vector<16x32xf32>
    %136 = arith.mulf %135, %125 : vector<16x32xf32>
    %137 = arith.addf %134, %136 : vector<16x32xf32>
    %138 = tpu.reciprocal %127 : vector<16x32xf32> -> vector<16x32xf32>
    %139 = arith.mulf %137, %138 : vector<16x32xf32>
    %c48_45 = arith.constant 48 : index
    %c0_46 = arith.constant 0 : index
    %140 = vector.load %arg1[%c48_45, %c0_46] : memref<224x128xf32, #tpu.memory_space<vmem>>, vector<32x32xf32>
    %cst_47 = arith.constant dense<0.000000e+00> : vector<16x32xf32>
    %141 = tpu.matmul %139, %140, %cst_47 {dimension_numbers = #tpu.dot_dimension_numbers<[1], [0], [0], [1], [0, 0, 1, 1], [], []>, precision = #tpu.contract_precision<fp32>} : vector<16x32xf32>, vector<32x32xf32>, vector<16x32xf32> -> vector<16x32xf32>
    %c1_48 = arith.constant 1 : index
    %c0_49 = arith.constant 0 : index
    %142 = vector.load %arg2[%c1_48, %c0_49] : memref<24x128xf32, #tpu.memory_space<vmem>>, vector<1x32xf32>
    %143 = vector.broadcast %142 : vector<1x32xf32> to vector<16x32xf32>
    %144 = arith.addf %141, %143 : vector<16x32xf32>
    %145 = arith.addf %109, %144 : vector<16x32xf32>
    %c2_50 = arith.constant 2 : index
    %c0_51 = arith.constant 0 : index
    %146 = vector.load %arg2[%c2_50, %c0_51] : memref<24x128xf32, #tpu.memory_space<vmem>>, vector<1x32xf32>
    %c3_52 = arith.constant 3 : index
    %c0_53 = arith.constant 0 : index
    %147 = vector.load %arg2[%c3_52, %c0_53] : memref<24x128xf32, #tpu.memory_space<vmem>>, vector<1x32xf32>
    %cst_54 = arith.constant dense<0.000000e+00> : vector<16xf32>
    %148 = vector.multi_reduction <add>, %145, %cst_54 [1] : vector<16x32xf32> to vector<16xf32>
    %149 = vector.shape_cast %148 : vector<16xf32> to vector<16x1xf32>
    %cst_55 = arith.constant 3.200000e+01 : f32
    %150 = vector.broadcast %cst_55 : f32 to vector<16x1xf32>
    %151 = arith.divf %149, %150 : vector<16x1xf32>
    %152 = vector.broadcast %151 : vector<16x1xf32> to vector<16x32xf32>
    %153 = arith.subf %145, %152 : vector<16x32xf32>
    %154 = arith.mulf %153, %153 : vector<16x32xf32>
    %cst_56 = arith.constant dense<0.000000e+00> : vector<16xf32>
    %155 = vector.multi_reduction <add>, %154, %cst_56 [1] : vector<16x32xf32> to vector<16xf32>
    %156 = vector.shape_cast %155 : vector<16xf32> to vector<16x1xf32>
    %cst_57 = arith.constant 3.200000e+01 : f32
    %157 = vector.broadcast %cst_57 : f32 to vector<16x1xf32>
    %158 = arith.divf %156, %157 : vector<16x1xf32>
    %cst_58 = arith.constant 9.99999996E-13 : f32
    %159 = vector.broadcast %cst_58 : f32 to vector<16x1xf32>
    %160 = arith.addf %158, %159 : vector<16x1xf32>
    %161 = math.rsqrt %160 : vector<16x1xf32>
    %162 = vector.broadcast %161 : vector<16x1xf32> to vector<16x32xf32>
    %163 = arith.mulf %153, %162 : vector<16x32xf32>
    %164 = vector.broadcast %146 : vector<1x32xf32> to vector<16x32xf32>
    %165 = arith.mulf %163, %164 : vector<16x32xf32>
    %166 = vector.broadcast %147 : vector<1x32xf32> to vector<16x32xf32>
    %167 = arith.addf %165, %166 : vector<16x32xf32>
    %c80_59 = arith.constant 80 : index
    %c0_60 = arith.constant 0 : index
    %168 = vector.load %arg1[%c80_59, %c0_60] : memref<224x128xf32, #tpu.memory_space<vmem>>, vector<32x64xf32>
    %cst_61 = arith.constant dense<0.000000e+00> : vector<16x64xf32>
    %169 = tpu.matmul %167, %168, %cst_61 {dimension_numbers = #tpu.dot_dimension_numbers<[1], [0], [0], [1], [0, 0, 1, 1], [], []>, precision = #tpu.contract_precision<fp32>} : vector<16x32xf32>, vector<32x64xf32>, vector<16x64xf32> -> vector<16x64xf32>
    %c4_62 = arith.constant 4 : index
    %c0_63 = arith.constant 0 : index
    %170 = vector.load %arg2[%c4_62, %c0_63] : memref<24x128xf32, #tpu.memory_space<vmem>>, vector<1x64xf32>
    %171 = vector.broadcast %170 : vector<1x64xf32> to vector<16x64xf32>
    %172 = arith.addf %169, %171 : vector<16x64xf32>
    %cst_64 = arith.constant 5.000000e-01 : f32
    %173 = vector.broadcast %cst_64 : f32 to vector<16x64xf32>
    %174 = arith.mulf %173, %172 : vector<16x64xf32>
    %cst_65 = arith.constant 4.471500e-02 : f32
    %175 = vector.broadcast %cst_65 : f32 to vector<16x64xf32>
    %176 = arith.mulf %175, %172 : vector<16x64xf32>
    %177 = arith.mulf %176, %172 : vector<16x64xf32>
    %178 = arith.mulf %177, %172 : vector<16x64xf32>
    %179 = arith.addf %172, %178 : vector<16x64xf32>
    %cst_66 = arith.constant 0.797884583 : f32
    %180 = vector.broadcast %cst_66 : f32 to vector<16x64xf32>
    %181 = arith.mulf %180, %179 : vector<16x64xf32>
    %182 = math.tanh %181 : vector<16x64xf32>
    %cst_67 = arith.constant 1.000000e+00 : f32
    %183 = vector.broadcast %cst_67 : f32 to vector<16x64xf32>
    %184 = arith.addf %183, %182 : vector<16x64xf32>
    %185 = arith.mulf %174, %184 : vector<16x64xf32>
    %c112_68 = arith.constant 112 : index
    %c0_69 = arith.constant 0 : index
    %186 = vector.load %arg1[%c112_68, %c0_69] : memref<224x128xf32, #tpu.memory_space<vmem>>, vector<64x32xf32>
    %cst_70 = arith.constant dense<0.000000e+00> : vector<16x32xf32>
    %187 = tpu.matmul %185, %186, %cst_70 {dimension_numbers = #tpu.dot_dimension_numbers<[1], [0], [0], [1], [0, 0, 1, 1], [], []>, precision = #tpu.contract_precision<fp32>} : vector<16x64xf32>, vector<64x32xf32>, vector<16x32xf32> -> vector<16x32xf32>
    %c5_71 = arith.constant 5 : index
    %c0_72 = arith.constant 0 : index
    %188 = vector.load %arg2[%c5_71, %c0_72] : memref<24x128xf32, #tpu.memory_space<vmem>>, vector<1x32xf32>
    %189 = vector.broadcast %188 : vector<1x32xf32> to vector<16x32xf32>
    %190 = arith.addf %187, %189 : vector<16x32xf32>
    %191 = arith.addf %190, %167 : vector<16x32xf32>
    %c6_73 = arith.constant 6 : index
    %c0_74 = arith.constant 0 : index
    %192 = vector.load %arg2[%c6_73, %c0_74] : memref<24x128xf32, #tpu.memory_space<vmem>>, vector<1x32xf32>
    %c7_75 = arith.constant 7 : index
    %c0_76 = arith.constant 0 : index
    %193 = vector.load %arg2[%c7_75, %c0_76] : memref<24x128xf32, #tpu.memory_space<vmem>>, vector<1x32xf32>
    %cst_77 = arith.constant dense<0.000000e+00> : vector<16xf32>
    %194 = vector.multi_reduction <add>, %191, %cst_77 [1] : vector<16x32xf32> to vector<16xf32>
    %195 = vector.shape_cast %194 : vector<16xf32> to vector<16x1xf32>
    %cst_78 = arith.constant 3.200000e+01 : f32
    %196 = vector.broadcast %cst_78 : f32 to vector<16x1xf32>
    %197 = arith.divf %195, %196 : vector<16x1xf32>
    %198 = vector.broadcast %197 : vector<16x1xf32> to vector<16x32xf32>
    %199 = arith.subf %191, %198 : vector<16x32xf32>
    %200 = arith.mulf %199, %199 : vector<16x32xf32>
    %cst_79 = arith.constant dense<0.000000e+00> : vector<16xf32>
    %201 = vector.multi_reduction <add>, %200, %cst_79 [1] : vector<16x32xf32> to vector<16xf32>
    %202 = vector.shape_cast %201 : vector<16xf32> to vector<16x1xf32>
    %cst_80 = arith.constant 3.200000e+01 : f32
    %203 = vector.broadcast %cst_80 : f32 to vector<16x1xf32>
    %204 = arith.divf %202, %203 : vector<16x1xf32>
    %cst_81 = arith.constant 9.99999996E-13 : f32
    %205 = vector.broadcast %cst_81 : f32 to vector<16x1xf32>
    %206 = arith.addf %204, %205 : vector<16x1xf32>
    %207 = math.rsqrt %206 : vector<16x1xf32>
    %208 = vector.broadcast %207 : vector<16x1xf32> to vector<16x32xf32>
    %209 = arith.mulf %199, %208 : vector<16x32xf32>
    %210 = vector.broadcast %192 : vector<1x32xf32> to vector<16x32xf32>
    %211 = arith.mulf %209, %210 : vector<16x32xf32>
    %212 = vector.broadcast %193 : vector<1x32xf32> to vector<16x32xf32>
    %213 = arith.addf %211, %212 : vector<16x32xf32>
    %c0_82 = arith.constant 0 : index
    %c0_83 = arith.constant 0 : index
    %214 = vector.load %arg3[%c0_82, %c0_83] : memref<16x32xf32, #tpu.memory_space<vmem>>, vector<16x32xf32>
    tpu.vector_store %arg3[%c0_82, %c0_83], %213 {strides = array<i32>} : memref<16x32xf32, #tpu.memory_space<vmem>>, vector<16x32xf32>,
    return
  }
}

</mosaic_0001>

<bundles_post_ra>
// kernel: convbert_transformer.1
= control target key start
LH: loop header
LB: loop body
LE: loop exit
PB: predicated region body
PF: predicated region fallthrough
CT: control target
= control target key end

     0   :  { %vm24_vm0 = vcmask 130048   ;;  %s9355_s0 = inlined_call_operand.vmem [shape: f32[16,16], index: 0, kind: input, shape index: {}]   ;;  %s9356_s1 = inlined_call_operand.vmem [shape: f32[224,128], index: 1, kind: input, shape index: {}]   ;;  %s9357_s2 = inlined_call_operand.vmem [shape: f32[24,128], index: 2, kind: input, shape index: {}]   ;;  %s9358_s3 = inlined_call_operand.hbm [shape: f32[16,32], index: 3, kind: output, shape index: {}]  }
   0x1   :  { %v18_v0 = vld [vmem:[%s9356_s1 + $0x8] sm:$0xff]  ;;  %v17_v1 = vld [vmem:[%s9356_s1] sm:$0xff] }
   0x2   :  { %v15_v2 = vld [vmem:[%s9355_s0] sm:$0xff]  ;;  %v60_v3 = vand.u32 4294901760, %v18_v0  ;;  %v63_v4 = vand.u32 4294901760, %v17_v1  ;;  %v16_v6 = vld [vmem:[%s9355_s0 + $0x8] sm:$0xff] }
   0x3   :  { %v26_v5 = vsel %vm24_vm0, %v15_v2, 0 }
   0x4   :  { %8 = vsyncpa [#allocation3], 0  ;;  %v98_v7 = vand.u32 4294901760, %v26_v5  ;;  %v29_v8 = vsel %vm24_vm0, %v16_v6, 0  ;;  %7211 = vmatprep.subr.mxu0 %v60_v3  ;;  %v148_v9 = vsub.f32 %v18_v0, %v60_v3  ;;  %v155_v11 = vsub.f32 %v17_v1, %v63_v4  ;;  %v536_v26 = vld [vmem:[%s9356_s1 + $0x28] sm:$0xff]  ;;  %v535_v28 = vld [vmem:[%s9356_s1 + $0x20] sm:$0xff] }
   0x5   :  { %v108_v10 = vand.u32 4294901760, %v29_v8  ;;  %7212 = vmatpush3.msra.mxu0 %v60_v3  ;;  %v8169_v27 = vand.u32 4294901760, %v536_v26  ;;  %v8177_v30 = vand.u32 4294901760, %v535_v28  ;;  %v534_v31 = vld [vmem:[%s9356_s1 + $0x18] sm:$0xff]  ;;  %v533_v35 = vld [vmem:[%s9356_s1 + $0x10] sm:$0xff]  ;;  %vm539_vm1 = vcmask 261120  }
   0x6   :  { %v99_v12 = vsub.f32 %v26_v5, %v98_v7  ;;  %7222 = vmatprep.mubr.f32.mxu1 %v98_v7  ;;  %7213 = vmatprep.subr.mxu0 %v63_v4  ;;  %v149_v13 = vand.u32 4294901760, %v148_v9  ;;  %v156_v15 = vand.u32 4294901760, %v155_v11  ;;  %v8190_v34 = vand.u32 4294901760, %v534_v31  ;;  %v6747_v50 = vld [vmem:[%s9357_s2] ss:$0 sm:$0xff]  ;;  %s8126_s18 = smov 64  }
   0x7   :  { %v109_v14 = vsub.f32 %v29_v8, %v108_v10  ;;  %7214 = vmatpush3.msra.mxu0 %v63_v4  ;;  %9513 = vst [vmem:[#allocation5_spill] sm:$0xff] %v8169_v27  ;;  %v8175_v29 = vsub.f32 %v536_v26, %v8169_v27  ;;  %9515 = vst [vmem:[#allocation7_spill] sm:$0xff] %v8177_v30  ;;  %v8188_v33 = vsub.f32 %v535_v28, %v8177_v30  ;;  %s8127_s19 = smov 96   ;;  %s8128_s0 = smov 32   ;;  %vm3044_vm2 = vcmask 523264  }
   0x8   :  { %v100_v16 = vand.u32 4294901760, %v99_v12  ;;  %v150_v17 = vsub.f32 %v148_v9, %v149_v13  ;;  %v157_v19 = vsub.f32 %v155_v11, %v156_v15  ;;  %7225 = vmatprep.subr.mxu0 %v148_v9  ;;  %9518 = vst [vmem:[#allocation10_spill] sm:$0xff] %v8190_v34  ;;  %v8203_v38 = vsub.f32 %v534_v31, %v8190_v34  ;;  %s8129_s28 = smov [#allocation2]  }
   0x9   :  { %v110_v18 = vand.u32 4294901760, %v109_v14  ;;  %9514 = vst [vmem:[#allocation6_spill] sm:$0xff] %v8175_v29  ;;  %v8185_v32 = vand.u32 4294901760, %v8175_v29  ;;  %9517 = vst [vmem:[#allocation9_spill] sm:$0xff] %v8188_v33  ;;  %v8200_v37 = vand.u32 4294901760, %v8188_v33  ;;  %v8205_v39 = vand.u32 4294901760, %v533_v35 }
   0xa   :  { %v101_v20 = vsub.f32 %v99_v12, %v100_v16  ;;  %v151_v21 = vand.u32 4294901760, %v150_v17  ;;  %v158_v23 = vand.u32 4294901760, %v157_v19  ;;  %9520 = vst [vmem:[#allocation12_spill] sm:$0xff] %v8203_v38  ;;  %v8214_v42 = vand.u32 4294901760, %v8203_v38  ;;  %s6736_s29 = sshll.u32 %s8129_s28, 4  ;;  %s6737_s29 = int_to_ptr.vmem [resolvable:$true] %s6736_s29 }
   0xb   :  { %v111_v22 = vsub.f32 %v109_v14, %v110_v18  ;;  %9516 = vst [vmem:[#allocation8_spill] sm:$0xff] %v8185_v32  ;;  %v663_v36 = vsub.f32 %v8175_v29, %v8185_v32  ;;  %9519 = vst [vmem:[#allocation11_spill] sm:$0xff] %v8200_v37  ;;  %v670_v41 = vsub.f32 %v8188_v33, %v8200_v37  ;;  %s8104_s5 = scalar_lea.vmem %s6737_s29, 256  ;;  %p8109_p1 = scmp.lt.s32.totalorder %s6737_s29, %s6737_s29 }
   0xc   :  { %v102_v24 = vand.u32 4294901760, %v101_v20  ;;  %7218 = vmatprep.subr.mxu1 %v151_v21  ;;  %9521 = vst [vmem:[#allocation13_spill] sm:$0xff] %v8205_v39  ;;  %9522 = vst [vmem:[#allocation14_spill] sm:$0xff] %v8214_v42  ;;  %v8217_v43 = vsub.f32 %v533_v35, %v8205_v39  ;;  %v677_v45 = vsub.f32 %v8203_v38, %v8214_v42  ;;  %p8105_p0 = scmp.ne.s32.totalorder %s6737_s29, %s8104_s5  ;;  %p8110_p2 = scmp.lt.s32.totalorder %s8104_s5, %s8104_s5 }
   0xd   :  { %v112_v25 = vand.u32 4294901760, %v111_v22  ;;  %7219 = vmatpush3.msra.mxu1 %v151_v21  ;;  %v8209_v40 = vand.u32 4294901760, %v663_v36  ;;  %v8222_v44 = vand.u32 4294901760, %v670_v41  ;;  %v1145_v41 = vld [vmem:[%s9356_s1 + $0xb8] sm:$0xff] }
   0xe   :  { %7215 = vmatprep.mubr.f32.mxu0 %v102_v24  ;;  %7220 = vmatprep.subr.mxu1 %v158_v23  ;;  %9523 = vst [vmem:[#allocation15_spill] sm:$0xff] %v8217_v43  ;;  %v8227_v46 = vand.u32 4294901760, %v8217_v43  ;;  %v8232_v47 = vand.u32 4294901760, %v677_v45  ;;  %v538_v45 = vld [vmem:[%s9357_s2 + $0x10] sm:$0xff]  ;;  %p8111_p3 = por %p8110_p2, %p8109_p1 }
   0xf   :  { %7216 = vmatmul.mubr.f32.vlgmr.msra.gmra.mxu0 %v112_v25  ;;  %7221 = vmatpush3.msra.mxu1 %v158_v23  ;;  %v1144_v23 = vld [vmem:[%s9356_s1 + $0xb0] sm:$0xff] }
  0x10   :  { %7226 = vmatpush3.msra.mxu0 %v148_v9  ;;  %7223 = vmatmul.mubr.f32.vlgmr.msra.gmra.mxu1 %v108_v10  ;;  %9524 = vst [vmem:[#allocation16_spill] sm:$0xff] %v8227_v46  ;;  %v684_v48 = vsub.f32 %v8217_v43, %v8227_v46  ;;  %v1151_v24 = vsel %vm24_vm0, %v1144_v23, 0  ;;  %p8112_p4 = pnand %p8111_p3, %p8105_p0 }
  0x11   :  { %7227 = vmatprep.subr.mxu0 %v155_v11  ;;  %7232 = vmatprep.subr.mxu1 %v60_v3  ;;  %v8289_v25 = vand.u32 4294901760, %v1151_v24 }
  0x12   :  { %7228 = vmatpush3.msra.mxu0 %v155_v11  ;;  %7229 = vmatprep.mubr.f32.mxu0 %v99_v12  ;;  %v8238_v49 = vand.u32 4294901760, %v684_v48  ;;  %v1146_v48 = vld [vmem:[%s9356_s1 + $0xc0] sm:$0xff] }
  0x13   :  { %7233 = vmatpush3.msra.mxu1 %v60_v3  ;;  %7230 = vmatmul.mubr.f32.vlgmr.msra.gmra.mxu0 %v109_v14  ;;  %9526 = vst [vmem:[#allocation18_spill] sm:$0xff] %v8289_v25  ;;  %v8292_v26 = vsub.f32 %v1151_v24, %v8289_v25 }
  0x14   :  { %7234 = vmatprep.subr.mxu1 %v63_v4  ;;  %7239 = vmatprep.subr.mxu0 %v149_v13  ;;  %9525 = vst [vmem:[#allocation17_spill] sm:$0xff] %v8238_v49 }
  0x15   :  { %7235 = vmatpush3.msra.mxu1 %v63_v4  ;;  %7236 = vmatprep.mubr.f32.mxu1 %v100_v16  ;;  %9527 = vst [vmem:[#allocation19_spill] sm:$0xff] %v8292_v26  ;;  %v8296_v28 = vand.u32 4294901760, %v8292_v26 }
  0x16   :  { %7240 = vmatpush3.msra.mxu0 %v149_v13  ;;  %7237 = vmatmul.mubr.f32.vlgmr.msra.gmra.mxu1 %v110_v18 }
  0x17   :  { %7241 = vmatprep.subr.mxu0 %v156_v15  ;;  %7246 = vmatprep.subr.mxu1 %v60_v3  ;;  %9528 = vst [vmem:[#allocation20_spill] sm:$0xff] %v8296_v28  ;;  %v1238_v31 = vsub.f32 %v8292_v26, %v8296_v28 }
  0x18   :  { %7242 = vmatpush3.msra.mxu0 %v156_v15  ;;  %7243 = vmatprep.mubr.f32.mxu0 %v98_v7 }
  0x19   :  { %7247 = vmatpush3.msra.mxu1 %v60_v3  ;;  %7244 = vmatmul.mubr.f32.vlgmr.msra.gmra.mxu0 %v108_v10  ;;  %v8300_v35 = vand.u32 4294901760, %v1238_v31 }
  0x1a   :  { %7248 = vmatprep.subr.mxu1 %v63_v4  ;;  %7250 = vmatprep.mubr.f32.mxu1 %v98_v7 }
  0x1b   :  { %7249 = vmatpush3.msra.mxu1 %v63_v4  ;;  %7253 = vmatprep.subr.mxu0 %v8169_v27  ;;  %9529 = vst [vmem:[#allocation21_spill] sm:$0xff] %v8300_v35 }
  0x1c   :  { %7251 = vmatmul.mubr.f32.vlgmr.msra.gmra.mxu1 %v108_v10  ;;  %7254 = vmatpush3.msra.mxu0 %v8169_v27 }
  0x1d   :  { %7255 = vmatprep.subr.mxu0 %v8177_v30  ;;  %7264 = vmatprep.subr.mxu1 %v8209_v40 }
  0x1e   :  { %7256 = vmatpush3.msra.mxu0 %v8177_v30  ;;  %7265 = vmatpush3.msra.mxu1 %v8209_v40 }
  0x1f   :  { %7257 = vmatprep.subr.mxu0 %v8190_v34  ;;  %7266 = vmatprep.subr.mxu1 %v8222_v44 }
  0x20   :  { %7258 = vmatpush3.msra.mxu0 %v8190_v34  ;;  %7267 = vmatpush3.msra.mxu1 %v8222_v44 }
  0x21   :  { %7259 = vmatprep.subr.mxu0 %v8205_v39  ;;  %7268 = vmatprep.subr.mxu1 %v8232_v47 }
  0x22   :  { %7260 = vmatpush3.msra.mxu0 %v8205_v39  ;;  %7269 = vmatpush3.msra.mxu1 %v8232_v47 }
  0x23   :  { %7275 = vmatprep.subr.mxu0 %v8175_v29  ;;  %7270 = vmatprep.subr.mxu1 %v8238_v49 }
  0x24   :  { %7271 = vmatpush3.msra.mxu1 %v8238_v49 }
  0x25   :  { %7286 = vmatprep.subr.mxu1 %v8169_v27 }
  0xcf   :  { %v7217_v51 = vpop.f32.mrf.mxu0 }
  0xd0   :  { %v115_v52 = vadd.f32 %v7217_v51, %v6747_v50  ;;  %v7224_v54 = vpop.f32.mrf.mxu1 }
  0xd1   :  { %v104_v53 = vpop.f32.mrf.mxu0 }
  0xd2   :  { %v105_v55 = vadd.f32 %v6747_v50, %v104_v53  ;;  %v202_v56 = vadd.f32 %v7224_v54, %v115_v52  ;;  %v195_v57 = vpop.f32.mrf.mxu1  ;;  %v537_v52 = vld [vmem:[%s9357_s2 + $0x8] sm:$0xff]  ;;  %v1154_v53 = vsel %vm24_vm0, %v1145_v41, 0 }
  0xd3   :  { %v7231_v59 = vpop.f32.mrf.mxu0 }
  0xd4   :  { %v196_v58 = vadd.f32 %v195_v57, %v105_v55  ;;  %v285_v60 = vadd.f32 %v7231_v59, %v202_v56  ;;  %v1157_v55 = vsel %vm24_vm0, %v1146_v48, 0  ;;  %v1147_v56 = vld [vmem:[%s9356_s1 + $0xc8] sm:$0xff]  ;;  %v8320_v59 = vand.u32 4294901760, %v1154_v53 }
  0xd5   :  { %v277_v61 = vpop.f32.mrf.mxu0 }
  0xd6   :  { %v278_v62 = vadd.f32 %v277_v61, %v196_v58  ;;  %v7238_v63 = vpop.f32.mrf.mxu1  ;;  %9530 = vst [vmem:[#allocation22_spill] sm:$0xff] %v8320_v59 }
  0xd7   :  { %v368_v0 = vadd.f32 %v7238_v63, %v285_v60  ;;  %v1148_v60 = vld [vmem:[%s9356_s1 + $0xd0] sm:$0xff]  ;;  %v8325_v63 = vand.u32 4294901760, %v1157_v55 }
  0xd8   :  { %v359_v1 = vpop.f32.mrf.mxu1 }
  0xd9   :  { %v360_v2 = vadd.f32 %v359_v1, %v278_v62  ;;  %v7245_v3 = vpop.f32.mrf.mxu0  ;;  %9531 = vst [vmem:[#allocation23_spill] sm:$0xff] %v8325_v63 }
  0xda   :  { %v451_v4 = vadd.f32 %v7245_v3, %v368_v0  ;;  %v1160_v0 = vsel %vm24_vm0, %v1147_v56, 0  ;;  %v1163_v3 = vsel %vm24_vm0, %v1148_v60, 0 }
  0xdb   :  { %v444_v5 = vpop.f32.mrf.mxu0 }
  0xdc   :  { %v7252_v6 = vpop.f32.mrf.mxu1  ;;  %v445_v7 = vadd.f32 %v444_v5, %v360_v2 }
  0xdd   :  { %v8247_v8 = vadd.f32 %v7252_v6, %v451_v4  ;;  %v1149_v4 = vld [vmem:[%s9356_s1 + $0xd8] sm:$0xff] }
  0xde   :  { %v523_v9 = vpop.f32.mrf.mxu1 }
  0xdf   :  { %v544_v10 = vsel %vm539_vm1, %v8247_v8, 0  ;;  %v8251_v11 = vadd.f32 %v523_v9, %v445_v7  ;;  %v8333_v7 = vsub.f32 %v1154_v53, %v8320_v59  ;;  %v8335_v9 = vand.u32 4294901760, %v1160_v0 }
  0xe0   :  { %v625_v12 = vand.u32 4294901760, %v544_v10 }
  0xe1   :  { %v541_v13 = vsel %vm539_vm1, %v8251_v11, 0  ;;  %9532 = vst [vmem:[#allocation24_spill] sm:$0xff] %v8333_v7  ;;  %9533 = vst [vmem:[#allocation25_spill] sm:$0xff] %v8335_v9 }
  0xe2   :  { %v626_v14 = vsub.f32 %v544_v10, %v625_v12  ;;  %v615_v15 = vand.u32 4294901760, %v541_v13 }
  0xe4   :  { %v616_v16 = vsub.f32 %v541_v13, %v615_v15  ;;  %7272 = vmatprep.mubr.f32.mxu1 %v615_v15  ;;  %v627_v17 = vand.u32 4294901760, %v626_v14  ;;  %v8340_v13 = vand.u32 4294901760, %v1163_v3 }
  0xe5   :  { %7273 = vmatmul.mubr.f32.vlgmr.msra.gmra.mxu1 %v625_v12 }
  0xe6   :  { %7287 = vmatpush3.msra.mxu1 %v8169_v27  ;;  %v617_v18 = vand.u32 4294901760, %v616_v16  ;;  %v628_v20 = vsub.f32 %v626_v14, %v627_v17  ;;  %9535 = vst [vmem:[#allocation27_spill] sm:$0xff] %v8340_v13  ;;  %v8355_v31 = vsub.f32 %v1163_v3, %v8340_v13 }
  0xe7   :  { %7288 = vmatprep.subr.mxu1 %v8177_v30 }
  0xe8   :  { %7289 = vmatpush3.msra.mxu1 %v8177_v30  ;;  %7294 = vmatprep.mubr.f32.mxu1 %v617_v18  ;;  %v618_v19 = vsub.f32 %v616_v16, %v617_v18  ;;  %v629_v22 = vand.u32 4294901760, %v628_v20  ;;  %v8347_v20 = vsub.f32 %v1160_v0, %v8335_v9  ;;  %9540 = vst [vmem:[#allocation32_spill] sm:$0xff] %v8355_v31  ;;  %v8375_v56 = vand.u32 4294901760, %v8355_v31 }
  0xe9   :  { %7290 = vmatprep.subr.mxu1 %v8190_v34 }
  0xea   :  { %7291 = vmatpush3.msra.mxu1 %v8190_v34  ;;  %v619_v21 = vand.u32 4294901760, %v618_v19  ;;  %9537 = vst [vmem:[#allocation29_spill] sm:$0xff] %v8347_v20  ;;  %9543 = vst [vmem:[#allocation35_spill] sm:$0xff] %v8375_v56  ;;  %v1278_v3 = vsub.f32 %v8355_v31, %v8375_v56 }
  0xeb   :  { %7292 = vmatprep.subr.mxu1 %v8205_v39 }
  0xec   :  { %7293 = vmatpush3.msra.mxu1 %v8205_v39  ;;  %7261 = vmatprep.mubr.f32.mxu0 %v619_v21 }
  0xed   :  { %7295 = vmatmul.mubr.f32.vlgmr.msra.gmra.mxu1 %v627_v17  ;;  %7308 = vmatprep.subr.mxu1 %v8169_v27  ;;  %v8344_v17 = vand.u32 4294901760, %v8333_v7 }
  0xee   :  { %7262 = vmatmul.mubr.f32.vlgmr.msra.gmra.mxu0 %v629_v22  ;;  %7309 = vmatpush3.msra.mxu1 %v8169_v27 }
  0xef   :  { %7276 = vmatpush3.msra.mxu0 %v8175_v29  ;;  %7316 = vmatprep.mubr.f32.mxu1 %v615_v15  ;;  %9536 = vst [vmem:[#allocation28_spill] sm:$0xff] %v8344_v17  ;;  %v1248_v48 = vsub.f32 %v8333_v7, %v8344_v17 }
  0xf0   :  { %7277 = vmatprep.subr.mxu0 %v8188_v33  ;;  %7283 = vmatprep.mubr.f32.mxu0 %v616_v16 }
  0xf1   :  { %7310 = vmatprep.subr.mxu1 %v8177_v30  ;;  %7278 = vmatpush3.msra.mxu0 %v8188_v33 }
  0xf2   :  { %7311 = vmatpush3.msra.mxu1 %v8177_v30  ;;  %7279 = vmatprep.subr.mxu0 %v8203_v38 }
  0xf3   :  { %7312 = vmatprep.subr.mxu1 %v8190_v34  ;;  %7280 = vmatpush3.msra.mxu0 %v8203_v38 }
  0xf4   :  { %7313 = vmatpush3.msra.mxu1 %v8190_v34  ;;  %7281 = vmatprep.subr.mxu0 %v8217_v43 }
  0xf5   :  { %7314 = vmatprep.subr.mxu1 %v8205_v39  ;;  %7282 = vmatpush3.msra.mxu0 %v8217_v43 }
  0xf6   :  { %7315 = vmatpush3.msra.mxu1 %v8205_v39  ;;  %7284 = vmatmul.mubr.f32.vlgmr.msra.gmra.mxu0 %v626_v14  ;;  %v1166_v14 = vsel %vm24_vm0, %v1149_v4, 0 }
  0xf7   :  { %7297 = vmatprep.subr.mxu0 %v8185_v32  ;;  %7317 = vmatmul.mubr.f32.vlgmr.msra.gmra.mxu1 %v625_v12  ;;  %v8349_v21 = vand.u32 4294901760, %v1166_v14 }
  0xf8   :  { %7298 = vmatpush3.msra.mxu0 %v8185_v32  ;;  %7305 = vmatprep.mubr.f32.mxu0 %v615_v15 }
  0xf9   :  { %7299 = vmatprep.subr.mxu0 %v8200_v37  ;;  %7336 = vmatprep.mubr.f32.mxu1 %v8289_v25  ;;  %9538 = vst [vmem:[#allocation30_spill] sm:$0xff] %v8349_v21 }
  0xfa   :  { %7300 = vmatpush3.msra.mxu0 %v8200_v37 }
  0xfb   :  { %7301 = vmatprep.subr.mxu0 %v8214_v42 }
  0xfc   :  { %7302 = vmatpush3.msra.mxu0 %v8214_v42 }
  0xfd   :  { %7303 = vmatprep.subr.mxu0 %v8227_v46 }
  0xfe   :  { %7304 = vmatpush3.msra.mxu0 %v8227_v46 }
  0xff   :  { %7306 = vmatmul.mubr.f32.vlgmr.msra.gmra.mxu0 %v625_v12  ;;  %v8338_v12 = vsub.f32 %v1157_v55, %v8325_v63 }
 0x100   :  { %7323 = vmatprep.mubr.f32.mxu0 %v8300_v35 }
 0x101   :  { %9534 = vst [vmem:[#allocation26_spill] sm:$0xff] %v8338_v12  ;;  %v8352_v24 = vand.u32 4294901760, %v8338_v12 }
 0x103   :  { %9539 = vst [vmem:[#allocation31_spill] sm:$0xff] %v8352_v24  ;;  %v1258_v55 = vsub.f32 %v8338_v12, %v8352_v24 }
 0x1a5   :  { %v7274_v50 = vpop.f32.mrf.mxu1 }
 0x1a7   :  { %v722_v61 = vpop.f32.mrf.mxu1 }
 0x1ad   :  { %v7296_v1 = vpop.f32.mrf.mxu1 }
 0x1ae   :  { %v7263_v36 = vpop.f32.mrf.mxu0 }
 0x1af   :  { %v632_v54 = vadd.f32 %v7263_v36, %v538_v45  ;;  %v892_v15 = vpop.f32.mrf.mxu1 }
 0x1b0   :  { %v621_v51 = vpop.f32.mrf.mxu0 }
 0x1b1   :  { %v622_v57 = vadd.f32 %v621_v51, %v537_v52  ;;  %v729_v62 = vadd.f32 %v7274_v50, %v632_v54  ;;  %v8362_v51 = vand.u32 4294901760, %v8347_v20  ;;  %v8365_v52 = vsub.f32 %v1166_v14, %v8349_v21 }
 0x1b3   :  { %v723_v6 = vadd.f32 %v722_v61, %v622_v57  ;;  %9541 = vst [vmem:[#allocation33_spill] sm:$0xff] %v8362_v51  ;;  %9542 = vst [vmem:[#allocation34_spill] sm:$0xff] %v8365_v52  ;;  %v1268_v61 = vsub.f32 %v8347_v20, %v8362_v51 }
 0x1b6   :  { %v7285_v58 = vpop.f32.mrf.mxu0 }
 0x1b7   :  { %v816_v5 = vadd.f32 %v7285_v58, %v729_v62  ;;  %v7318_v18 = vpop.f32.mrf.mxu1  ;;  %v8383_v58 = vand.u32 4294901760, %v1248_v48  ;;  %v8393_v62 = vand.u32 4294901760, %v8365_v52 }
 0x1b8   :  { %v808_v2 = vpop.f32.mrf.mxu0 }
 0x1b9   :  { %v809_v10 = vadd.f32 %v808_v2, %v723_v6  ;;  %v901_v16 = vadd.f32 %v7296_v1, %v816_v5  ;;  %v1064_v50 = vpop.f32.mrf.mxu1  ;;  %9544 = vst [vmem:[#allocation36_spill] sm:$0xff] %v8383_v58  ;;  %9545 = vst [vmem:[#allocation37_spill] sm:$0xff] %v8393_v62  ;;  %v8398_v1 = vand.u32 4294901760, %v1258_v55  ;;  %v8408_v6 = vand.u32 4294901760, %v1268_v61 }
 0x1bb   :  { %v893_v23 = vadd.f32 %v892_v15, %v809_v10  ;;  %9546 = vst [vmem:[#allocation38_spill] sm:$0xff] %v8398_v1  ;;  %9547 = vst [vmem:[#allocation39_spill] sm:$0xff] %v8408_v6  ;;  %v1288_v10 = vsub.f32 %v8365_v52, %v8393_v62 }
 0x1bf   :  { %v7307_v19 = vpop.f32.mrf.mxu0 }
 0x1c0   :  { %v990_v22 = vadd.f32 %v7307_v19, %v901_v16  ;;  %v8413_v16 = vand.u32 4294901760, %v1278_v3  ;;  %v8416_v19 = vand.u32 4294901760, %v1288_v10 }
 0x1c1   :  { %v983_v36 = vpop.f32.mrf.mxu0 }
 0x1c2   :  { %v8357_v41 = vadd.f32 %v7318_v18, %v990_v22  ;;  %v984_v45 = vadd.f32 %v983_v36, %v893_v23  ;;  %9548 = vst [vmem:[#allocation40_spill] sm:$0xff] %v8413_v16  ;;  %9549 = vst [vmem:[#allocation41_spill] sm:$0xff] %v8416_v19 }
 0x1c4   :  { %v8367_v53 = vadd.f32 %v1064_v50, %v984_v45  ;;  %v8370_v54 = vand.u32 4294901760, %v8357_v41 }
 0x1c6   :  { %7319 = vmatprep.subr.mxu0 %v8370_v54  ;;  %1084 = vrot.lane.b32.xlu1 %v8367_v53, %s8126_s18  ;;  %v8381_v57 = vand.u32 4294901760, %v8367_v53  ;;  %v1325_v60 = vsub.f32 %v8357_v41, %v8370_v54 }
 0x1c7   :  { %1076 = vrot.lane.b32.xlu0 %v8367_v53, %s8127_s19  ;;  %7320 = vmatpush3.msra.mxu0 %v8370_v54 }
 0x1c8   :  { %7321 = vmatprep.subr.mxu0 %v8381_v57  ;;  %v1332_v0 = vsub.f32 %v8367_v53, %v8381_v57  ;;  %v1326_v2 = vand.u32 4294901760, %v1325_v60 }
 0x1c9   :  { %7322 = vmatpush3.msra.mxu0 %v8381_v57 }
 0x1ca   :  { %1086 = vrot.lane.b32.xlu1 %v8357_v41, %s8126_s18  ;;  %7324 = vmatmul.mubr.f32.vlgmr.msra.gmra.mxu0 %v8383_v58  ;;  %v1327_v4 = vsub.f32 %v1325_v60, %v1326_v2  ;;  %v1333_v5 = vand.u32 4294901760, %v1332_v0 }
 0x1cb   :  { %1078 = vrot.lane.b32.xlu0 %v8357_v41, %s8127_s19  ;;  %7345 = vmatprep.subr.mxu0 %v1325_v60 }
 0x1cc   :  { %7346 = vmatpush3.msra.mxu0 %v1325_v60  ;;  %7326 = vmatprep.mubr.f32.mxu0 %v8398_v1  ;;  %v1328_v14 = vand.u32 4294901760, %v1327_v4  ;;  %v1334_v15 = vsub.f32 %v1332_v0, %v1333_v5 }
 0x1cd   :  { %7347 = vmatprep.subr.mxu0 %v1332_v0 }
 0x1ce   :  { %7348 = vmatpush3.msra.mxu0 %v1332_v0  ;;  %7332 = vmatprep.subr.mxu1 %v1328_v14  ;;  %v1335_v18 = vand.u32 4294901760, %v1334_v15 }
 0x1cf   :  { %7327 = vmatmul.mubr.f32.gmra.mxu0 %v8408_v6  ;;  %7371 = vmatprep.subr.mxu0 %v1326_v2 }
 0x1d0   :  { %7333 = vmatpush3.msra.mxu1 %v1328_v14  ;;  %7329 = vmatprep.mubr.f32.mxu0 %v8413_v16 }
 0x1d1   :  { %7334 = vmatprep.subr.mxu1 %v1335_v18 }
 0x1d2   :  { %7335 = vmatpush3.msra.mxu1 %v1335_v18 }
 0x1d3   :  { %7330 = vmatmul.mubr.f32.gmra.mxu0 %v8416_v19  ;;  %7337 = vmatmul.mubr.f32.vlgmr.msra.gmra.mxu1 %v8320_v59 }
 0x1d4   :  { %7358 = vmatprep.subr.mxu1 %v8370_v54  ;;  %7339 = vmatprep.mubr.f32.mxu1 %v8325_v63 }
 0x1d5   :  { %7359 = vmatpush3.msra.mxu1 %v8370_v54  ;;  %7349 = vmatprep.mubr.f32.mxu0 %v8292_v26 }
 0x1d6   :  { %7360 = vmatprep.subr.mxu1 %v8381_v57 }
 0x1d7   :  { %7361 = vmatpush3.msra.mxu1 %v8381_v57  ;;  %7350 = vmatmul.mubr.f32.vlgmr.msra.gmra.mxu0 %v8333_v7 }
 0x1d8   :  { %7340 = vmatmul.mubr.f32.gmra.mxu1 %v8335_v9  ;;  %7372 = vmatpush3.msra.mxu0 %v1326_v2 }
 0x1d9   :  { %7384 = vmatprep.subr.mxu1 %v8370_v54  ;;  %7373 = vmatprep.subr.mxu0 %v1333_v5 }
 0x1da   :  { %7374 = vmatpush3.msra.mxu0 %v1333_v5  ;;  %7342 = vmatprep.mubr.f32.mxu1 %v8340_v13 }
 0x1db   :  { %7352 = vmatprep.mubr.f32.mxu0 %v8338_v12 }
 0x1dc   :  { %7343 = vmatmul.mubr.f32.gmra.mxu1 %v8349_v21  ;;  %7353 = vmatmul.mubr.f32.gmra.mxu0 %v8347_v20 }
 0x1dd   :  { %7362 = vmatprep.mubr.f32.mxu1 %v8296_v28  ;;  %7355 = vmatprep.mubr.f32.mxu0 %v8355_v31 }
 0x1e0   :  { %7363 = vmatmul.mubr.f32.vlgmr.msra.gmra.mxu1 %v8344_v17  ;;  %7356 = vmatmul.mubr.f32.gmra.mxu0 %v8365_v52 }
 0x1e1   :  { %7385 = vmatpush3.msra.mxu1 %v8370_v54  ;;  %7365 = vmatprep.mubr.f32.mxu1 %v8352_v24 }
 0x1e2   :  { %7386 = vmatprep.subr.mxu1 %v8381_v57  ;;  %7375 = vmatprep.mubr.f32.mxu0 %v8289_v25 }
 0x1e3   :  { %7387 = vmatpush3.msra.mxu1 %v8381_v57 }
 0x1e4   :  { %7366 = vmatmul.mubr.f32.gmra.mxu1 %v8362_v51  ;;  %7376 = vmatmul.mubr.f32.vlgmr.msra.gmra.mxu0 %v8320_v59 }
 0x1e5   :  { %7368 = vmatprep.mubr.f32.mxu1 %v8375_v56  ;;  %7378 = vmatprep.mubr.f32.mxu0 %v8325_v63 }
 0x1e8   :  { %7369 = vmatmul.mubr.f32.gmra.mxu1 %v8393_v62  ;;  %7379 = vmatmul.mubr.f32.gmra.mxu0 %v8335_v9 }
 0x1e9   :  { %7388 = vmatprep.mubr.f32.mxu1 %v8289_v25  ;;  %7381 = vmatprep.mubr.f32.mxu0 %v8340_v13 }
 0x1ec   :  { %7389 = vmatmul.mubr.f32.vlgmr.msra.gmra.mxu1 %v8320_v59  ;;  %7382 = vmatmul.mubr.f32.gmra.mxu0 %v8349_v21 }
 0x1ed   :  { %7391 = vmatprep.mubr.f32.mxu1 %v8325_v63 }
 0x1f0   :  { %7392 = vmatmul.mubr.f32.gmra.mxu1 %v8335_v9 }
 0x1f1   :  { %7394 = vmatprep.mubr.f32.mxu1 %v8340_v13 }
 0x1f4   :  { %7395 = vmatmul.mubr.f32.gmra.mxu1 %v8349_v21 }
 0x238   :  { %v1085_v22 = vpop.permute.xlu1 %1084 }
 0x239   :  { %v1077_v23 = vpop.permute.xlu0 %1076 }
 0x23a   :  { %v1082_v36 = vmax.f32 %v8367_v53, %v1077_v23 }
 0x23c   :  { %v1090_v45 = vmax.f32 %v1082_v36, %v1085_v22  ;;  %v1087_v54 = vpop.permute.xlu1 %1086 }
 0x23d   :  { %v1079_v48 = vpop.permute.xlu0 %1078 }
 0x23e   :  { %v1083_v50 = vmax.f32 %v8357_v41, %v1079_v48  ;;  %1100 = vrot.lane.b32.xlu0 %v1090_v45, %s8128_s0  ;;  %v1092_v5 = vsub.f32 %v8367_v53, %v1090_v45 }
 0x240   :  { %v1091_v55 = vmax.f32 %v1083_v50, %v1087_v54  ;;  %v1094_v22 = vmul.f32 1.442695, %v1092_v5 }
 0x242   :  { %1112 = vrot.lane.b32.xlu0 %v1090_v45, %s8126_s18  ;;  %1102 = vrot.lane.b32.xlu1 %v1091_v55, %s8128_s0  ;;  %v1093_v23 = vsub.f32 %v8357_v41, %v1091_v55 }
 0x244   :  { %v1096_v48 = vmul.f32 1.442695, %v1093_v23  ;;  %v1884_v23 = vld [vmem:[%s9356_s1 + $0x30] sm:$0xff] }
 0x246   :  { %1114 = vrot.lane.b32.xlu1 %v1091_v55, %s8126_s18  ;;  %v1887_v55 = vld [vmem:[%s9356_s1 + $0x48] sm:$0xff] }
 0x2b0   :  { %v1101_v57 = vpop.permute.xlu0 %1100 }
 0x2b1   :  { %v1106_v60 = vsub.f32 %v8367_v53, %v1101_v57 }
 0x2b3   :  { %v1108_v61 = vmul.f32 1.442695, %v1106_v60 }
 0x2b4   :  { %v1103_v0 = vpop.permute.xlu1 %1102  ;;  %v1113_v2 = vpop.permute.xlu0 %1112 }
 0x2b5   :  { %8039 = vpow2.f32 %v1108_v61  ;;  %v1107_v3 = vsub.f32 %v8357_v41, %v1103_v0  ;;  %v1118_v4 = vsub.f32 %v8367_v53, %v1113_v2  ;;  %v8482_v61 = vand.u32 4294901760, %v1887_v55  ;;  %v1886_v0 = vld [vmem:[%s9356_s1 + $0x40] sm:$0xff] }
 0x2b7   :  { %v1110_v10 = vmul.f32 1.442695, %v1107_v3  ;;  %v1120_v14 = vmul.f32 1.442695, %v1118_v4  ;;  %v8488_v2 = vsub.f32 %v1887_v55, %v8482_v61  ;;  %v8490_v3 = vand.u32 4294901760, %v1886_v0  ;;  %7397 = vmatprep.subr.mxu0 %v8482_v61  ;;  %v1885_v4 = vld [vmem:[%s9356_s1 + $0x38] sm:$0xff] }
 0x2b8   :  { %v1115_v15 = vpop.permute.xlu1 %1114  ;;  %7398 = vmatpush3.msra.mxu0 %v8482_v61 }
 0x2b9   :  { %8041 = vpow2.f32 %v1110_v10  ;;  %v1119_v18 = vsub.f32 %v8357_v41, %v1115_v15  ;;  %v8501_v15 = vsub.f32 %v1886_v0, %v8490_v3  ;;  %7399 = vmatprep.subr.mxu0 %v8490_v3 }
 0x2ba   :  { %8043 = vpow2.f32 %v1120_v14  ;;  %v8498_v14 = vand.u32 4294901760, %v8488_v2  ;;  %7400 = vmatpush3.msra.mxu0 %v8490_v3 }
 0x2bb   :  { %v1122_v36 = vmul.f32 1.442695, %v1119_v18  ;;  %v8503_v18 = vand.u32 4294901760, %v1885_v4 }
 0x2bd   :  { %8045 = vpow2.f32 %v1122_v36  ;;  %7401 = vmatprep.subr.mxu0 %v8503_v18 }
 0x2be   :  { %8047 = vpow2.f32 %v1094_v22  ;;  %7402 = vmatpush3.msra.mxu0 %v8503_v18 }
 0x2bf   :  { %8049 = vpow2.f32 %v1096_v48  ;;  %v2016_v48 = vsub.f32 %v8488_v2, %v8498_v14 }
 0x2c1   :  { %v8522_v55 = vand.u32 4294901760, %v2016_v48 }
 0x2c2   :  { %v8040_v50 = vpop.eup %8039 }
 0x2c3   :  { %1126 = vrot.lane.b32.xlu0 %v8040_v50, %s8127_s19  ;;  %9551 = vst [vmem:[#allocation43_spill] sm:$0xff] %v8522_v55  ;;  %7408 = vmatprep.subr.mxu1 %v8522_v55 }
 0x2c4   :  { %7409 = vmatpush3.msra.mxu1 %v8522_v55 }
 0x2c6   :  { %v8042_v54 = vpop.eup %8041 }
 0x2c7   :  { %v8044_v53 = vpop.eup %8043  ;;  %1128 = vrot.lane.b32.xlu1 %v8042_v54, %s8127_s19 }
 0x2c8   :  { %1136 = vrot.lane.b32.xlu0 %v8044_v53, %s8126_s18 }
 0x2ca   :  { %v8046_v45 = vpop.eup %8045 }
 0x2cb   :  { %v8048_v57 = vpop.eup %8047  ;;  %1138 = vrot.lane.b32.xlu1 %v8046_v45, %s8126_s18 }
 0x2cc   :  { %1844 = vrot.lane.b32.xlu0 %v8048_v57, %s8127_s19  ;;  %v8050_v41 = vpop.eup %8049 }
 0x2cf   :  { %1854 = vrot.lane.b32.xlu1 %v8042_v54, %s8126_s18  ;;  %v8516_v54 = vsub.f32 %v1885_v4, %v8503_v18 }
 0x2d0   :  { %1846 = vrot.lane.b32.xlu0 %v8050_v41, %s8127_s19 }
 0x2d1   :  { %v8527_v0 = vand.u32 4294901760, %v8516_v54 }
 0x2d3   :  { %1852 = vrot.lane.b32.xlu1 %v8040_v50, %s8126_s18  ;;  %v8513_v50 = vand.u32 4294901760, %v8501_v15  ;;  %9552 = vst [vmem:[#allocation44_spill] sm:$0xff] %v8527_v0 }
 0x2d4   :  { %1862 = vrot.lane.b32.xlu0 %v8044_v53, %s8128_s0 }
 0x2d5   :  { %9550 = vst [vmem:[#allocation42_spill] sm:$0xff] %v8513_v50 }
 0x2d7   :  { %1864 = vrot.lane.b32.xlu1 %v8046_v45, %s8128_s0  ;;  %v8519_v45 = vand.u32 4294901760, %v1884_v23 }
 0x2d9   :  { %v8530_v4 = vsub.f32 %v1884_v23, %v8519_v45  ;;  %7403 = vmatprep.subr.mxu0 %v8519_v45 }
 0x2da   :  { %7404 = vmatpush3.msra.mxu0 %v8519_v45 }
 0x2db   :  { %7419 = vmatprep.subr.mxu0 %v8488_v2 }
 0x335   :  { %v1127_v60 = vpop.permute.xlu0 %1126 }
 0x336   :  { %v1132_v5 = vadd.f32 %v8048_v57, %v1127_v60  ;;  %v2023_v60 = vsub.f32 %v8501_v15, %v8513_v50 }
 0x339   :  { %v1129_v10 = vpop.permute.xlu1 %1128 }
 0x33a   :  { %v1137_v22 = vpop.permute.xlu0 %1136  ;;  %v1133_v53 = vadd.f32 %v8050_v41, %v1129_v10  ;;  %v8534_v41 = vand.u32 4294901760, %v2023_v60  ;;  %v2030_v10 = vsub.f32 %v8516_v54, %v8527_v0  ;;  %v7325_v60 = vpop.f32.mrf.mxu0 }
 0x33b   :  { %v1142_v36 = vadd.f32 %v1137_v22, %v1132_v5  ;;  %v8541_v22 = vand.u32 4294901760, %v8530_v4 }
 0x33c   :  { %9553 = vst [vmem:[#allocation45_spill] sm:$0xff] %v8534_v41  ;;  %7410 = vmatprep.subr.mxu1 %v8534_v41  ;;  %v8545_v23 = vand.u32 4294901760, %v2030_v10  ;;  %v7338_v10 = vpop.f32.mrf.mxu1 }
 0x33d   :  { %8051 = vrcp.f32 %v1142_v36  ;;  %v1139_v57 = vpop.permute.xlu1 %1138  ;;  %9554 = vst [vmem:[#allocation46_spill] sm:$0xff] %v8541_v22  ;;  %7411 = vmatpush3.msra.mxu1 %v8534_v41  ;;  %v2037_v36 = vsub.f32 %v8530_v4, %v8541_v22  ;;  %v1379_v35 = vadd.f32 %v7338_v10, %v7325_v60 }
 0x33e   :  { %v1143_v5 = vadd.f32 %v1139_v57, %v1133_v53  ;;  %9555 = vst [vmem:[#allocation47_spill] sm:$0xff] %v8545_v23  ;;  %7412 = vmatprep.subr.mxu1 %v8545_v23  ;;  %v1372_v62 = vpop.f32.mrf.mxu1 }
 0x33f   :  { %7413 = vmatpush3.msra.mxu1 %v8545_v23  ;;  %v8552_v48 = vand.u32 4294901760, %v2037_v36 }
 0x340   :  { %8053 = vrcp.f32 %v1143_v5  ;;  %v1241_v5 = vpop.f32.mrf.mxu0  ;;  %v7341_v36 = vpop.f32.mrf.mxu1 }
 0x341   :  { %9556 = vst [vmem:[#allocation48_spill] sm:$0xff] %v8552_v48  ;;  %7414 = vmatprep.subr.mxu1 %v8552_v48  ;;  %v1373_v16 = vadd.f32 %v1372_v62, %v1241_v5  ;;  %v1855_v62 = vpop.permute.xlu1 %1854 }
 0x342   :  { %7415 = vmatpush3.msra.mxu1 %v8552_v48  ;;  %v7328_v41 = vpop.f32.mrf.mxu0  ;;  %v1384_v56 = vpop.f32.mrf.mxu1 }
 0x343   :  { %7430 = vmatprep.subr.mxu1 %v8482_v61  ;;  %v1391_v46 = vadd.f32 %v7341_v36, %v7328_v41 }
 0x344   :  { %v1261_v23 = vpop.f32.mrf.mxu0  ;;  %v7344_v24 = vpop.f32.mrf.mxu1 }
 0x345   :  { %v1385_v19 = vadd.f32 %v1384_v56, %v1261_v23  ;;  %v1845_v56 = vpop.permute.xlu0 %1844 }
 0x346   :  { %v7331_v55 = vpop.f32.mrf.mxu0  ;;  %v1396_v48 = vpop.f32.mrf.mxu1 }
 0x347   :  { %v1403_v43 = vadd.f32 %v7344_v24, %v7331_v55 }
 0x348   :  { %v1281_v51 = vpop.f32.mrf.mxu0  ;;  %v7364_v31 = vpop.f32.mrf.mxu1 }
 0x349   :  { %v1397_v42 = vadd.f32 %v1396_v48, %v1281_v51 }
 0x34a   :  { %v8052_v53 = vpop.eup %8051  ;;  %v7351_v52 = vpop.f32.mrf.mxu0 }
 0x34b   :  { %1876 = vrot.lane.b32.xlu0 %v8052_v53, %s8127_s19  ;;  %v1588_v53 = vpop.f32.mrf.mxu1  ;;  %v1486_v33 = vadd.f32 %v7351_v52, %v1379_v35  ;;  %v1847_v35 = vpop.permute.xlu0 %1846 }
 0x34c   :  { %v1478_v17 = vpop.f32.mrf.mxu0 }
 0x34d   :  { %v8054_v57 = vpop.eup %8053  ;;  %v7367_v21 = vpop.f32.mrf.mxu1  ;;  %v1479_v25 = vadd.f32 %v1478_v17, %v1373_v16  ;;  %v1597_v5 = vadd.f32 %v7364_v31, %v1486_v33 }
 0x34e   :  { %1878 = vrot.lane.b32.xlu1 %v8054_v57, %s8127_s19  ;;  %v7354_v28 = vpop.f32.mrf.mxu0 }
 0x34f   :  { %v1604_v12 = vpop.f32.mrf.mxu1  ;;  %v1500_v29 = vadd.f32 %v7354_v28, %v1391_v46  ;;  %v1589_v39 = vadd.f32 %v1588_v53, %v1479_v25  ;;  %v1853_v46 = vpop.permute.xlu1 %1852 }
 0x350   :  { %v1492_v20 = vpop.f32.mrf.mxu0 }
 0x351   :  { %v7370_v9 = vpop.f32.mrf.mxu1  ;;  %v1493_v58 = vadd.f32 %v1492_v20, %v1385_v19  ;;  %v1613_v20 = vadd.f32 %v7367_v21, %v1500_v29 }
 0x352   :  { %v7357_v57 = vpop.f32.mrf.mxu0 }
 0x353   :  { %v1620_v7 = vpop.f32.mrf.mxu1  ;;  %v1605_v38 = vadd.f32 %v1604_v12, %v1493_v58  ;;  %v1514_v49 = vadd.f32 %v7357_v57, %v1403_v43 }
 0x354   :  { %v1506_v13 = vpop.f32.mrf.mxu0 }
 0x355   :  { %v7390_v59 = vpop.f32.mrf.mxu1  ;;  %v1507_v34 = vadd.f32 %v1506_v13, %v1397_v42  ;;  %v1629_v51 = vadd.f32 %v7370_v9, %v1514_v49 }
 0x356   :  { %v7377_v26 = vpop.f32.mrf.mxu0 }
 0x357   :  { %v1808_v1 = vpop.f32.mrf.mxu1  ;;  %v1621_v19 = vadd.f32 %v1620_v7, %v1507_v34  ;;  %v1712_v24 = vadd.f32 %v7377_v26, %v1597_v5  ;;  %v1863_v34 = vpop.permute.xlu0 %1862 }
 0x358   :  { %v1705_v63 = vpop.f32.mrf.mxu0 }
 0x359   :  { %v7393_v32 = vpop.f32.mrf.mxu1  ;;  %v1706_v41 = vadd.f32 %v1705_v63, %v1589_v39  ;;  %v1815_v52 = vadd.f32 %v7390_v59, %v1712_v24  ;;  %v1865_v39 = vpop.permute.xlu1 %1864 }
 0x35a   :  { %v7380_v6 = vpop.f32.mrf.mxu0 }
 0x35b   :  { %v1820_v27 = vpop.f32.mrf.mxu1  ;;  %v1724_v12 = vadd.f32 %v7380_v6, %v1613_v20  ;;  %v1809_v25 = vadd.f32 %v1808_v1, %v1706_v41  ;;  %v1851_v63 = vmul.f32 %v1847_v35, %v1815_v52 }
 0x35c   :  { %v1717_v37 = vpop.f32.mrf.mxu0 }
 0x35d   :  { %v1718_v23 = vadd.f32 %v1717_v37, %v1605_v38  ;;  %v7396_v16 = vpop.f32.mrf.mxu1  ;;  %v1827_v58 = vadd.f32 %v7393_v32, %v1724_v12  ;;  %v1850_v37 = vmul.f32 %v1845_v56, %v1809_v25 }
 0x35e   :  { %v7383_v30 = vpop.f32.mrf.mxu0 }
 0x35f   :  { %v1821_v48 = vadd.f32 %v1820_v27, %v1718_v23  ;;  %v1736_v28 = vadd.f32 %v7383_v30, %v1629_v51  ;;  %v1832_v13 = vpop.f32.mrf.mxu1  ;;  %v1859_v49 = vmul.f32 %v1855_v62, %v1827_v58 }
 0x360   :  { %v1729_v17 = vpop.f32.mrf.mxu0 }
 0x361   :  { %v1730_v42 = vadd.f32 %v1729_v17, %v1621_v19  ;;  %v1858_v43 = vmul.f32 %v1853_v46, %v1821_v48  ;;  %v1839_v29 = vadd.f32 %v7396_v16, %v1736_v28  ;;  %v1861_v9 = vadd.f32 %v1859_v49, %v1851_v63  ;;  %v6748_v19 = vld [vmem:[%s9357_s2 + $0x1] ss:$0 sm:$0xff] }
 0x363   :  { %v1833_v33 = vadd.f32 %v1832_v13, %v1730_v42  ;;  %v1860_v38 = vadd.f32 %v1858_v43, %v1850_v37  ;;  %v1869_v26 = vmul.f32 %v1865_v39, %v1839_v29 }
 0x365   :  { %v1868_v27 = vmul.f32 %v1863_v34, %v1833_v33  ;;  %v1871_v1 = vadd.f32 %v1869_v26, %v1861_v9 }
 0x367   :  { %v1870_v7 = vadd.f32 %v1868_v27, %v1860_v38 }
 0x3bd   :  { %v1877_v21 = vpop.permute.xlu0 %1876 }
 0x3be   :  { %v1882_v31 = vmul.f32 %v1877_v21, %v1870_v7 }
 0x3c0   :  { %v1894_v30 = vsel %vm539_vm1, %v1882_v31, 0  ;;  %v1879_v6 = vpop.permute.xlu1 %1878 }
 0x3c1   :  { %v1968_v59 = vand.u32 4294901760, %v1894_v30  ;;  %v1883_v32 = vmul.f32 %v1879_v6, %v1871_v1 }
 0x3c3   :  { %v1969_v55 = vsub.f32 %v1894_v30, %v1968_v59  ;;  %v1897_v60 = vsel %vm539_vm1, %v1883_v32, 0  ;;  %7416 = vmatprep.mubr.f32.mxu1 %v1968_v59 }
 0x3c4   :  { %v1978_v10 = vand.u32 4294901760, %v1897_v60 }
 0x3c5   :  { %v1970_v36 = vand.u32 4294901760, %v1969_v55 }
 0x3c6   :  { %v1979_v53 = vsub.f32 %v1897_v60, %v1978_v10  ;;  %7417 = vmatmul.mubr.f32.vlgmr.msra.gmra.mxu1 %v1978_v10  ;;  %v2472_v60 = vld [vmem:[%s9356_s1 + $0x60] sm:$0xff] }
 0x3c7   :  { %7431 = vmatpush3.msra.mxu1 %v8482_v61  ;;  %7438 = vmatprep.mubr.f32.mxu1 %v1970_v36  ;;  %v1971_v57 = vsub.f32 %v1969_v55, %v1970_v36 }
 0x3c8   :  { %7432 = vmatprep.subr.mxu1 %v8490_v3  ;;  %v1980_v56 = vand.u32 4294901760, %v1979_v53 }
 0x3c9   :  { %7433 = vmatpush3.msra.mxu1 %v8490_v3  ;;  %v1972_v62 = vand.u32 4294901760, %v1971_v57 }
 0x3ca   :  { %7434 = vmatprep.subr.mxu1 %v8503_v18  ;;  %v1981_v23 = vsub.f32 %v1979_v53, %v1980_v56 }
 0x3cb   :  { %7405 = vmatprep.mubr.f32.mxu0 %v1972_v62  ;;  %7435 = vmatpush3.msra.mxu1 %v8503_v18 }
 0x3cc   :  { %7436 = vmatprep.subr.mxu1 %v8519_v45  ;;  %v1982_v5 = vand.u32 4294901760, %v1981_v23 }
 0x3cd   :  { %7437 = vmatpush3.msra.mxu1 %v8519_v45 }
 0x3ce   :  { %7439 = vmatmul.mubr.f32.vlgmr.msra.gmra.mxu1 %v1980_v56  ;;  %7452 = vmatprep.subr.mxu1 %v8482_v61 }
 0x3cf   :  { %7406 = vmatmul.mubr.f32.vlgmr.msra.gmra.mxu0 %v1982_v5  ;;  %7453 = vmatpush3.msra.mxu1 %v8482_v61 }
 0x3d0   :  { %7420 = vmatpush3.msra.mxu0 %v8488_v2  ;;  %7460 = vmatprep.mubr.f32.mxu1 %v1968_v59 }
 0x3d1   :  { %7421 = vmatprep.subr.mxu0 %v8501_v15  ;;  %7427 = vmatprep.mubr.f32.mxu0 %v1969_v55  ;;  %v2473_v55 = vld [vmem:[%s9356_s1 + $0x68] sm:$0xff] }
 0x3d2   :  { %7454 = vmatprep.subr.mxu1 %v8490_v3  ;;  %7422 = vmatpush3.msra.mxu0 %v8501_v15  ;;  %v8613_v36 = vand.u32 4294901760, %v2473_v55 }
 0x3d3   :  { %7455 = vmatpush3.msra.mxu1 %v8490_v3  ;;  %7423 = vmatprep.subr.mxu0 %v8516_v54 }
 0x3d4   :  { %7456 = vmatprep.subr.mxu1 %v8503_v18  ;;  %7424 = vmatpush3.msra.mxu0 %v8516_v54  ;;  %9557 = vst [vmem:[#allocation49_spill] sm:$0xff] %v8613_v36  ;;  %v8620_v56 = vsub.f32 %v2473_v55, %v8613_v36 }
 0x3d5   :  { %7457 = vmatpush3.msra.mxu1 %v8503_v18  ;;  %7425 = vmatprep.subr.mxu0 %v8530_v4 }
 0x3d6   :  { %7458 = vmatprep.subr.mxu1 %v8519_v45  ;;  %7426 = vmatpush3.msra.mxu0 %v8530_v4  ;;  %9560 = vst [vmem:[#allocation52_spill] sm:$0xff] %v8620_v56  ;;  %v8631_v5 = vand.u32 4294901760, %v8620_v56 }
 0x3d7   :  { %7459 = vmatpush3.msra.mxu1 %v8519_v45  ;;  %7428 = vmatmul.mubr.f32.vlgmr.msra.gmra.mxu0 %v1979_v53  ;;  %v8615_v53 = vand.u32 4294901760, %v2472_v60 }
 0x3d8   :  { %7441 = vmatprep.subr.mxu0 %v8498_v14  ;;  %7461 = vmatmul.mubr.f32.vlgmr.msra.gmra.mxu1 %v1978_v10  ;;  %9563 = vst [vmem:[#allocation55_spill] sm:$0xff] %v8631_v5 }
 0x3d9   :  { %7442 = vmatpush3.msra.mxu0 %v8498_v14  ;;  %7449 = vmatprep.mubr.f32.mxu0 %v1968_v59  ;;  %9558 = vst [vmem:[#allocation50_spill] sm:$0xff] %v8615_v53  ;;  %v8623_v62 = vsub.f32 %v2472_v60, %v8615_v53 }
 0x3da   :  { %7443 = vmatprep.subr.mxu0 %v8513_v50 }
 0x3db   :  { %7444 = vmatpush3.msra.mxu0 %v8513_v50  ;;  %9561 = vst [vmem:[#allocation53_spill] sm:$0xff] %v8623_v62 }
 0x3dc   :  { %7445 = vmatprep.subr.mxu0 %v8527_v0 }
 0x3dd   :  { %7446 = vmatpush3.msra.mxu0 %v8527_v0 }
 0x3de   :  { %7447 = vmatprep.subr.mxu0 %v8541_v22 }
 0x3df   :  { %7448 = vmatpush3.msra.mxu0 %v8541_v22 }
 0x3e0   :  { %7450 = vmatmul.mubr.f32.vlgmr.msra.gmra.mxu0 %v1978_v10  ;;  %v2471_v10 = vld [vmem:[%s9356_s1 + $0x58] sm:$0xff]  ;;  %7463 = vmatprep.subr.mxu0 %v8613_v36 }
 0x3e1   :  { %v8617_v57 = vand.u32 4294901760, %v2471_v10  ;;  %7464 = vmatpush3.msra.mxu0 %v8613_v36 }
 0x3e2   :  { %7465 = vmatprep.subr.mxu0 %v8615_v53 }
 0x3e3   :  { %9559 = vst [vmem:[#allocation51_spill] sm:$0xff] %v8617_v57  ;;  %v8626_v23 = vsub.f32 %v2471_v10, %v8617_v57  ;;  %7466 = vmatpush3.msra.mxu0 %v8615_v53 }
 0x3e4   :  { %7467 = vmatprep.subr.mxu0 %v8617_v57 }
 0x3e5   :  { %9562 = vst [vmem:[#allocation54_spill] sm:$0xff] %v8626_v23  ;;  %7468 = vmatpush3.msra.mxu0 %v8617_v57 }
 0x486   :  { %v7418_v41 = vpop.f32.mrf.mxu1 }
 0x488   :  { %v2075_v24 = vpop.f32.mrf.mxu1 }
 0x48e   :  { %v7440_v35 = vpop.f32.mrf.mxu1 }
 0x48f   :  { %v7407_v20 = vpop.f32.mrf.mxu0 }
 0x490   :  { %v1985_v17 = vadd.f32 %v7407_v20, %v6748_v19  ;;  %v2245_v13 = vpop.f32.mrf.mxu1  ;;  %v8634_v20 = vand.u32 4294901760, %v8623_v62 }
 0x491   :  { %v1974_v51 = vpop.f32.mrf.mxu0 }
 0x492   :  { %v1975_v16 = vadd.f32 %v6748_v19, %v1974_v51  ;;  %v2082_v12 = vadd.f32 %v7418_v41, %v1985_v17  ;;  %9564 = vst [vmem:[#allocation56_spill] sm:$0xff] %v8634_v20  ;;  %v8637_v19 = vand.u32 4294901760, %v8626_v23  ;;  %v2602_v41 = vsub.f32 %v8620_v56, %v8631_v5 }
 0x493   :  { %v2609_v51 = vsub.f32 %v8623_v62, %v8634_v20 }
 0x494   :  { %v2076_v42 = vadd.f32 %v2075_v24, %v1975_v16  ;;  %9565 = vst [vmem:[#allocation57_spill] sm:$0xff] %v8637_v19  ;;  %v2616_v17 = vsub.f32 %v8626_v23, %v8637_v19  ;;  %v8649_v16 = vand.u32 4294901760, %v2602_v41  ;;  %v2470_v24 = vld [vmem:[%s9356_s1 + $0x50] sm:$0xff]  ;;  %v3038_v41 = vld [vmem:[%s9356_s1 + $0xa8] sm:$0xff] }
 0x496   :  { %9566 = vst [vmem:[#allocation58_spill] sm:$0xff] %v8649_v16  ;;  %7474 = vmatprep.subr.mxu1 %v8649_v16 }
 0x497   :  { %v7429_v48 = vpop.f32.mrf.mxu0  ;;  %7475 = vmatpush3.msra.mxu1 %v8649_v16 }
 0x498   :  { %v2169_v25 = vadd.f32 %v7429_v48, %v2082_v12  ;;  %v7462_v52 = vpop.f32.mrf.mxu1  ;;  %v8651_v48 = vand.u32 4294901760, %v2609_v51  ;;  %v8656_v12 = vand.u32 4294901760, %v2470_v24  ;;  %v8730_v51 = vand.u32 4294901760, %v3038_v41 }
 0x499   :  { %v2161_v46 = vpop.f32.mrf.mxu0 }
 0x49a   :  { %v2162_v28 = vadd.f32 %v2161_v46, %v2076_v42  ;;  %v2254_v43 = vadd.f32 %v7440_v35, %v2169_v25  ;;  %v2417_v39 = vpop.f32.mrf.mxu1  ;;  %9567 = vst [vmem:[#allocation59_spill] sm:$0xff] %v8651_v48  ;;  %9568 = vst [vmem:[#allocation60_spill] sm:$0xff] %v8656_v12  ;;  %v8659_v35 = vand.u32 4294901760, %v2616_v17  ;;  %v8663_v46 = vsub.f32 %v2470_v24, %v8656_v12  ;;  %v3037_v17 = vld [vmem:[%s9356_s1 + $0xa0] sm:$0xff] }
 0x49b   :  { %7469 = vmatprep.subr.mxu0 %v8656_v12  ;;  %7476 = vmatprep.subr.mxu1 %v8651_v48  ;;  %v8736_v24 = vsub.f32 %v3038_v41, %v8730_v51 }
 0x49c   :  { %v2246_v33 = vadd.f32 %v2245_v13, %v2162_v28  ;;  %9569 = vst [vmem:[#allocation61_spill] sm:$0xff] %v8659_v35  ;;  %9570 = vst [vmem:[#allocation62_spill] sm:$0xff] %v8663_v46  ;;  %7470 = vmatpush3.msra.mxu0 %v8656_v12  ;;  %7477 = vmatpush3.msra.mxu1 %v8651_v48  ;;  %v8670_v25 = vand.u32 4294901760, %v8663_v46 }
 0x49d   :  { %7485 = vmatprep.subr.mxu0 %v8620_v56  ;;  %7478 = vmatprep.subr.mxu1 %v8659_v35  ;;  %9573 = vst [vmem:[#allocation65_spill] sm:$0xff] %v8736_v24 }
 0x49e   :  { %9571 = vst [vmem:[#allocation63_spill] sm:$0xff] %v8670_v25  ;;  %7479 = vmatpush3.msra.mxu1 %v8659_v35  ;;  %v2623_v42 = vsub.f32 %v8663_v46, %v8670_v25 }
 0x4a0   :  { %v7451_v58 = vpop.f32.mrf.mxu0  ;;  %v8677_v28 = vand.u32 4294901760, %v2623_v42  ;;  %v8738_v42 = vand.u32 4294901760, %v3037_v17 }
 0x4a1   :  { %v2343_v37 = vadd.f32 %v7451_v58, %v2254_v43 }
 0x4a2   :  { %v2336_v29 = vpop.f32.mrf.mxu0  ;;  %9572 = vst [vmem:[#allocation64_spill] sm:$0xff] %v8677_v28  ;;  %7480 = vmatprep.subr.mxu1 %v8677_v28 }
 0x4a3   :  { %v2424_v34 = vadd.f32 %v7462_v52, %v2343_v37  ;;  %v2337_v38 = vadd.f32 %v2336_v29, %v2246_v33  ;;  %7481 = vmatpush3.msra.mxu1 %v8677_v28 }
 0x4a4   :  { %7496 = vmatprep.subr.mxu1 %v8613_v36 }
 0x4a5   :  { %v2418_v49 = vadd.f32 %v2417_v39, %v2337_v38  ;;  %v2428_v63 = vadd.f32 %v2424_v34, %v8247_v8  ;;  %v6749_v34 = vld [vmem:[%s9357_s2 + $0x2] ss:$0 sm:$0xff]  ;;  %v6750_v39 = vld [vmem:[%s9357_s2 + $0x3] ss:$0 sm:$0xff] }
 0x4a7   :  { %v2434_v27 = vsel %vm539_vm1, %v2428_v63, 0.0  ;;  %v2427_v26 = vadd.f32 %v2418_v49, %v8251_v11 }
 0x4a8   :  { %2435 = vadd.xlane.f32.xlu1 %v2434_v27 }
 0x4a9   :  { %v2431_v7 = vsel %vm539_vm1, %v2427_v26, 0.0 }
 0x4aa   :  { %2432 = vadd.xlane.f32.xlu0 %v2431_v7 }
 0x531   :  { %v2436_v9 = vpop.xlane.xlu1 %2435 }
 0x532   :  { %v2439_v21 = vmul.f32 0.03125, %v2436_v9 }
 0x533   :  { %v2433_v31 = vpop.xlane.xlu0 %2432 }
 0x534   :  { %v2438_v1 = vmul.f32 0.03125, %v2433_v31  ;;  %v8598_v30 = vsub.f32 %v2428_v63, %v2439_v21 }
 0x536   :  { %v2440_v6 = vsub.f32 %v2427_v26, %v2438_v1  ;;  %v2443_v8 = vmul.f32 %v8598_v30, %v8598_v30 }
 0x538   :  { %v2442_v59 = vmul.f32 %v2440_v6, %v2440_v6  ;;  %v2447_v11 = vsel %vm539_vm1, %v2443_v8, 0.0 }
 0x53a   :  { %v2444_v32 = vsel %vm539_vm1, %v2442_v59, 0.0 }
 0x53b   :  { %2445 = vadd.xlane.f32.xlu0 %v2444_v32 }
 0x53f   :  { %2448 = vadd.xlane.f32.xlu0 %v2447_v11 }
 0x5c4   :  { %v2446_v13 = vpop.xlane.xlu0 %2445 }
 0x5c5   :  { %v2450_v43 = vmul.f32 0.03125, %v2446_v13  ;;  %v3036_v13 = vld [vmem:[%s9356_s1 + $0x98] sm:$0xff] }
 0x5c7   :  { %v2452_v52 = vadd.f32 1e-12, %v2450_v43  ;;  %v3035_v43 = vld [vmem:[%s9356_s1 + $0x90] sm:$0xff] }
 0x5c8   :  { %v2449_v58 = vpop.xlane.xlu0 %2448 }
 0x5c9   :  { %8055 = vrsqrt.f32 %v2452_v52  ;;  %v2451_v37 = vmul.f32 0.03125, %v2449_v58  ;;  %v3034_v52 = vld [vmem:[%s9356_s1 + $0x88] sm:$0xff]  ;;  %v8752_v58 = vand.u32 4294901760, %v8736_v24 }
 0x5cb   :  { %v2453_v33 = vadd.f32 1e-12, %v2451_v37  ;;  %9574 = vst [vmem:[#allocation66_spill] sm:$0xff] %v8752_v58  ;;  %v8755_v37 = vsub.f32 %v3037_v17, %v8738_v42 }
 0x5cd   :  { %8057 = vrsqrt.f32 %v2453_v33  ;;  %9575 = vst [vmem:[#allocation67_spill] sm:$0xff] %v8755_v37  ;;  %v8757_v33 = vand.u32 4294901760, %v3036_v13 }
 0x5d6   :  { %v8056_v29 = vpop.eup %8055 }
 0x5d7   :  { %v2456_v38 = vmul.f32 %v8056_v29, %v2440_v6  ;;  %v8759_v29 = vand.u32 4294901760, %v3035_v43 }
 0x5d9   :  { %v2462_v49 = vmul.f32 %v6749_v34, %v2456_v38  ;;  %v3032_v38 = vld [vmem:[%s9356_s1 + $0x78] sm:$0xff] }
 0x5da   :  { %v8058_v63 = vpop.eup %8057 }
 0x5db   :  { %v8688_v27 = vadd.f32 %v6750_v39, %v2462_v49  ;;  %v2457_v26 = vmul.f32 %v8058_v63, %v8598_v30  ;;  %v8771_v49 = vand.u32 4294901760, %v3034_v52 }
 0x5dd   :  { %v2480_v7 = vsel %vm539_vm1, %v8688_v27, 0  ;;  %v2463_v9 = vmul.f32 %v6749_v34, %v2457_v26  ;;  %v3033_v34 = vld [vmem:[%s9356_s1 + $0x80] sm:$0xff]  ;;  %v8776_v26 = vand.u32 4294901760, %v3032_v38 }
 0x5de   :  { %v2554_v21 = vand.u32 4294901760, %v2480_v7  ;;  %v8773_v63 = vand.u32 4294901760, %v3033_v34 }
 0x5df   :  { %v8693_v31 = vadd.f32 %v6750_v39, %v2463_v9  ;;  %v3031_v39 = vld [vmem:[%s9356_s1 + $0x70] sm:$0xff]  ;;  %9576 = vst [vmem:[#allocation68_spill] sm:$0xff] %v8776_v26  ;;  %v3164_v9 = vsub.f32 %v8736_v24, %v8752_v58 }
 0x5e0   :  { %7482 = vmatprep.mubr.f32.mxu1 %v2554_v21  ;;  %v2555_v1 = vsub.f32 %v2480_v7, %v2554_v21  ;;  %v8778_v7 = vand.u32 4294901760, %v3031_v39 }
 0x5e1   :  { %v2483_v6 = vsel %vm539_vm1, %v8693_v31, 0 }
 0x5e2   :  { %v2564_v59 = vand.u32 4294901760, %v2483_v6  ;;  %v2556_v32 = vand.u32 4294901760, %v2555_v1  ;;  %9577 = vst [vmem:[#allocation69_spill] sm:$0xff] %v8778_v7 }
 0x5e4   :  { %v2565_v8 = vsub.f32 %v2483_v6, %v2564_v59  ;;  %7483 = vmatmul.mubr.f32.vlgmr.msra.gmra.mxu1 %v2564_v59  ;;  %v2557_v11 = vsub.f32 %v2555_v1, %v2556_v32  ;;  %v8789_v6 = vsub.f32 %v3035_v43, %v8759_v29 }
 0x5e5   :  { %7497 = vmatpush3.msra.mxu1 %v8613_v36  ;;  %7504 = vmatprep.mubr.f32.mxu1 %v2556_v32  ;;  %v8796_v32 = vsub.f32 %v3033_v34, %v8773_v63 }
 0x5e6   :  { %7498 = vmatprep.subr.mxu1 %v8615_v53  ;;  %v2558_v30 = vand.u32 4294901760, %v2557_v11  ;;  %v2566_v55 = vand.u32 4294901760, %v2565_v8  ;;  %9580 = vst [vmem:[#allocation72_spill] sm:$0xff] %v8789_v6  ;;  %v8803_v11 = vsub.f32 %v3031_v39, %v8778_v7 }
 0x5e7   :  { %7499 = vmatpush3.msra.mxu1 %v8615_v53  ;;  %9582 = vst [vmem:[#allocation74_spill] sm:$0xff] %v8796_v32  ;;  %v8820_v17 = vand.u32 4294901760, %v8796_v32 }
 0x5e8   :  { %7500 = vmatprep.subr.mxu1 %v8617_v57  ;;  %7471 = vmatprep.mubr.f32.mxu0 %v2558_v30  ;;  %v2567_v60 = vsub.f32 %v2565_v8, %v2566_v55  ;;  %9584 = vst [vmem:[#allocation76_spill] sm:$0xff] %v8803_v11  ;;  %v8805_v30 = vand.u32 4294901760, %v3164_v9 }
 0x5e9   :  { %7501 = vmatpush3.msra.mxu1 %v8617_v57  ;;  %9589 = vst [vmem:[#allocation81_spill] sm:$0xff] %v8820_v17 }
 0x5ea   :  { %7502 = vmatprep.subr.mxu1 %v8656_v12  ;;  %v2568_v10 = vand.u32 4294901760, %v2567_v60  ;;  %9585 = vst [vmem:[#allocation77_spill] sm:$0xff] %v8805_v30 }
 0x5eb   :  { %7503 = vmatpush3.msra.mxu1 %v8656_v12 }
 0x5ec   :  { %7505 = vmatmul.mubr.f32.vlgmr.msra.gmra.mxu1 %v2566_v55  ;;  %7518 = vmatprep.subr.mxu1 %v8613_v36 }
 0x5ed   :  { %7472 = vmatmul.mubr.f32.vlgmr.msra.gmra.mxu0 %v2568_v10  ;;  %7519 = vmatpush3.msra.mxu1 %v8613_v36  ;;  %v8813_v10 = vand.u32 4294901760, %v8789_v6 }
 0x5ee   :  { %7486 = vmatpush3.msra.mxu0 %v8620_v56  ;;  %7526 = vmatprep.mubr.f32.mxu1 %v2554_v21 }
 0x5ef   :  { %7487 = vmatprep.subr.mxu0 %v8623_v62  ;;  %7493 = vmatprep.mubr.f32.mxu0 %v2555_v1  ;;  %v8786_v1 = vsub.f32 %v3036_v13, %v8757_v33  ;;  %9587 = vst [vmem:[#allocation79_spill] sm:$0xff] %v8813_v10 }
 0x5f0   :  { %7520 = vmatprep.subr.mxu1 %v8615_v53  ;;  %7488 = vmatpush3.msra.mxu0 %v8623_v62 }
 0x5f1   :  { %7521 = vmatpush3.msra.mxu1 %v8615_v53  ;;  %7489 = vmatprep.subr.mxu0 %v8626_v23  ;;  %9579 = vst [vmem:[#allocation71_spill] sm:$0xff] %v8786_v1  ;;  %v8810_v60 = vand.u32 4294901760, %v8786_v1 }
 0x5f2   :  { %7522 = vmatprep.subr.mxu1 %v8617_v57  ;;  %7490 = vmatpush3.msra.mxu0 %v8626_v23 }
 0x5f3   :  { %7523 = vmatpush3.msra.mxu1 %v8617_v57  ;;  %7491 = vmatprep.subr.mxu0 %v8663_v46  ;;  %9586 = vst [vmem:[#allocation78_spill] sm:$0xff] %v8810_v60  ;;  %v3178_v43 = vsub.f32 %v8786_v1, %v8810_v60 }
 0x5f4   :  { %7524 = vmatprep.subr.mxu1 %v8656_v12  ;;  %7492 = vmatpush3.msra.mxu0 %v8663_v46 }
 0x5f5   :  { %7525 = vmatpush3.msra.mxu1 %v8656_v12  ;;  %7494 = vmatmul.mubr.f32.vlgmr.msra.gmra.mxu0 %v2565_v8  ;;  %v8799_v8 = vsub.f32 %v3032_v38, %v8776_v26  ;;  %v8838_v39 = vand.u32 4294901760, %v3178_v43 }
 0x5f6   :  { %7507 = vmatprep.subr.mxu0 %v8631_v5  ;;  %7527 = vmatmul.mubr.f32.vlgmr.msra.gmra.mxu1 %v2564_v59 }
 0x5f7   :  { %7508 = vmatpush3.msra.mxu0 %v8631_v5  ;;  %7515 = vmatprep.mubr.f32.mxu0 %v2554_v21  ;;  %v8783_v21 = vand.u32 4294901760, %v8755_v37  ;;  %9583 = vst [vmem:[#allocation75_spill] sm:$0xff] %v8799_v8  ;;  %v8831_v34 = vand.u32 4294901760, %v8799_v8  ;;  %9592 = vst [vmem:[#allocation84_spill] sm:$0xff] %v8838_v39 }
 0x5f8   :  { %7509 = vmatprep.subr.mxu0 %v8634_v20  ;;  %7548 = vmatprep.subr.mxu1 %v8805_v30 }
 0x5f9   :  { %7510 = vmatpush3.msra.mxu0 %v8634_v20  ;;  %9578 = vst [vmem:[#allocation70_spill] sm:$0xff] %v8783_v21  ;;  %v3171_v55 = vsub.f32 %v8755_v37, %v8783_v21  ;;  %9591 = vst [vmem:[#allocation83_spill] sm:$0xff] %v8831_v34  ;;  %7549 = vmatpush3.msra.mxu1 %v8805_v30  ;;  %v3206_v43 = vsub.f32 %v8799_v8, %v8831_v34 }
 0x5fa   :  { %7511 = vmatprep.subr.mxu0 %v8637_v19 }
 0x5fb   :  { %7512 = vmatpush3.msra.mxu0 %v8637_v19  ;;  %v8824_v13 = vand.u32 4294901760, %v3171_v55  ;;  %v3199_v55 = vsub.f32 %v8796_v32, %v8820_v17 }
 0x5fc   :  { %7513 = vmatprep.subr.mxu0 %v8670_v25 }
 0x5fd   :  { %7514 = vmatpush3.msra.mxu0 %v8670_v25  ;;  %9590 = vst [vmem:[#allocation82_spill] sm:$0xff] %v8824_v13  ;;  %7550 = vmatprep.subr.mxu1 %v8824_v13  ;;  %v8845_v25 = vand.u32 4294901760, %v8803_v11 }
 0x5fe   :  { %7516 = vmatmul.mubr.f32.vlgmr.msra.gmra.mxu0 %v2564_v59  ;;  %7529 = vmatprep.subr.mxu0 %v8730_v51  ;;  %v8793_v59 = vsub.f32 %v3034_v52, %v8771_v49  ;;  %v3185_v52 = vsub.f32 %v8789_v6, %v8813_v10 }
 0x5ff   :  { %7530 = vmatpush3.msra.mxu0 %v8730_v51  ;;  %9594 = vst [vmem:[#allocation86_spill] sm:$0xff] %v8845_v25  ;;  %7551 = vmatpush3.msra.mxu1 %v8824_v13  ;;  %v3213_v13 = vsub.f32 %v8803_v11, %v8845_v25 }
 0x600   :  { %7531 = vmatprep.subr.mxu0 %v8738_v42  ;;  %9581 = vst [vmem:[#allocation73_spill] sm:$0xff] %v8793_v59  ;;  %v8817_v41 = vand.u32 4294901760, %v8793_v59  ;;  %v8840_v9 = vand.u32 4294901760, %v3185_v52  ;;  %7552 = vmatprep.subr.mxu1 %v8838_v39  ;;  %v8859_v52 = vand.u32 4294901760, %v3199_v55 }
 0x601   :  { %7532 = vmatpush3.msra.mxu0 %v8738_v42  ;;  %7553 = vmatpush3.msra.mxu1 %v8838_v39  ;;  %v8873_v55 = vand.u32 4294901760, %v3213_v13 }
 0x602   :  { %7533 = vmatprep.subr.mxu0 %v8757_v33  ;;  %9588 = vst [vmem:[#allocation80_spill] sm:$0xff] %v8817_v41  ;;  %v3192_v38 = vsub.f32 %v8793_v59, %v8817_v41  ;;  %9593 = vst [vmem:[#allocation85_spill] sm:$0xff] %v8840_v9  ;;  %7554 = vmatprep.subr.mxu1 %v8840_v9 }
 0x603   :  { %7534 = vmatpush3.msra.mxu0 %v8757_v33  ;;  %9596 = vst [vmem:[#allocation88_spill] sm:$0xff] %v8859_v52  ;;  %7555 = vmatpush3.msra.mxu1 %v8840_v9  ;;  %9598 = vst [vmem:[#allocation90_spill] sm:$0xff] %v8873_v55 }
 0x604   :  { %7535 = vmatprep.subr.mxu0 %v8759_v29  ;;  %v8851_v19 = vand.u32 4294901760, %v3192_v38  ;;  %v8867_v38 = vand.u32 4294901760, %v3206_v43 }
 0x605   :  { %7536 = vmatpush3.msra.mxu0 %v8759_v29 }
 0x606   :  { %7537 = vmatprep.subr.mxu0 %v8771_v49  ;;  %9595 = vst [vmem:[#allocation87_spill] sm:$0xff] %v8851_v19  ;;  %7556 = vmatprep.subr.mxu1 %v8851_v19  ;;  %9597 = vst [vmem:[#allocation89_spill] sm:$0xff] %v8867_v38 }
 0x607   :  { %7538 = vmatpush3.msra.mxu0 %v8771_v49  ;;  %7557 = vmatpush3.msra.mxu1 %v8851_v19  ;;  %v6751_v19 = vld [vmem:[%s9357_s2 + $0x4] ss:$0 sm:$0xff] }
 0x608   :  { %7539 = vmatprep.subr.mxu0 %v8773_v63  ;;  %7558 = vmatprep.subr.mxu1 %v8859_v52 }
 0x609   :  { %7540 = vmatpush3.msra.mxu0 %v8773_v63  ;;  %7559 = vmatpush3.msra.mxu1 %v8859_v52 }
 0x60a   :  { %7541 = vmatprep.subr.mxu0 %v8776_v26  ;;  %7560 = vmatprep.subr.mxu1 %v8867_v38 }
 0x60b   :  { %7542 = vmatpush3.msra.mxu0 %v8776_v26  ;;  %7561 = vmatpush3.msra.mxu1 %v8867_v38 }
 0x60c   :  { %7543 = vmatprep.subr.mxu0 %v8778_v7  ;;  %7562 = vmatprep.subr.mxu1 %v8873_v55 }
 0x60d   :  { %7544 = vmatpush3.msra.mxu0 %v8778_v7  ;;  %7563 = vmatpush3.msra.mxu1 %v8873_v55 }
 0x60e   :  { %7567 = vmatprep.subr.mxu0 %v8736_v24  ;;  %7586 = vmatprep.subr.mxu1 %v8730_v51 }
 0x6a4   :  { %v7484_v9 = vpop.f32.mrf.mxu1 }
 0x6a6   :  { %v2661_v20 = vpop.f32.mrf.mxu1 }
 0x6ac   :  { %v7506_v46 = vpop.f32.mrf.mxu1 }
 0x6ad   :  { %v7473_v43 = vpop.f32.mrf.mxu0 }
 0x6ae   :  { %v2571_v39 = vadd.f32 %v7473_v43, %v6751_v19  ;;  %v2831_v55 = vpop.f32.mrf.mxu1 }
 0x6af   :  { %v2560_v13 = vpop.f32.mrf.mxu0 }
 0x6b0   :  { %v2561_v30 = vadd.f32 %v6751_v19, %v2560_v13  ;;  %v2668_v5 = vadd.f32 %v7484_v9, %v2571_v39 }
 0x6b2   :  { %v2662_v62 = vadd.f32 %v2661_v20, %v2561_v30 }
 0x6b5   :  { %v7495_v52 = vpop.f32.mrf.mxu0 }
 0x6b6   :  { %v2755_v23 = vadd.f32 %v7495_v52, %v2668_v5  ;;  %v7528_v57 = vpop.f32.mrf.mxu1 }
 0x6b7   :  { %v2747_v38 = vpop.f32.mrf.mxu0 }
 0x6b8   :  { %v2748_v56 = vadd.f32 %v2747_v38, %v2662_v62  ;;  %v2840_v12 = vadd.f32 %v7506_v46, %v2755_v23  ;;  %v3003_v0 = vpop.f32.mrf.mxu1 }
 0x6ba   :  { %v2832_v28 = vadd.f32 %v2831_v55, %v2748_v56 }
 0x6be   :  { %v7517_v53 = vpop.f32.mrf.mxu0 }
 0x6bf   :  { %v2929_v36 = vadd.f32 %v7517_v53, %v2840_v12 }
 0x6c0   :  { %v2922_v35 = vpop.f32.mrf.mxu0 }
 0x6c1   :  { %v3010_v22 = vadd.f32 %v7528_v57, %v2929_v36  ;;  %v2923_v48 = vadd.f32 %v2922_v35, %v2832_v28 }
 0x6c3   :  { %v3016_v43 = vmul.f32 0.044715, %v3010_v22  ;;  %v3004_v19 = vadd.f32 %v3003_v0, %v2923_v48  ;;  %v3014_v53 = vmul.f32 0.5, %v3010_v22 }
 0x6c5   :  { %v3018_v13 = vmul.f32 %v3016_v43, %v3010_v22  ;;  %v3015_v16 = vmul.f32 0.044715, %v3004_v19  ;;  %v3013_v36 = vmul.f32 0.5, %v3004_v19 }
 0x6c7   :  { %v3020_v39 = vmul.f32 %v3018_v13, %v3010_v22  ;;  %v3017_v9 = vmul.f32 %v3015_v16, %v3004_v19 }
 0x6c9   :  { %v3022_v50 = vadd.f32 %v3020_v39, %v3010_v22  ;;  %v3019_v5 = vmul.f32 %v3017_v9, %v3004_v19  ;;  %v9599_v39 = vld [vmem:[#allocation17_spill] sm:$0xff]  ;;  %v9602_v9 = vld [vmem:[#allocation10_spill] sm:$0xff] }
 0x6cb   :  { %v3024_v20 = vmul.f32 0.7978846, %v3022_v50  ;;  %v3021_v62 = vadd.f32 %v3019_v5, %v3004_v19  ;;  %v9604_v5 = vld [vmem:[#allocation6_spill] sm:$0xff] }
 0x6cd   :  { %v3023_v30 = vmul.f32 0.7978846, %v3021_v62  ;;  %8059 = vtanh.f32 %v3024_v20  ;;  %v6752_v62 = vld [vmem:[%s9357_s2 + $0x5] ss:$0 sm:$0xff] }
 0x6cf   :  { %8061 = vtanh.f32 %v3023_v30 }
 0x6da   :  { %v8060_v23 = vpop.eup %8059 }
 0x6db   :  { %v3028_v56 = vadd.f32 1.0, %v8060_v23 }
 0x6dc   :  { %v8062_v12 = vpop.eup %8061 }
 0x6dd   :  { %v3027_v57 = vadd.f32 1.0, %v8062_v12  ;;  %v3030_v35 = vmul.f32 %v3028_v56, %v3014_v53 }
 0x6df   :  { %v3029_v0 = vmul.f32 %v3027_v57, %v3013_v36  ;;  %v3049_v48 = vsel %vm3044_vm2, %v3030_v35, 0 }
 0x6e0   :  { %v8885_v46 = vand.u32 4294901760, %v3049_v48 }
 0x6e1   :  { %v3046_v16 = vsel %vm3044_vm2, %v3029_v0, 0 }
 0x6e2   :  { %v3124_v50 = vand.u32 4294901760, %v3046_v16  ;;  %v3135_v28 = vsub.f32 %v3049_v48, %v8885_v46 }
 0x6e4   :  { %7564 = vmatprep.mubr.f32.mxu1 %v3124_v50  ;;  %v3125_v52 = vsub.f32 %v3046_v16, %v3124_v50  ;;  %v3136_v38 = vand.u32 4294901760, %v3135_v28 }
 0x6e5   :  { %7565 = vmatmul.mubr.f32.vlgmr.msra.gmra.mxu1 %v8885_v46 }
 0x6e6   :  { %7587 = vmatpush3.msra.mxu1 %v8730_v51  ;;  %v3126_v22 = vand.u32 4294901760, %v3125_v52  ;;  %v3137_v55 = vsub.f32 %v3135_v28, %v3136_v38 }
 0x6e7   :  { %7588 = vmatprep.subr.mxu1 %v8738_v42 }
 0x6e8   :  { %7589 = vmatpush3.msra.mxu1 %v8738_v42  ;;  %7602 = vmatprep.mubr.f32.mxu1 %v3126_v22  ;;  %v3127_v43 = vsub.f32 %v3125_v52, %v3126_v22  ;;  %v3138_v13 = vand.u32 4294901760, %v3137_v55 }
 0x6e9   :  { %7590 = vmatprep.subr.mxu1 %v8757_v33 }
 0x6ea   :  { %7591 = vmatpush3.msra.mxu1 %v8757_v33  ;;  %v3128_v19 = vand.u32 4294901760, %v3127_v43 }
 0x6eb   :  { %7592 = vmatprep.subr.mxu1 %v8759_v29 }
 0x6ec   :  { %7593 = vmatpush3.msra.mxu1 %v8759_v29  ;;  %7545 = vmatprep.mubr.f32.mxu0 %v3128_v19 }
 0x6ed   :  { %7594 = vmatprep.subr.mxu1 %v8771_v49  ;;  %7546 = vmatmul.mubr.f32.vlgmr.msra.gmra.mxu0 %v3138_v13 }
 0x6ee   :  { %7568 = vmatpush3.msra.mxu0 %v8736_v24  ;;  %7595 = vmatpush3.msra.mxu1 %v8771_v49 }
 0x6ef   :  { %7569 = vmatprep.subr.mxu0 %v8755_v37  ;;  %7583 = vmatprep.mubr.f32.mxu0 %v3125_v52 }
 0x6f0   :  { %7596 = vmatprep.subr.mxu1 %v8773_v63  ;;  %7570 = vmatpush3.msra.mxu0 %v8755_v37 }
 0x6f1   :  { %7597 = vmatpush3.msra.mxu1 %v8773_v63  ;;  %7571 = vmatprep.subr.mxu0 %v8786_v1 }
 0x6f2   :  { %7598 = vmatprep.subr.mxu1 %v8776_v26  ;;  %7572 = vmatpush3.msra.mxu0 %v8786_v1 }
 0x6f3   :  { %7599 = vmatpush3.msra.mxu1 %v8776_v26  ;;  %7573 = vmatprep.subr.mxu0 %v8789_v6 }
 0x6f4   :  { %7600 = vmatprep.subr.mxu1 %v8778_v7  ;;  %7574 = vmatpush3.msra.mxu0 %v8789_v6 }
 0x6f5   :  { %7601 = vmatpush3.msra.mxu1 %v8778_v7  ;;  %7575 = vmatprep.subr.mxu0 %v8793_v59 }
 0x6f6   :  { %7603 = vmatmul.mubr.f32.vlgmr.msra.gmra.mxu1 %v3136_v38  ;;  %7624 = vmatprep.subr.mxu1 %v8730_v51 }
 0x6f7   :  { %7576 = vmatpush3.msra.mxu0 %v8793_v59  ;;  %7625 = vmatpush3.msra.mxu1 %v8730_v51 }
 0x6f8   :  { %7640 = vmatprep.mubr.f32.mxu1 %v3124_v50  ;;  %7577 = vmatprep.subr.mxu0 %v8796_v32 }
 0x6f9   :  { %7626 = vmatprep.subr.mxu1 %v8738_v42  ;;  %7578 = vmatpush3.msra.mxu0 %v8796_v32 }
 0x6fa   :  { %7627 = vmatpush3.msra.mxu1 %v8738_v42  ;;  %7579 = vmatprep.subr.mxu0 %v8799_v8 }
 0x6fb   :  { %7628 = vmatprep.subr.mxu1 %v8757_v33  ;;  %7580 = vmatpush3.msra.mxu0 %v8799_v8 }
 0x6fc   :  { %7629 = vmatpush3.msra.mxu1 %v8757_v33  ;;  %7581 = vmatprep.subr.mxu0 %v8803_v11 }
 0x6fd   :  { %7630 = vmatprep.subr.mxu1 %v8759_v29  ;;  %7582 = vmatpush3.msra.mxu0 %v8803_v11 }
 0x6fe   :  { %7631 = vmatpush3.msra.mxu1 %v8759_v29  ;;  %7584 = vmatmul.mubr.f32.vlgmr.msra.gmra.mxu0 %v3135_v28 }
 0x6ff   :  { %7605 = vmatprep.subr.mxu0 %v8752_v58  ;;  %7632 = vmatprep.subr.mxu1 %v8771_v49 }
 0x700   :  { %7606 = vmatpush3.msra.mxu0 %v8752_v58  ;;  %7621 = vmatprep.mubr.f32.mxu0 %v3124_v50 }
 0x701   :  { %7633 = vmatpush3.msra.mxu1 %v8771_v49  ;;  %7607 = vmatprep.subr.mxu0 %v8783_v21 }
 0x702   :  { %7634 = vmatprep.subr.mxu1 %v8773_v63  ;;  %7608 = vmatpush3.msra.mxu0 %v8783_v21 }
 0x703   :  { %7635 = vmatpush3.msra.mxu1 %v8773_v63  ;;  %7609 = vmatprep.subr.mxu0 %v8810_v60 }
 0x704   :  { %7636 = vmatprep.subr.mxu1 %v8776_v26  ;;  %7610 = vmatpush3.msra.mxu0 %v8810_v60 }
 0x705   :  { %7637 = vmatpush3.msra.mxu1 %v8776_v26  ;;  %7611 = vmatprep.subr.mxu0 %v8813_v10 }
 0x706   :  { %7638 = vmatprep.subr.mxu1 %v8778_v7  ;;  %7612 = vmatpush3.msra.mxu0 %v8813_v10 }
 0x707   :  { %7639 = vmatpush3.msra.mxu1 %v8778_v7  ;;  %7613 = vmatprep.subr.mxu0 %v8817_v41 }
 0x708   :  { %7641 = vmatmul.mubr.f32.vlgmr.msra.gmra.mxu1 %v8885_v46  ;;  %7614 = vmatpush3.msra.mxu0 %v8817_v41 }
 0x709   :  { %7615 = vmatprep.subr.mxu0 %v8820_v17  ;;  %7654 = vmatprep.subr.mxu1 %v8209_v40 }
 0x70a   :  { %7616 = vmatpush3.msra.mxu0 %v8820_v17  ;;  %7655 = vmatpush3.msra.mxu1 %v8209_v40  ;;  %v9600_v40 = vld [vmem:[#allocation5_spill] sm:$0xff] }
 0x70b   :  { %7617 = vmatprep.subr.mxu0 %v8831_v34  ;;  %7656 = vmatprep.subr.mxu1 %v8222_v44 }
 0x70c   :  { %7618 = vmatpush3.msra.mxu0 %v8831_v34  ;;  %7657 = vmatpush3.msra.mxu1 %v8222_v44  ;;  %v9601_v44 = vld [vmem:[#allocation7_spill] sm:$0xff] }
 0x70d   :  { %7619 = vmatprep.subr.mxu0 %v8845_v25  ;;  %7658 = vmatprep.subr.mxu1 %v8232_v47 }
 0x70e   :  { %7620 = vmatpush3.msra.mxu0 %v8845_v25  ;;  %7659 = vmatpush3.msra.mxu1 %v8232_v47  ;;  %v9603_v47 = vld [vmem:[#allocation13_spill] sm:$0xff] }
 0x70f   :  { %7622 = vmatmul.mubr.f32.vlgmr.msra.gmra.mxu0 %v8885_v46  ;;  %7660 = vmatprep.subr.mxu1 %v9599_v39 }
 0x710   :  { %7661 = vmatpush3.msra.mxu1 %v9599_v39  ;;  %7643 = vmatprep.subr.mxu0 %v9600_v40 }
 0x711   :  { %7676 = vmatprep.subr.mxu1 %v9600_v40  ;;  %7644 = vmatpush3.msra.mxu0 %v9600_v40 }
 0x712   :  { %7645 = vmatprep.subr.mxu0 %v9601_v44 }
 0x713   :  { %7646 = vmatpush3.msra.mxu0 %v9601_v44 }
 0x714   :  { %7647 = vmatprep.subr.mxu0 %v9602_v9 }
 0x715   :  { %7648 = vmatpush3.msra.mxu0 %v9602_v9 }
 0x716   :  { %7649 = vmatprep.subr.mxu0 %v9603_v47 }
 0x717   :  { %7650 = vmatpush3.msra.mxu0 %v9603_v47 }
 0x718   :  { %7665 = vmatprep.subr.mxu0 %v9604_v5 }
 0x7a5   :  { %v7566_v30 = vpop.f32.mrf.mxu1 }
 0x7a7   :  { %v3251_v36 = vpop.f32.mrf.mxu1 }
 0x7ad   :  { %v7547_v20 = vpop.f32.mrf.mxu0 }
 0x7ae   :  { %v3141_v53 = vadd.f32 %v7547_v20, %v6752_v62 }
 0x7af   :  { %v3130_v23 = vpop.f32.mrf.mxu0 }
 0x7b0   :  { %v3131_v12 = vadd.f32 %v6752_v62, %v3130_v23  ;;  %v3258_v57 = vadd.f32 %v7566_v30, %v3141_v53 }
 0x7b2   :  { %v3252_v46 = vadd.f32 %v3251_v36, %v3131_v12 }
 0x7b6   :  { %v7604_v35 = vpop.f32.mrf.mxu1 }
 0x7b8   :  { %v3433_v50 = vpop.f32.mrf.mxu1 }
 0x7be   :  { %v7585_v56 = vpop.f32.mrf.mxu0 }
 0x7bf   :  { %v3353_v48 = vadd.f32 %v7585_v56, %v3258_v57 }
 0x7c0   :  { %v3345_v0 = vpop.f32.mrf.mxu0 }
 0x7c1   :  { %v3346_v16 = vadd.f32 %v3345_v0, %v3252_v46  ;;  %v3442_v28 = vadd.f32 %v7604_v35, %v3353_v48 }
 0x7c3   :  { %v3434_v55 = vadd.f32 %v3433_v50, %v3346_v16 }
 0x7c8   :  { %v7642_v52 = vpop.f32.mrf.mxu1 }
 0x7ca   :  { %v3621_v39 = vpop.f32.mrf.mxu1 }
 0x7cf   :  { %v7623_v38 = vpop.f32.mrf.mxu0 }
 0x7d0   :  { %v3543_v22 = vadd.f32 %v7623_v38, %v3442_v28 }
 0x7d1   :  { %v3536_v43 = vpop.f32.mrf.mxu0 }
 0x7d2   :  { %v3628_v19 = vadd.f32 %v7642_v52, %v3543_v22  ;;  %v3537_v13 = vadd.f32 %v3536_v43, %v3434_v55  ;;  %v6753_v43 = vld [vmem:[%s9357_s2 + $0x6] ss:$0 sm:$0xff] }
 0x7d4   :  { %v3622_v20 = vadd.f32 %v3621_v39, %v3537_v13  ;;  %v3632_v62 = vadd.f32 %v3628_v19, %v8693_v31  ;;  %v6754_v39 = vld [vmem:[%s9357_s2 + $0x7] ss:$0 sm:$0xff] }
 0x7d6   :  { %v3638_v30 = vsel %vm539_vm1, %v3632_v62, 0.0  ;;  %v3631_v23 = vadd.f32 %v3622_v20, %v8688_v27 }
 0x7d7   :  { %3639 = vadd.xlane.f32.xlu0 %v3638_v30 }
 0x7d8   :  { %v3635_v53 = vsel %vm539_vm1, %v3631_v23, 0.0 }
 0x7d9   :  { %3636 = vadd.xlane.f32.xlu1 %v3635_v53 }
 0x860   :  { %v3640_v56 = vpop.xlane.xlu0 %3639 }
 0x861   :  { %v3642_v12 = vmul.f32 0.03125, %v3640_v56 }
 0x862   :  { %v3637_v36 = vpop.xlane.xlu1 %3636 }
 0x863   :  { %v3644_v57 = vsub.f32 %v3632_v62, %v3642_v12  ;;  %v3641_v35 = vmul.f32 0.03125, %v3637_v36 }
 0x865   :  { %v3643_v0 = vsub.f32 %v3631_v23, %v3641_v35  ;;  %v3646_v48 = vmul.f32 %v3644_v57, %v3644_v57 }
 0x867   :  { %v3650_v46 = vsel %vm539_vm1, %v3646_v48, 0.0  ;;  %v3645_v16 = vmul.f32 %v3643_v0, %v3643_v0 }
 0x868   :  { %3651 = vadd.xlane.f32.xlu0 %v3650_v46 }
 0x869   :  { %v3647_v31 = vsel %vm539_vm1, %v3645_v16, 0.0 }
 0x86a   :  { %3648 = vadd.xlane.f32.xlu1 %v3647_v31 }
 0x8f1   :  { %v3652_v50 = vpop.xlane.xlu0 %3651 }
 0x8f2   :  { %v3654_v27 = vmul.f32 0.03125, %v3652_v50 }
 0x8f3   :  { %v3649_v28 = vpop.xlane.xlu1 %3648 }
 0x8f4   :  { %v3656_v52 = vadd.f32 1e-12, %v3654_v27  ;;  %v3653_v38 = vmul.f32 0.03125, %v3649_v28  ;;  %v9605_v28 = vld [vmem:[#allocation9_spill] sm:$0xff] }
 0x8f6   :  { %8063 = vrsqrt.f32 %v3656_v52  ;;  %v3655_v22 = vadd.f32 1e-12, %v3653_v38  ;;  %v9606_v52 = vld [vmem:[#allocation12_spill] sm:$0xff]  ;;  %v9610_v38 = vld [vmem:[#allocation18_spill] sm:$0xff] }
 0x8f8   :  { %8065 = vrsqrt.f32 %v3655_v22  ;;  %v9612_v22 = vld [vmem:[#allocation16_spill] sm:$0xff] }
 0x903   :  { %v8064_v55 = vpop.eup %8063 }
 0x904   :  { %v3660_v19 = vmul.f32 %v8064_v55, %v3644_v57 }
 0x905   :  { %v8066_v13 = vpop.eup %8065 }
 0x906   :  { %v3659_v20 = vmul.f32 %v8066_v13, %v3643_v0  ;;  %v3666_v62 = vmul.f32 %v6753_v43, %v3660_v19  ;;  %v8095_v13 = vld [vmem:[%s9357_s2 + $0x10] sm:$0xff] }
 0x908   :  { %v3665_v30 = vmul.f32 %v6753_v43, %v3659_v20  ;;  %v8987_v23 = vadd.f32 %v6754_v39, %v3666_v62  ;;  %v8096_v20 = vld [vmem:[%s9357_s2 + $0x8] sm:$0xff] }
 0x90a   :  { %v8989_v53 = vadd.f32 %v6754_v39, %v3665_v30  ;;  %v3677_v56 = vsel %vm539_vm1, %v8987_v23, 0 }
 0x90b   :  { %v3758_v12 = vand.u32 4294901760, %v3677_v56 }
 0x90c   :  { %v3674_v36 = vsel %vm539_vm1, %v8989_v53, 0 }
 0x90d   :  { %v3748_v57 = vand.u32 4294901760, %v3674_v36  ;;  %v3759_v35 = vsub.f32 %v3677_v56, %v3758_v12 }
 0x90f   :  { %7662 = vmatprep.mubr.f32.mxu1 %v3748_v57  ;;  %v3749_v48 = vsub.f32 %v3674_v36, %v3748_v57  ;;  %v3760_v46 = vand.u32 4294901760, %v3759_v35 }
 0x910   :  { %7663 = vmatmul.mubr.f32.vlgmr.msra.gmra.mxu1 %v3758_v12 }
 0x911   :  { %7677 = vmatpush3.msra.mxu1 %v9600_v40  ;;  %v3750_v0 = vand.u32 4294901760, %v3749_v48  ;;  %v3761_v31 = vsub.f32 %v3759_v35, %v3760_v46 }
 0x912   :  { %7678 = vmatprep.subr.mxu1 %v9601_v44 }
 0x913   :  { %7679 = vmatpush3.msra.mxu1 %v9601_v44  ;;  %7684 = vmatprep.mubr.f32.mxu1 %v3750_v0  ;;  %v3751_v16 = vsub.f32 %v3749_v48, %v3750_v0  ;;  %v3762_v27 = vand.u32 4294901760, %v3761_v31 }
 0x914   :  { %7680 = vmatprep.subr.mxu1 %v9602_v9 }
 0x915   :  { %7681 = vmatpush3.msra.mxu1 %v9602_v9  ;;  %v3752_v50 = vand.u32 4294901760, %v3751_v16 }
 0x916   :  { %7682 = vmatprep.subr.mxu1 %v9603_v47 }
 0x917   :  { %7683 = vmatpush3.msra.mxu1 %v9603_v47  ;;  %7651 = vmatprep.mubr.f32.mxu0 %v3752_v50 }
 0x918   :  { %7685 = vmatmul.mubr.f32.vlgmr.msra.gmra.mxu1 %v3760_v46  ;;  %7698 = vmatprep.subr.mxu1 %v9600_v40 }
 0x919   :  { %7652 = vmatmul.mubr.f32.vlgmr.msra.gmra.mxu0 %v3762_v27  ;;  %7699 = vmatpush3.msra.mxu1 %v9600_v40  ;;  %v9607_v40 = vld [vmem:[#allocation15_spill] sm:$0xff] }
 0x91a   :  { %7666 = vmatpush3.msra.mxu0 %v9604_v5  ;;  %7706 = vmatprep.mubr.f32.mxu1 %v3748_v57  ;;  %v9608_v5 = vld [vmem:[#allocation8_spill] sm:$0xff] }
 0x91b   :  { %7667 = vmatprep.subr.mxu0 %v9605_v28  ;;  %7673 = vmatprep.mubr.f32.mxu0 %v3749_v48 }
 0x91c   :  { %7700 = vmatprep.subr.mxu1 %v9601_v44  ;;  %7668 = vmatpush3.msra.mxu0 %v9605_v28 }
 0x91d   :  { %7701 = vmatpush3.msra.mxu1 %v9601_v44  ;;  %7669 = vmatprep.subr.mxu0 %v9606_v52  ;;  %v9609_v44 = vld [vmem:[#allocation11_spill] sm:$0xff] }
 0x91e   :  { %7702 = vmatprep.subr.mxu1 %v9602_v9  ;;  %7670 = vmatpush3.msra.mxu0 %v9606_v52 }
 0x91f   :  { %7703 = vmatpush3.msra.mxu1 %v9602_v9  ;;  %7671 = vmatprep.subr.mxu0 %v9607_v40  ;;  %v9611_v9 = vld [vmem:[#allocation14_spill] sm:$0xff] }
 0x920   :  { %7704 = vmatprep.subr.mxu1 %v9603_v47  ;;  %7672 = vmatpush3.msra.mxu0 %v9607_v40 }
 0x921   :  { %7705 = vmatpush3.msra.mxu1 %v9603_v47  ;;  %7674 = vmatmul.mubr.f32.vlgmr.msra.gmra.mxu0 %v3759_v35  ;;  %v9613_v47 = vld [vmem:[#allocation21_spill] sm:$0xff] }
 0x922   :  { %7687 = vmatprep.subr.mxu0 %v9608_v5  ;;  %7707 = vmatmul.mubr.f32.vlgmr.msra.gmra.mxu1 %v3758_v12 }
 0x923   :  { %7688 = vmatpush3.msra.mxu0 %v9608_v5  ;;  %7695 = vmatprep.mubr.f32.mxu0 %v3748_v57 }
 0x924   :  { %7689 = vmatprep.subr.mxu0 %v9609_v44  ;;  %7726 = vmatprep.mubr.f32.mxu1 %v9610_v38 }
 0x925   :  { %7690 = vmatpush3.msra.mxu0 %v9609_v44 }
 0x926   :  { %7691 = vmatprep.subr.mxu0 %v9611_v9 }
 0x927   :  { %7692 = vmatpush3.msra.mxu0 %v9611_v9 }
 0x928   :  { %7693 = vmatprep.subr.mxu0 %v9612_v22 }
 0x929   :  { %7694 = vmatpush3.msra.mxu0 %v9612_v22 }
 0x92a   :  { %7696 = vmatmul.mubr.f32.vlgmr.msra.gmra.mxu0 %v3758_v12 }
 0x92b   :  { %7713 = vmatprep.mubr.f32.mxu0 %v9613_v47 }
 0x9d0   :  { %v7664_v43 = vpop.f32.mrf.mxu1 }
 0x9d2   :  { %v3855_v56 = vpop.f32.mrf.mxu1 }
 0x9d8   :  { %v7686_v57 = vpop.f32.mrf.mxu1 }
 0x9d9   :  { %v7653_v55 = vpop.f32.mrf.mxu0 }
 0x9da   :  { %v3765_v39 = vadd.f32 %v8095_v13, %v7653_v55  ;;  %v4025_v0 = vpop.f32.mrf.mxu1  ;;  %v9614_v13 = vld [vmem:[#allocation36_spill] sm:$0xff] }
 0x9db   :  { %v3754_v19 = vpop.f32.mrf.mxu0 }
 0x9dc   :  { %v3755_v62 = vadd.f32 %v8096_v20, %v3754_v19  ;;  %v3862_v36 = vadd.f32 %v7664_v43, %v3765_v39 }
 0x9de   :  { %v3856_v48 = vadd.f32 %v3855_v56, %v3755_v62  ;;  %v9615_v62 = vld [vmem:[#allocation38_spill] sm:$0xff] }
 0x9e1   :  { %v7675_v30 = vpop.f32.mrf.mxu0 }
 0x9e2   :  { %v3949_v35 = vadd.f32 %v7675_v30, %v3862_v36  ;;  %v7708_v31 = vpop.f32.mrf.mxu1 }
 0x9e3   :  { %v3941_v12 = vpop.f32.mrf.mxu0 }
 0x9e4   :  { %v3942_v46 = vadd.f32 %v3941_v12, %v3856_v48  ;;  %v4034_v16 = vadd.f32 %v7686_v57, %v3949_v35  ;;  %v4197_v44 = vpop.f32.mrf.mxu1  ;;  %v9616_v57 = vld [vmem:[#allocation39_spill] sm:$0xff]  ;;  %v9617_v12 = vld [vmem:[#allocation40_spill] sm:$0xff]  ;;  %v9618_v35 = vld [vmem:[#allocation41_spill] sm:$0xff] }
 0x9e5   :  { %v9619_v48 = vld [vmem:[#allocation22_spill] sm:$0xff] }
 0x9e6   :  { %v4026_v28 = vadd.f32 %v4025_v0, %v3942_v46  ;;  %v9620_v46 = vld [vmem:[#allocation23_spill] sm:$0xff] }
 0x9e7   :  { %v9621_v0 = vld [vmem:[#allocation19_spill] sm:$0xff] }
 0x9ea   :  { %v7697_v50 = vpop.f32.mrf.mxu0 }
 0x9eb   :  { %v4123_v27 = vadd.f32 %v7697_v50, %v4034_v16  ;;  %v9622_v16 = vld [vmem:[#allocation24_spill] sm:$0xff]  ;;  %v9624_v50 = vld [vmem:[#allocation27_spill] sm:$0xff] }
 0x9ec   :  { %v4116_v52 = vpop.f32.mrf.mxu0 }
 0x9ed   :  { %v9033_v40 = vadd.f32 %v7708_v31, %v4123_v27  ;;  %v4117_v5 = vadd.f32 %v4116_v52, %v4026_v28  ;;  %v9623_v31 = vld [vmem:[#allocation25_spill] sm:$0xff]  ;;  %v9625_v27 = vld [vmem:[#allocation26_spill] sm:$0xff] }
 0x9ee   :  { %v9626_v28 = vld [vmem:[#allocation30_spill] sm:$0xff]  ;;  %v9627_v52 = vld [vmem:[#allocation29_spill] sm:$0xff] }
 0x9ef   :  { %v9035_v9 = vadd.f32 %v4197_v44, %v4117_v5  ;;  %4211 = vrot.lane.b32.xlu0 %v9033_v40, %s8127_s19  ;;  %v4306_v22 = vand.u32 4294901760, %v9033_v40  ;;  %v9628_v5 = vld [vmem:[#allocation20_spill] sm:$0xff] }
 0x9f0   :  { %v9629_v44 = vld [vmem:[#allocation32_spill] sm:$0xff] }
 0x9f1   :  { %7709 = vmatprep.subr.mxu0 %v4306_v22  ;;  %4209 = vrot.lane.b32.xlu1 %v9035_v9, %s8127_s19  ;;  %v4309_v47 = vand.u32 4294901760, %v9035_v9  ;;  %v4434_v55 = vsub.f32 %v9033_v40, %v4306_v22 }
 0x9f2   :  { %7710 = vmatpush3.msra.mxu0 %v4306_v22 }
 0x9f3   :  { %7711 = vmatprep.subr.mxu0 %v4309_v47  ;;  %v4441_v43 = vsub.f32 %v9035_v9, %v4309_v47  ;;  %v4435_v19 = vand.u32 4294901760, %v4434_v55 }
 0x9f4   :  { %7712 = vmatpush3.msra.mxu0 %v4309_v47 }
 0x9f5   :  { %4217 = vrot.lane.b32.xlu1 %v9035_v9, %s8126_s18  ;;  %7714 = vmatmul.mubr.f32.vlgmr.msra.gmra.mxu0 %v9614_v13  ;;  %v4436_v39 = vsub.f32 %v4434_v55, %v4435_v19  ;;  %v4442_v20 = vand.u32 4294901760, %v4441_v43  ;;  %v9633_v13 = vld [vmem:[#allocation33_spill] sm:$0xff] }
 0x9f6   :  { %7735 = vmatprep.subr.mxu0 %v4434_v55  ;;  %7716 = vmatprep.mubr.f32.mxu0 %v9615_v62  ;;  %v9639_v62 = vld [vmem:[#allocation48_spill] sm:$0xff] }
 0x9f7   :  { %7736 = vmatpush3.msra.mxu0 %v4434_v55  ;;  %v4437_v30 = vand.u32 4294901760, %v4436_v39  ;;  %v4443_v56 = vsub.f32 %v4441_v43, %v4442_v20  ;;  %v9630_v55 = vld [vmem:[#allocation28_spill] sm:$0xff]  ;;  %v9634_v39 = vld [vmem:[#allocation35_spill] sm:$0xff] }
 0x9f8   :  { %7737 = vmatprep.subr.mxu0 %v4441_v43 }
 0x9f9   :  { %7738 = vmatpush3.msra.mxu0 %v4441_v43  ;;  %7722 = vmatprep.subr.mxu1 %v4437_v30  ;;  %v4444_v36 = vand.u32 4294901760, %v4443_v56  ;;  %v9631_v43 = vld [vmem:[#allocation34_spill] sm:$0xff] }
 0x9fa   :  { %4219 = vrot.lane.b32.xlu1 %v9033_v40, %s8126_s18  ;;  %7717 = vmatmul.mubr.f32.gmra.mxu0 %v9616_v57 }
 0x9fb   :  { %7761 = vmatprep.subr.mxu0 %v4435_v19  ;;  %7723 = vmatpush3.msra.mxu1 %v4437_v30 }
 0x9fc   :  { %7724 = vmatprep.subr.mxu1 %v4444_v36  ;;  %7719 = vmatprep.mubr.f32.mxu0 %v9617_v12 }
 0x9fd   :  { %7725 = vmatpush3.msra.mxu1 %v4444_v36 }
 0x9fe   :  { %7720 = vmatmul.mubr.f32.gmra.mxu0 %v9618_v35  ;;  %7727 = vmatmul.mubr.f32.vlgmr.msra.gmra.mxu1 %v9619_v48 }
 0x9ff   :  { %7748 = vmatprep.subr.mxu1 %v4306_v22  ;;  %7729 = vmatprep.mubr.f32.mxu1 %v9620_v46 }
 0xa00   :  { %7749 = vmatpush3.msra.mxu1 %v4306_v22  ;;  %7739 = vmatprep.mubr.f32.mxu0 %v9621_v0 }
 0xa01   :  { %7750 = vmatprep.subr.mxu1 %v4309_v47 }
 0xa02   :  { %7751 = vmatpush3.msra.mxu1 %v4309_v47  ;;  %7740 = vmatmul.mubr.f32.vlgmr.msra.gmra.mxu0 %v9622_v16 }
 0xa03   :  { %7730 = vmatmul.mubr.f32.gmra.mxu1 %v9623_v31  ;;  %7762 = vmatpush3.msra.mxu0 %v4435_v19  ;;  %v9632_v19 = vld [vmem:[#allocation31_spill] sm:$0xff] }
 0xa04   :  { %7774 = vmatprep.subr.mxu1 %v4306_v22  ;;  %7763 = vmatprep.subr.mxu0 %v4442_v20 }
 0xa05   :  { %7764 = vmatpush3.msra.mxu0 %v4442_v20  ;;  %7732 = vmatprep.mubr.f32.mxu1 %v9624_v50  ;;  %v9635_v20 = vld [vmem:[#allocation43_spill] sm:$0xff] }
 0xa06   :  { %7742 = vmatprep.mubr.f32.mxu0 %v9625_v27  ;;  %7787 = vmatprep.subr.mxu0 %v8482_v61 }
 0xa07   :  { %7733 = vmatmul.mubr.f32.gmra.mxu1 %v9626_v28  ;;  %7743 = vmatmul.mubr.f32.gmra.mxu0 %v9627_v52 }
 0xa08   :  { %7752 = vmatprep.mubr.f32.mxu1 %v9628_v5  ;;  %7745 = vmatprep.mubr.f32.mxu0 %v9629_v44 }
 0xa0b   :  { %7753 = vmatmul.mubr.f32.vlgmr.msra.gmra.mxu1 %v9630_v55  ;;  %7746 = vmatmul.mubr.f32.gmra.mxu0 %v9631_v43 }
 0xa0c   :  { %7775 = vmatpush3.msra.mxu1 %v4306_v22  ;;  %7755 = vmatprep.mubr.f32.mxu1 %v9632_v19  ;;  %v9636_v22 = vld [vmem:[#allocation37_spill] sm:$0xff] }
 0xa0d   :  { %7776 = vmatprep.subr.mxu1 %v4309_v47  ;;  %7765 = vmatprep.mubr.f32.mxu0 %v9610_v38 }
 0xa0e   :  { %7777 = vmatpush3.msra.mxu1 %v4309_v47  ;;  %v9637_v47 = vld [vmem:[#allocation45_spill] sm:$0xff] }
 0xa0f   :  { %7756 = vmatmul.mubr.f32.gmra.mxu1 %v9633_v13  ;;  %7766 = vmatmul.mubr.f32.vlgmr.msra.gmra.mxu0 %v9619_v48 }
 0xa10   :  { %7758 = vmatprep.mubr.f32.mxu1 %v9634_v39  ;;  %7768 = vmatprep.mubr.f32.mxu0 %v9620_v46 }
 0xa11   :  { %7798 = vmatprep.subr.mxu1 %v9635_v20  ;;  %7788 = vmatpush3.msra.mxu0 %v8482_v61 }
 0xa12   :  { %7789 = vmatprep.subr.mxu0 %v8490_v3 }
 0xa13   :  { %7759 = vmatmul.mubr.f32.gmra.mxu1 %v9636_v22  ;;  %7769 = vmatmul.mubr.f32.gmra.mxu0 %v9623_v31 }
 0xa14   :  { %7778 = vmatprep.mubr.f32.mxu1 %v9610_v38  ;;  %7771 = vmatprep.mubr.f32.mxu0 %v9624_v50  ;;  %v9638_v38 = vld [vmem:[#allocation47_spill] sm:$0xff] }
 0xa15   :  { %7790 = vmatpush3.msra.mxu0 %v8490_v3 }
 0xa16   :  { %7791 = vmatprep.subr.mxu0 %v8503_v18 }
 0xa17   :  { %7779 = vmatmul.mubr.f32.vlgmr.msra.gmra.mxu1 %v9619_v48  ;;  %7772 = vmatmul.mubr.f32.gmra.mxu0 %v9626_v28 }
 0xa18   :  { %7781 = vmatprep.mubr.f32.mxu1 %v9620_v46  ;;  %7799 = vmatpush3.msra.mxu1 %v9635_v20 }
 0xa19   :  { %7800 = vmatprep.subr.mxu1 %v9637_v47  ;;  %7792 = vmatpush3.msra.mxu0 %v8503_v18 }
 0xa1a   :  { %7801 = vmatpush3.msra.mxu1 %v9637_v47  ;;  %7793 = vmatprep.subr.mxu0 %v8519_v45 }
 0xa1b   :  { %7782 = vmatmul.mubr.f32.gmra.mxu1 %v9623_v31  ;;  %7802 = vmatprep.subr.mxu1 %v9638_v38 }
 0xa1c   :  { %7784 = vmatprep.mubr.f32.mxu1 %v9624_v50  ;;  %7803 = vmatpush3.msra.mxu1 %v9638_v38 }
 0xa1d   :  { %7804 = vmatprep.subr.mxu1 %v9639_v62  ;;  %7794 = vmatpush3.msra.mxu0 %v8519_v45 }
 0xa1e   :  { %7805 = vmatpush3.msra.mxu1 %v9639_v62  ;;  %7809 = vmatprep.subr.mxu0 %v8488_v2 }
 0xa1f   :  { %7785 = vmatmul.mubr.f32.gmra.mxu1 %v9626_v28  ;;  %7820 = vmatprep.subr.mxu1 %v8482_v61 }
 0xa61   :  { %v4212_v57 = vpop.permute.xlu0 %4211 }
 0xa62   :  { %v4216_v35 = vmax.f32 %v9033_v40, %v4212_v57 }
 0xa63   :  { %v4210_v30 = vpop.permute.xlu1 %4209 }
 0xa64   :  { %v4215_v56 = vmax.f32 %v9035_v9, %v4210_v30 }
 0xa67   :  { %v4218_v36 = vpop.permute.xlu1 %4217 }
 0xa68   :  { %v4223_v12 = vmax.f32 %v4215_v56, %v4218_v36 }
 0xa6a   :  { %4233 = vrot.lane.b32.xlu0 %v4223_v12, %s8128_s0  ;;  %v4225_v27 = vsub.f32 %v9035_v9, %v4223_v12 }
 0xa6c   :  { %v4220_v48 = vpop.permute.xlu1 %4219  ;;  %v4227_v43 = vmul.f32 1.442695, %v4225_v27 }
 0xa6d   :  { %v4224_v46 = vmax.f32 %v4216_v35, %v4220_v48 }
 0xa6e   :  { %4245 = vrot.lane.b32.xlu0 %v4223_v12, %s8126_s18 }
 0xa6f   :  { %4235 = vrot.lane.b32.xlu1 %v4224_v46, %s8128_s0  ;;  %v4226_v19 = vsub.f32 %v9033_v40, %v4224_v46 }
 0xa71   :  { %v4229_v22 = vmul.f32 1.442695, %v4226_v19 }
 0xa73   :  { %4247 = vrot.lane.b32.xlu1 %v4224_v46, %s8126_s18 }
 0xadc   :  { %v4234_v0 = vpop.permute.xlu0 %4233 }
 0xadd   :  { %v4239_v16 = vsub.f32 %v9035_v9, %v4234_v0 }
 0xadf   :  { %v4241_v31 = vmul.f32 1.442695, %v4239_v16 }
 0xae0   :  { %v4246_v50 = vpop.permute.xlu0 %4245 }
 0xae1   :  { %8067 = vpow2.f32 %v4241_v31  ;;  %v4251_v28 = vsub.f32 %v9035_v9, %v4246_v50  ;;  %v4236_v52 = vpop.permute.xlu1 %4235  ;;  %v7715_v50 = vpop.f32.mrf.mxu0 }
 0xae2   :  { %v4240_v5 = vsub.f32 %v9033_v40, %v4236_v52 }
 0xae3   :  { %v4253_v44 = vmul.f32 1.442695, %v4251_v28  ;;  %v4350_v27 = vpop.f32.mrf.mxu0  ;;  %v7728_v28 = vpop.f32.mrf.mxu1 }
 0xae4   :  { %v4243_v55 = vmul.f32 1.442695, %v4240_v5  ;;  %v4488_v58 = vadd.f32 %v7728_v28, %v7715_v50 }
 0xae5   :  { %8069 = vpow2.f32 %v4253_v44  ;;  %v4248_v13 = vpop.permute.xlu1 %4247  ;;  %v7718_v52 = vpop.f32.mrf.mxu0 }
 0xae6   :  { %8071 = vpow2.f32 %v4243_v55  ;;  %v4252_v39 = vsub.f32 %v9033_v40, %v4248_v13  ;;  %v4481_v5 = vpop.f32.mrf.mxu1 }
 0xae7   :  { %8073 = vpow2.f32 %v4227_v43  ;;  %v4370_v44 = vpop.f32.mrf.mxu0 }
 0xae8   :  { %v4255_v20 = vmul.f32 1.442695, %v4252_v39  ;;  %v7731_v55 = vpop.f32.mrf.mxu1 }
 0xae9   :  { %v7721_v43 = vpop.f32.mrf.mxu0  ;;  %v4500_v11 = vadd.f32 %v7731_v55, %v7718_v52 }
 0xaea   :  { %8075 = vpow2.f32 %v4255_v20  ;;  %v4493_v19 = vpop.f32.mrf.mxu1 }
 0xaeb   :  { %8077 = vpow2.f32 %v4229_v22  ;;  %v4390_v13 = vpop.f32.mrf.mxu0 }
 0xaec   :  { %v7734_v39 = vpop.f32.mrf.mxu1 }
 0xaed   :  { %v7741_v22 = vpop.f32.mrf.mxu0  ;;  %v4512_v32 = vadd.f32 %v7734_v39, %v7721_v43 }
 0xaee   :  { %v8068_v47 = vpop.eup %8067  ;;  %v4505_v20 = vpop.f32.mrf.mxu1  ;;  %v4595_v24 = vadd.f32 %v7741_v22, %v4488_v58 }
 0xaef   :  { %4259 = vrot.lane.b32.xlu0 %v8068_v47, %s8127_s19  ;;  %v4506_v41 = vadd.f32 %v4505_v20, %v4390_v13 }
 0xaf2   :  { %v8070_v9 = vpop.eup %8069 }
 0xaf3   :  { %v8072_v38 = vpop.eup %8071  ;;  %4269 = vrot.lane.b32.xlu0 %v8070_v9, %s8126_s18 }
 0xaf4   :  { %4261 = vrot.lane.b32.xlu1 %v8072_v38, %s8127_s19  ;;  %v8074_v62 = vpop.eup %8073 }
 0xaf7   :  { %v8076_v30 = vpop.eup %8075  ;;  %4953 = vrot.lane.b32.xlu0 %v8074_v62, %s8127_s19 }
 0xaf8   :  { %4271 = vrot.lane.b32.xlu1 %v8076_v30, %s8126_s18  ;;  %v8078_v40 = vpop.eup %8077 }
 0xafb   :  { %4955 = vrot.lane.b32.xlu0 %v8078_v40, %s8127_s19 }
 0xafc   :  { %4963 = vrot.lane.b32.xlu1 %v8072_v38, %s8126_s18 }
 0xaff   :  { %4971 = vrot.lane.b32.xlu0 %v8070_v9, %s8128_s0  ;;  %v7754_v9 = vpop.f32.mrf.mxu1 }
 0xb00   :  { %4961 = vrot.lane.b32.xlu1 %v8068_v47, %s8126_s18  ;;  %v4587_v47 = vpop.f32.mrf.mxu0  ;;  %v4706_v13 = vadd.f32 %v7754_v9, %v4595_v24 }
 0xb02   :  { %v7744_v38 = vpop.f32.mrf.mxu0 }
 0xb03   :  { %v4609_v7 = vadd.f32 %v7744_v38, %v4500_v11 }
 0xb04   :  { %4973 = vrot.lane.b32.xlu1 %v8076_v30, %s8128_s0  ;;  %v4601_v30 = vpop.f32.mrf.mxu0 }
 0xb61   :  { %v4260_v56 = vpop.permute.xlu0 %4259 }
 0xb62   :  { %v4265_v36 = vadd.f32 %v8074_v62, %v4260_v56  ;;  %v4697_v62 = vpop.f32.mrf.mxu1  ;;  %v7747_v56 = vpop.f32.mrf.mxu0 }
 0xb65   :  { %v4270_v57 = vpop.permute.xlu0 %4269 }
 0xb66   :  { %v4275_v12 = vadd.f32 %v4270_v57, %v4265_v36  ;;  %v4262_v35 = vpop.permute.xlu1 %4261  ;;  %v4615_v57 = vpop.f32.mrf.mxu0 }
 0xb67   :  { %v4266_v48 = vadd.f32 %v8078_v40, %v4262_v35  ;;  %v7757_v40 = vpop.f32.mrf.mxu1  ;;  %v4616_v6 = vadd.f32 %v4615_v57, %v4506_v41 }
 0xb68   :  { %8079 = vrcp.f32 %v4275_v12  ;;  %v4722_v20 = vadd.f32 %v7757_v40, %v4609_v7 }
 0xb69   :  { %v4713_v36 = vpop.f32.mrf.mxu1  ;;  %v4954_v26 = vpop.permute.xlu0 %4953 }
 0xb6a   :  { %v4272_v46 = vpop.permute.xlu1 %4271 }
 0xb6b   :  { %v4276_v0 = vadd.f32 %v4272_v46, %v4266_v48  ;;  %v7760_v12 = vpop.f32.mrf.mxu1  ;;  %v7767_v48 = vpop.f32.mrf.mxu0 }
 0xb6c   :  { %v4821_v55 = vadd.f32 %v7767_v48, %v4706_v13  ;;  %v9650_v13 = vld [vmem:[#allocation60_spill] sm:$0xff] }
 0xb6d   :  { %8081 = vrcp.f32 %v4276_v0  ;;  %v4729_v35 = vpop.f32.mrf.mxu1  ;;  %v4814_v46 = vpop.f32.mrf.mxu0 }
 0xb6f   :  { %v7780_v0 = vpop.f32.mrf.mxu1  ;;  %v7770_v25 = vpop.f32.mrf.mxu0 }
 0xb70   :  { %v4833_v43 = vadd.f32 %v7770_v25, %v4722_v20  ;;  %v9651_v20 = vld [vmem:[#allocation52_spill] sm:$0xff] }
 0xb71   :  { %v4917_v34 = vpop.f32.mrf.mxu1  ;;  %v4826_v60 = vpop.f32.mrf.mxu0 }
 0xb73   :  { %v7783_v21 = vpop.f32.mrf.mxu1  ;;  %v7773_v1 = vpop.f32.mrf.mxu0 }
 0xb75   :  { %v8080_v16 = vpop.eup %8079  ;;  %v4929_v37 = vpop.f32.mrf.mxu1 }
 0xb76   :  { %4985 = vrot.lane.b32.xlu0 %v8080_v16, %s8127_s19  ;;  %v4494_v16 = vadd.f32 %v4493_v19, %v4370_v44  ;;  %v4964_v44 = vpop.permute.xlu1 %4963  ;;  %v4730_v19 = vadd.f32 %v4729_v35, %v4616_v6  ;;  %v4936_v6 = vadd.f32 %v7783_v21, %v4833_v43 }
 0xb78   :  { %v4602_v17 = vadd.f32 %v4601_v30, %v4494_v16  ;;  %v7786_v16 = vpop.f32.mrf.mxu1 }
 0xb7a   :  { %v8082_v31 = vpop.eup %8081  ;;  %v4714_v8 = vadd.f32 %v4713_v36, %v4602_v17  ;;  %v4956_v17 = vpop.permute.xlu0 %4955 }
 0xb7b   :  { %4987 = vrot.lane.b32.xlu1 %v8082_v31, %s8127_s19  ;;  %v4482_v31 = vadd.f32 %v4481_v5, %v4350_v27  ;;  %v4623_v5 = vadd.f32 %v7747_v56, %v4512_v32  ;;  %v4962_v52 = vpop.permute.xlu1 %4961  ;;  %v4941_v58 = vpop.f32.mrf.mxu1  ;;  %v4924_v32 = vadd.f32 %v7780_v0, %v4821_v55 }
 0xb7c   :  { %v4827_v27 = vadd.f32 %v4826_v60, %v4714_v8 }
 0xb7d   :  { %v4588_v10 = vadd.f32 %v4587_v47, %v4482_v31  ;;  %v4838_v47 = vpop.f32.mrf.mxu0  ;;  %v4738_v28 = vadd.f32 %v7760_v12, %v4623_v5  ;;  %v4960_v38 = vmul.f32 %v4956_v17, %v4924_v32 }
 0xb7e   :  { %v4930_v50 = vadd.f32 %v4929_v37, %v4827_v27  ;;  %v4839_v41 = vadd.f32 %v4838_v47, %v4730_v19  ;;  %v4968_v37 = vmul.f32 %v4964_v44, %v4936_v6 }
 0xb7f   :  { %v4698_v59 = vadd.f32 %v4697_v62, %v4588_v10  ;;  %v4845_v39 = vadd.f32 %v7773_v1, %v4738_v28  ;;  %v4974_v9 = vpop.permute.xlu1 %4973  ;;  %v8097_v28 = vld [vmem:[%s9357_s2 + $0x1] ss:$0 sm:$0xff] }
 0xb80   :  { %v4967_v11 = vmul.f32 %v4962_v52, %v4930_v50  ;;  %v4942_v8 = vadd.f32 %v4941_v58, %v4839_v41  ;;  %v4970_v36 = vadd.f32 %v4968_v37, %v4960_v38 }
 0xb81   :  { %v4815_v30 = vadd.f32 %v4814_v46, %v4698_v59  ;;  %v4972_v59 = vpop.permute.xlu0 %4971  ;;  %v4948_v7 = vadd.f32 %v7786_v16, %v4845_v39 }
 0xb82   :  { %v4977_v60 = vmul.f32 %v4972_v59, %v4942_v8 }
 0xb83   :  { %v4918_v10 = vadd.f32 %v4917_v34, %v4815_v30  ;;  %v4978_v40 = vmul.f32 %v4974_v9, %v4948_v7  ;;  %v9649_v30 = vld [vmem:[#allocation51_spill] sm:$0xff] }
 0xb85   :  { %v4959_v22 = vmul.f32 %v4954_v26, %v4918_v10  ;;  %v4980_v1 = vadd.f32 %v4978_v40, %v4970_v36 }
 0xb87   :  { %v4969_v24 = vadd.f32 %v4967_v11, %v4959_v22 }
 0xb89   :  { %v4979_v62 = vadd.f32 %v4977_v60, %v4969_v24 }
 0xbe8   :  { %v4986_v34 = vpop.permute.xlu0 %4985 }
 0xbe9   :  { %v4991_v56 = vmul.f32 %v4986_v34, %v4979_v62 }
 0xbeb   :  { %v4994_v25 = vsel %vm539_vm1, %v4991_v56, 0 }
 0xbec   :  { %v5068_v57 = vand.u32 4294901760, %v4994_v25 }
 0xbed   :  { %v4988_v26 = vpop.permute.xlu1 %4987 }
 0xbee   :  { %v5069_v12 = vsub.f32 %v4994_v25, %v5068_v57  ;;  %v4992_v35 = vmul.f32 %v4988_v26, %v4980_v1  ;;  %7806 = vmatprep.mubr.f32.mxu1 %v5068_v57 }
 0xbf0   :  { %v4997_v21 = vsel %vm539_vm1, %v4992_v35, 0  ;;  %v5070_v48 = vand.u32 4294901760, %v5069_v12 }
 0xbf1   :  { %v5078_v46 = vand.u32 4294901760, %v4997_v21 }
 0xbf2   :  { %v5071_v0 = vsub.f32 %v5069_v12, %v5070_v48 }
 0xbf3   :  { %v5079_v31 = vsub.f32 %v4997_v21, %v5078_v46  ;;  %7807 = vmatmul.mubr.f32.vlgmr.msra.gmra.mxu1 %v5078_v46 }
 0xbf4   :  { %7821 = vmatpush3.msra.mxu1 %v8482_v61  ;;  %7828 = vmatprep.mubr.f32.mxu1 %v5070_v48  ;;  %v5072_v44 = vand.u32 4294901760, %v5071_v0 }
 0xbf5   :  { %7822 = vmatprep.subr.mxu1 %v8490_v3  ;;  %v5080_v27 = vand.u32 4294901760, %v5079_v31 }
 0xbf6   :  { %7823 = vmatpush3.msra.mxu1 %v8490_v3  ;;  %7795 = vmatprep.mubr.f32.mxu0 %v5072_v44 }
 0xbf7   :  { %7824 = vmatprep.subr.mxu1 %v8503_v18  ;;  %v5081_v5 = vsub.f32 %v5079_v31, %v5080_v27 }
 0xbf8   :  { %7825 = vmatpush3.msra.mxu1 %v8503_v18 }
 0xbf9   :  { %7826 = vmatprep.subr.mxu1 %v8519_v45  ;;  %v5082_v19 = vand.u32 4294901760, %v5081_v5 }
 0xbfa   :  { %7827 = vmatpush3.msra.mxu1 %v8519_v45 }
 0xbfb   :  { %7829 = vmatmul.mubr.f32.vlgmr.msra.gmra.mxu1 %v5080_v27  ;;  %7842 = vmatprep.subr.mxu1 %v8482_v61 }
 0xbfc   :  { %7796 = vmatmul.mubr.f32.vlgmr.msra.gmra.mxu0 %v5082_v19  ;;  %7843 = vmatpush3.msra.mxu1 %v8482_v61  ;;  %v9640_v61 = vld [vmem:[#allocation42_spill] sm:$0xff] }
 0xbfd   :  { %7810 = vmatpush3.msra.mxu0 %v8488_v2  ;;  %7850 = vmatprep.mubr.f32.mxu1 %v5068_v57  ;;  %v9641_v2 = vld [vmem:[#allocation58_spill] sm:$0xff] }
 0xbfe   :  { %7811 = vmatprep.subr.mxu0 %v8501_v15  ;;  %7817 = vmatprep.mubr.f32.mxu0 %v5069_v12 }
 0xbff   :  { %7844 = vmatprep.subr.mxu1 %v8490_v3  ;;  %7812 = vmatpush3.msra.mxu0 %v8501_v15  ;;  %v9643_v15 = vld [vmem:[#allocation59_spill] sm:$0xff] }
 0xc00   :  { %7845 = vmatpush3.msra.mxu1 %v8490_v3  ;;  %7813 = vmatprep.subr.mxu0 %v8516_v54  ;;  %v9642_v3 = vld [vmem:[#allocation44_spill] sm:$0xff] }
 0xc01   :  { %7846 = vmatprep.subr.mxu1 %v8503_v18  ;;  %7814 = vmatpush3.msra.mxu0 %v8516_v54  ;;  %v9646_v54 = vld [vmem:[#allocation64_spill] sm:$0xff] }
 0xc02   :  { %7847 = vmatpush3.msra.mxu1 %v8503_v18  ;;  %7815 = vmatprep.subr.mxu0 %v8530_v4  ;;  %v9644_v18 = vld [vmem:[#allocation46_spill] sm:$0xff] }
 0xc03   :  { %7848 = vmatprep.subr.mxu1 %v8519_v45  ;;  %7816 = vmatpush3.msra.mxu0 %v8530_v4  ;;  %v9648_v4 = vld [vmem:[#allocation50_spill] sm:$0xff] }
 0xc04   :  { %7849 = vmatpush3.msra.mxu1 %v8519_v45  ;;  %7818 = vmatmul.mubr.f32.vlgmr.msra.gmra.mxu0 %v5079_v31  ;;  %v9647_v45 = vld [vmem:[#allocation49_spill] sm:$0xff] }
 0xc05   :  { %7831 = vmatprep.subr.mxu0 %v8498_v14  ;;  %7851 = vmatmul.mubr.f32.vlgmr.msra.gmra.mxu1 %v5078_v46 }
 0xc06   :  { %7832 = vmatpush3.msra.mxu0 %v8498_v14  ;;  %7839 = vmatprep.mubr.f32.mxu0 %v5068_v57  ;;  %v9645_v14 = vld [vmem:[#allocation61_spill] sm:$0xff] }
 0xc07   :  { %7833 = vmatprep.subr.mxu0 %v9640_v61  ;;  %7864 = vmatprep.subr.mxu1 %v9641_v2 }
 0xc08   :  { %7834 = vmatpush3.msra.mxu0 %v9640_v61  ;;  %7865 = vmatpush3.msra.mxu1 %v9641_v2  ;;  %v8098_v2 = vld [vmem:[%s9357_s2 + $0x2] ss:$0 sm:$0xff] }
 0xc09   :  { %7835 = vmatprep.subr.mxu0 %v9642_v3  ;;  %7866 = vmatprep.subr.mxu1 %v9643_v15 }
 0xc0a   :  { %7836 = vmatpush3.msra.mxu0 %v9642_v3  ;;  %7867 = vmatpush3.msra.mxu1 %v9643_v15 }
 0xc0b   :  { %7837 = vmatprep.subr.mxu0 %v9644_v18  ;;  %7868 = vmatprep.subr.mxu1 %v9645_v14 }
 0xc0c   :  { %7838 = vmatpush3.msra.mxu0 %v9644_v18  ;;  %7869 = vmatpush3.msra.mxu1 %v9645_v14  ;;  %v8099_v18 = vld [vmem:[%s9357_s2 + $0x3] ss:$0 sm:$0xff] }
 0xc0d   :  { %7840 = vmatmul.mubr.f32.vlgmr.msra.gmra.mxu0 %v5078_v46  ;;  %7870 = vmatprep.subr.mxu1 %v9646_v54 }
 0xc0e   :  { %7871 = vmatpush3.msra.mxu1 %v9646_v54  ;;  %7853 = vmatprep.subr.mxu0 %v9647_v45 }
 0xc0f   :  { %7886 = vmatprep.subr.mxu1 %v9647_v45  ;;  %7854 = vmatpush3.msra.mxu0 %v9647_v45 }
 0xc10   :  { %7855 = vmatprep.subr.mxu0 %v9648_v4 }
 0xc11   :  { %7856 = vmatpush3.msra.mxu0 %v9648_v4 }
 0xc12   :  { %7857 = vmatprep.subr.mxu0 %v9649_v30 }
 0xc13   :  { %7858 = vmatpush3.msra.mxu0 %v9649_v30 }
 0xc14   :  { %7859 = vmatprep.subr.mxu0 %v9650_v13 }
 0xc15   :  { %7860 = vmatpush3.msra.mxu0 %v9650_v13 }
 0xc16   :  { %7875 = vmatprep.subr.mxu0 %v9651_v20 }
 0xcb3   :  { %v7808_v16 = vpop.f32.mrf.mxu1 }
 0xcb5   :  { %v5175_v41 = vpop.f32.mrf.mxu1 }
 0xcbb   :  { %v7830_v43 = vpop.f32.mrf.mxu1 }
 0xcbc   :  { %v7797_v47 = vpop.f32.mrf.mxu0 }
 0xcbd   :  { %v5085_v17 = vadd.f32 %v8097_v28, %v7797_v47  ;;  %v5345_v8 = vpop.f32.mrf.mxu1 }
 0xcbe   :  { %v5074_v50 = vpop.f32.mrf.mxu0 }
 0xcbf   :  { %v5075_v52 = vadd.f32 %v8097_v28, %v5074_v50  ;;  %v5182_v55 = vadd.f32 %v7808_v16, %v5085_v17 }
 0xcc1   :  { %v5176_v39 = vadd.f32 %v5175_v41, %v5075_v52 }
 0xcc4   :  { %v7819_v10 = vpop.f32.mrf.mxu0 }
 0xcc5   :  { %v5269_v11 = vadd.f32 %v7819_v10, %v5182_v55  ;;  %v7852_v6 = vpop.f32.mrf.mxu1 }
 0xcc6   :  { %v5261_v58 = vpop.f32.mrf.mxu0 }
 0xcc7   :  { %v5262_v22 = vadd.f32 %v5261_v58, %v5176_v39  ;;  %v5354_v32 = vadd.f32 %v7830_v43, %v5269_v11  ;;  %v5517_v38 = vpop.f32.mrf.mxu1 }
 0xcc9   :  { %v5346_v7 = vadd.f32 %v5345_v8, %v5262_v22  ;;  %v9652_v8 = vld [vmem:[#allocation53_spill] sm:$0xff] }
 0xccd   :  { %v7841_v59 = vpop.f32.mrf.mxu0 }
 0xcce   :  { %v5443_v24 = vadd.f32 %v7841_v59, %v5354_v32  ;;  %v9653_v32 = vld [vmem:[#allocation54_spill] sm:$0xff] }
 0xccf   :  { %v5436_v60 = vpop.f32.mrf.mxu0  ;;  %v9659_v59 = vld [vmem:[#allocation82_spill] sm:$0xff] }
 0xcd0   :  { %v5524_v9 = vadd.f32 %v7852_v6, %v5443_v24  ;;  %v5437_v37 = vadd.f32 %v5436_v60, %v5346_v7  ;;  %v9657_v6 = vld [vmem:[#allocation77_spill] sm:$0xff]  ;;  %v9661_v24 = vld [vmem:[#allocation84_spill] sm:$0xff]  ;;  %v9663_v60 = vld [vmem:[#allocation87_spill] sm:$0xff] }
 0xcd1   :  { %v9662_v7 = vld [vmem:[#allocation85_spill] sm:$0xff] }
 0xcd2   :  { %v5518_v62 = vadd.f32 %v5517_v38, %v5437_v37  ;;  %v5528_v40 = vadd.f32 %v5524_v9, %v8987_v23  ;;  %v9664_v9 = vld [vmem:[#allocation88_spill] sm:$0xff]  ;;  %v9665_v37 = vld [vmem:[#allocation89_spill] sm:$0xff]  ;;  %v9666_v38 = vld [vmem:[#allocation90_spill] sm:$0xff] }
 0xcd4   :  { %v5532_v34 = vsel %vm539_vm1, %v5528_v40, 0.0  ;;  %v5527_v56 = vadd.f32 %v5518_v62, %v8989_v53  ;;  %v9667_v62 = vld [vmem:[#allocation68_spill] sm:$0xff] }
 0xcd5   :  { %5533 = vadd.xlane.f32.xlu1 %v5532_v34  ;;  %v9669_v34 = vld [vmem:[#allocation65_spill] sm:$0xff] }
 0xcd6   :  { %v5529_v36 = vsel %vm539_vm1, %v5527_v56, 0.0 }
 0xcd7   :  { %5530 = vadd.xlane.f32.xlu0 %v5529_v36 }
 0xd5e   :  { %v5534_v25 = vpop.xlane.xlu1 %5533 }
 0xd5f   :  { %v5536_v57 = vmul.f32 0.03125, %v5534_v25 }
 0xd60   :  { %v5531_v1 = vpop.xlane.xlu0 %5530 }
 0xd61   :  { %v5535_v26 = vmul.f32 0.03125, %v5531_v1  ;;  %v5538_v12 = vsub.f32 %v5528_v40, %v5536_v57  ;;  %v9668_v40 = vld [vmem:[#allocation69_spill] sm:$0xff]  ;;  %v8100_v57 = vld [vmem:[%s9357_s2 + $0x4] ss:$0 sm:$0xff] }
 0xd63   :  { %v5537_v35 = vsub.f32 %v5527_v56, %v5535_v26  ;;  %v5540_v46 = vmul.f32 %v5538_v12, %v5538_v12 }
 0xd65   :  { %v5539_v21 = vmul.f32 %v5537_v35, %v5537_v35  ;;  %v5544_v23 = vsel %vm539_vm1, %v5540_v46, 0.0 }
 0xd67   :  { %v5541_v48 = vsel %vm539_vm1, %v5539_v21, 0.0 }
 0xd68   :  { %5542 = vadd.xlane.f32.xlu0 %v5541_v48 }
 0xd6c   :  { %5545 = vadd.xlane.f32.xlu0 %v5544_v23 }
 0xdf1   :  { %v5543_v0 = vpop.xlane.xlu0 %5542 }
 0xdf2   :  { %v5547_v53 = vmul.f32 0.03125, %v5543_v0 }
 0xdf4   :  { %v5549_v31 = vadd.f32 1e-12, %v5547_v53 }
 0xdf5   :  { %v5546_v44 = vpop.xlane.xlu0 %5545 }
 0xdf6   :  { %8083 = vrsqrt.f32 %v5549_v31  ;;  %v5548_v27 = vmul.f32 0.03125, %v5546_v44 }
 0xdf8   :  { %v5550_v5 = vadd.f32 1e-12, %v5548_v27 }
 0xdfa   :  { %8085 = vrsqrt.f32 %v5550_v5 }
 0xe03   :  { %v8084_v19 = vpop.eup %8083 }
 0xe04   :  { %v5553_v61 = vmul.f32 %v8084_v19, %v5537_v35 }
 0xe06   :  { %v5555_v3 = vmul.f32 %v8098_v2, %v5553_v61 }
 0xe07   :  { %v8086_v15 = vpop.eup %8085 }
 0xe08   :  { %v9190_v14 = vadd.f32 %v8099_v18, %v5555_v3  ;;  %v5554_v54 = vmul.f32 %v8086_v15, %v5538_v12 }
 0xe0a   :  { %v5560_v47 = vsel %vm539_vm1, %v9190_v14, 0  ;;  %v5556_v16 = vmul.f32 %v8098_v2, %v5554_v54 }
 0xe0b   :  { %v5634_v50 = vand.u32 4294901760, %v5560_v47 }
 0xe0c   :  { %v9194_v28 = vadd.f32 %v8099_v18, %v5556_v16 }
 0xe0d   :  { %7872 = vmatprep.mubr.f32.mxu1 %v5634_v50  ;;  %v5635_v17 = vsub.f32 %v5560_v47, %v5634_v50 }
 0xe0e   :  { %v5563_v52 = vsel %vm539_vm1, %v9194_v28, 0 }
 0xe0f   :  { %v5644_v10 = vand.u32 4294901760, %v5563_v52  ;;  %v5636_v41 = vand.u32 4294901760, %v5635_v17 }
 0xe11   :  { %v5645_v55 = vsub.f32 %v5563_v52, %v5644_v10  ;;  %7873 = vmatmul.mubr.f32.vlgmr.msra.gmra.mxu1 %v5644_v10  ;;  %v5637_v43 = vsub.f32 %v5635_v17, %v5636_v41 }
 0xe12   :  { %7887 = vmatpush3.msra.mxu1 %v9647_v45  ;;  %7894 = vmatprep.mubr.f32.mxu1 %v5636_v41 }
 0xe13   :  { %7888 = vmatprep.subr.mxu1 %v9648_v4  ;;  %v5638_v58 = vand.u32 4294901760, %v5637_v43  ;;  %v5646_v11 = vand.u32 4294901760, %v5645_v55 }
 0xe14   :  { %7889 = vmatpush3.msra.mxu1 %v9648_v4 }
 0xe15   :  { %7890 = vmatprep.subr.mxu1 %v9649_v30  ;;  %7861 = vmatprep.mubr.f32.mxu0 %v5638_v58  ;;  %v5647_v39 = vsub.f32 %v5645_v55, %v5646_v11 }
 0xe16   :  { %7891 = vmatpush3.msra.mxu1 %v9649_v30 }
 0xe17   :  { %7892 = vmatprep.subr.mxu1 %v9650_v13  ;;  %v5648_v22 = vand.u32 4294901760, %v5647_v39 }
 0xe18   :  { %7893 = vmatpush3.msra.mxu1 %v9650_v13 }
 0xe19   :  { %7895 = vmatmul.mubr.f32.vlgmr.msra.gmra.mxu1 %v5646_v11  ;;  %7908 = vmatprep.subr.mxu1 %v9647_v45 }
 0xe1a   :  { %7862 = vmatmul.mubr.f32.vlgmr.msra.gmra.mxu0 %v5648_v22  ;;  %7909 = vmatpush3.msra.mxu1 %v9647_v45  ;;  %v9654_v45 = vld [vmem:[#allocation62_spill] sm:$0xff] }
 0xe1b   :  { %7876 = vmatpush3.msra.mxu0 %v9651_v20  ;;  %7916 = vmatprep.mubr.f32.mxu1 %v5634_v50  ;;  %v9655_v20 = vld [vmem:[#allocation55_spill] sm:$0xff] }
 0xe1c   :  { %7877 = vmatprep.subr.mxu0 %v9652_v8  ;;  %7883 = vmatprep.mubr.f32.mxu0 %v5635_v17 }
 0xe1d   :  { %7910 = vmatprep.subr.mxu1 %v9648_v4  ;;  %7878 = vmatpush3.msra.mxu0 %v9652_v8 }
 0xe1e   :  { %7911 = vmatpush3.msra.mxu1 %v9648_v4  ;;  %7879 = vmatprep.subr.mxu0 %v9653_v32  ;;  %v9656_v4 = vld [vmem:[#allocation56_spill] sm:$0xff] }
 0xe1f   :  { %7912 = vmatprep.subr.mxu1 %v9649_v30  ;;  %7880 = vmatpush3.msra.mxu0 %v9653_v32 }
 0xe20   :  { %7913 = vmatpush3.msra.mxu1 %v9649_v30  ;;  %7881 = vmatprep.subr.mxu0 %v9654_v45  ;;  %v9658_v30 = vld [vmem:[#allocation57_spill] sm:$0xff] }
 0xe21   :  { %7914 = vmatprep.subr.mxu1 %v9650_v13  ;;  %7882 = vmatpush3.msra.mxu0 %v9654_v45 }
 0xe22   :  { %7915 = vmatpush3.msra.mxu1 %v9650_v13  ;;  %7884 = vmatmul.mubr.f32.vlgmr.msra.gmra.mxu0 %v5645_v55  ;;  %v9660_v13 = vld [vmem:[#allocation63_spill] sm:$0xff] }
 0xe23   :  { %7897 = vmatprep.subr.mxu0 %v9655_v20  ;;  %7917 = vmatmul.mubr.f32.vlgmr.msra.gmra.mxu1 %v5644_v10 }
 0xe24   :  { %7898 = vmatpush3.msra.mxu0 %v9655_v20  ;;  %7905 = vmatprep.mubr.f32.mxu0 %v5634_v50 }
 0xe25   :  { %7899 = vmatprep.subr.mxu0 %v9656_v4  ;;  %7938 = vmatprep.subr.mxu1 %v9657_v6 }
 0xe26   :  { %7900 = vmatpush3.msra.mxu0 %v9656_v4  ;;  %7939 = vmatpush3.msra.mxu1 %v9657_v6 }
 0xe27   :  { %7901 = vmatprep.subr.mxu0 %v9658_v30  ;;  %7940 = vmatprep.subr.mxu1 %v9659_v59 }
 0xe28   :  { %7902 = vmatpush3.msra.mxu0 %v9658_v30  ;;  %7941 = vmatpush3.msra.mxu1 %v9659_v59 }
 0xe29   :  { %7903 = vmatprep.subr.mxu0 %v9660_v13  ;;  %7942 = vmatprep.subr.mxu1 %v9661_v24 }
 0xe2a   :  { %7904 = vmatpush3.msra.mxu0 %v9660_v13  ;;  %7943 = vmatpush3.msra.mxu1 %v9661_v24 }
 0xe2b   :  { %7906 = vmatmul.mubr.f32.vlgmr.msra.gmra.mxu0 %v5644_v10  ;;  %7944 = vmatprep.subr.mxu1 %v9662_v7 }
 0xe2c   :  { %7945 = vmatpush3.msra.mxu1 %v9662_v7  ;;  %7919 = vmatprep.subr.mxu0 %v8730_v51 }
 0xe2d   :  { %7946 = vmatprep.subr.mxu1 %v9663_v60  ;;  %7920 = vmatpush3.msra.mxu0 %v8730_v51 }
 0xe2e   :  { %7947 = vmatpush3.msra.mxu1 %v9663_v60  ;;  %7921 = vmatprep.subr.mxu0 %v8738_v42 }
 0xe2f   :  { %7948 = vmatprep.subr.mxu1 %v9664_v9  ;;  %7922 = vmatpush3.msra.mxu0 %v8738_v42 }
 0xe30   :  { %7949 = vmatpush3.msra.mxu1 %v9664_v9  ;;  %7923 = vmatprep.subr.mxu0 %v8757_v33 }
 0xe31   :  { %7950 = vmatprep.subr.mxu1 %v9665_v37  ;;  %7924 = vmatpush3.msra.mxu0 %v8757_v33 }
 0xe32   :  { %7951 = vmatpush3.msra.mxu1 %v9665_v37  ;;  %7925 = vmatprep.subr.mxu0 %v8759_v29 }
 0xe33   :  { %7952 = vmatprep.subr.mxu1 %v9666_v38  ;;  %7926 = vmatpush3.msra.mxu0 %v8759_v29 }
 0xe34   :  { %7953 = vmatpush3.msra.mxu1 %v9666_v38  ;;  %7927 = vmatprep.subr.mxu0 %v8771_v49 }
 0xe35   :  { %7976 = vmatprep.subr.mxu1 %v8730_v51  ;;  %7928 = vmatpush3.msra.mxu0 %v8771_v49 }
 0xe36   :  { %7929 = vmatprep.subr.mxu0 %v8773_v63 }
 0xe37   :  { %7930 = vmatpush3.msra.mxu0 %v8773_v63 }
 0xe38   :  { %7931 = vmatprep.subr.mxu0 %v9667_v62 }
 0xe39   :  { %7932 = vmatpush3.msra.mxu0 %v9667_v62 }
 0xe3a   :  { %7933 = vmatprep.subr.mxu0 %v9668_v40 }
 0xe3b   :  { %7934 = vmatpush3.msra.mxu0 %v9668_v40 }
 0xe3c   :  { %7957 = vmatprep.subr.mxu0 %v9669_v34 }
 0xed1   :  { %v7874_v36 = vpop.f32.mrf.mxu1 }
 0xed3   :  { %v5741_v35 = vpop.f32.mrf.mxu1 }
 0xed9   :  { %v7896_v48 = vpop.f32.mrf.mxu1 }
 0xeda   :  { %v7863_v56 = vpop.f32.mrf.mxu0 }
 0xedb   :  { %v5651_v1 = vadd.f32 %v8100_v57, %v7863_v56  ;;  %v5911_v31 = vpop.f32.mrf.mxu1 }
 0xedc   :  { %v5640_v25 = vpop.f32.mrf.mxu0 }
 0xedd   :  { %v5641_v26 = vadd.f32 %v8100_v57, %v5640_v25  ;;  %v5748_v21 = vadd.f32 %v7874_v36, %v5651_v1  ;;  %v9670_v25 = vld [vmem:[#allocation67_spill] sm:$0xff]  ;;  %v9673_v1 = vld [vmem:[#allocation73_spill] sm:$0xff] }
 0xede   :  { %v9671_v57 = vld [vmem:[#allocation71_spill] sm:$0xff] }
 0xedf   :  { %v5742_v0 = vadd.f32 %v5741_v35, %v5641_v26  ;;  %v9674_v26 = vld [vmem:[#allocation74_spill] sm:$0xff]  ;;  %v9676_v35 = vld [vmem:[#allocation76_spill] sm:$0xff] }
 0xee2   :  { %v7885_v12 = vpop.f32.mrf.mxu0 }
 0xee3   :  { %v5835_v23 = vadd.f32 %v7885_v12, %v5748_v21  ;;  %v7918_v27 = vpop.f32.mrf.mxu1  ;;  %v9675_v12 = vld [vmem:[#allocation75_spill] sm:$0xff] }
 0xee4   :  { %v5827_v46 = vpop.f32.mrf.mxu0  ;;  %v9683_v21 = vld [vmem:[#allocation83_spill] sm:$0xff] }
 0xee5   :  { %v5828_v53 = vadd.f32 %v5827_v46, %v5742_v0  ;;  %v5920_v44 = vadd.f32 %v7896_v48, %v5835_v23  ;;  %v6083_v18 = vpop.f32.mrf.mxu1  ;;  %v8101_v23 = vld [vmem:[%s9357_s2 + $0x5] ss:$0 sm:$0xff] }
 0xee7   :  { %v5912_v61 = vadd.f32 %v5911_v31, %v5828_v53 }
 0xeeb   :  { %v7907_v5 = vpop.f32.mrf.mxu0 }
 0xeec   :  { %v6009_v19 = vadd.f32 %v7907_v5, %v5920_v44 }
 0xeed   :  { %v6002_v2 = vpop.f32.mrf.mxu0 }
 0xeee   :  { %v6090_v3 = vadd.f32 %v7918_v27, %v6009_v19  ;;  %v6003_v15 = vadd.f32 %v6002_v2, %v5912_v61 }
 0xef0   :  { %v6096_v54 = vmul.f32 0.044715, %v6090_v3  ;;  %v6084_v47 = vadd.f32 %v6083_v18, %v6003_v15  ;;  %v6094_v39 = vmul.f32 0.5, %v6090_v3 }
 0xef2   :  { %v6098_v16 = vmul.f32 %v6096_v54, %v6090_v3  ;;  %v6095_v50 = vmul.f32 0.044715, %v6084_v47  ;;  %v6093_v32 = vmul.f32 0.5, %v6084_v47 }
 0xef4   :  { %v6100_v17 = vmul.f32 %v6098_v16, %v6090_v3  ;;  %v6097_v52 = vmul.f32 %v6095_v50, %v6084_v47 }
 0xef6   :  { %v6102_v10 = vadd.f32 %v6100_v17, %v6090_v3  ;;  %v6099_v41 = vmul.f32 %v6097_v52, %v6084_v47 }
 0xef8   :  { %v6104_v55 = vmul.f32 0.7978846, %v6102_v10  ;;  %v6101_v43 = vadd.f32 %v6099_v41, %v6084_v47 }
 0xefa   :  { %v6103_v58 = vmul.f32 0.7978846, %v6101_v43  ;;  %8087 = vtanh.f32 %v6104_v55 }
 0xefc   :  { %8089 = vtanh.f32 %v6103_v58 }
 0xf07   :  { %v8088_v11 = vpop.eup %8087 }
 0xf08   :  { %v6108_v22 = vadd.f32 1.0, %v8088_v11 }
 0xf09   :  { %v8090_v8 = vpop.eup %8089 }
 0xf0a   :  { %v6107_v45 = vadd.f32 1.0, %v8090_v8  ;;  %v6110_v20 = vmul.f32 %v6108_v22, %v6094_v39 }
 0xf0c   :  { %v6109_v4 = vmul.f32 %v6107_v45, %v6093_v32  ;;  %v6115_v6 = vsel %vm3044_vm2, %v6110_v20, 0 }
 0xf0d   :  { %v9266_v30 = vand.u32 4294901760, %v6115_v6 }
 0xf0e   :  { %v6112_v59 = vsel %vm3044_vm2, %v6109_v4, 0 }
 0xf0f   :  { %v6190_v13 = vand.u32 4294901760, %v6112_v59  ;;  %v6201_v24 = vsub.f32 %v6115_v6, %v9266_v30 }
 0xf11   :  { %7954 = vmatprep.mubr.f32.mxu1 %v6190_v13  ;;  %v6191_v7 = vsub.f32 %v6112_v59, %v6190_v13  ;;  %v6202_v60 = vand.u32 4294901760, %v6201_v24 }
 0xf12   :  { %7955 = vmatmul.mubr.f32.vlgmr.msra.gmra.mxu1 %v9266_v30 }
 0xf13   :  { %7977 = vmatpush3.msra.mxu1 %v8730_v51  ;;  %v6192_v9 = vand.u32 4294901760, %v6191_v7  ;;  %v6203_v37 = vsub.f32 %v6201_v24, %v6202_v60 }
 0xf14   :  { %7978 = vmatprep.subr.mxu1 %v8738_v42 }
 0xf15   :  { %7979 = vmatpush3.msra.mxu1 %v8738_v42  ;;  %7992 = vmatprep.mubr.f32.mxu1 %v6192_v9  ;;  %v6193_v38 = vsub.f32 %v6191_v7, %v6192_v9  ;;  %v6204_v36 = vand.u32 4294901760, %v6203_v37 }
 0xf16   :  { %7980 = vmatprep.subr.mxu1 %v8757_v33 }
 0xf17   :  { %7981 = vmatpush3.msra.mxu1 %v8757_v33  ;;  %v6194_v56 = vand.u32 4294901760, %v6193_v38 }
 0xf18   :  { %7982 = vmatprep.subr.mxu1 %v8759_v29 }
 0xf19   :  { %7983 = vmatpush3.msra.mxu1 %v8759_v29  ;;  %7935 = vmatprep.mubr.f32.mxu0 %v6194_v56 }
 0xf1a   :  { %7984 = vmatprep.subr.mxu1 %v8771_v49  ;;  %7936 = vmatmul.mubr.f32.vlgmr.msra.gmra.mxu0 %v6204_v36 }
 0xf1b   :  { %7958 = vmatpush3.msra.mxu0 %v9669_v34  ;;  %7985 = vmatpush3.msra.mxu1 %v8771_v49  ;;  %v9672_v34 = vld [vmem:[#allocation72_spill] sm:$0xff] }
 0xf1c   :  { %7959 = vmatprep.subr.mxu0 %v9670_v25  ;;  %7973 = vmatprep.mubr.f32.mxu0 %v6191_v7 }
 0xf1d   :  { %7986 = vmatprep.subr.mxu1 %v8773_v63  ;;  %7960 = vmatpush3.msra.mxu0 %v9670_v25  ;;  %v8102_v25 = vld [vmem:[%s9357_s2 + $0x6] ss:$0 sm:$0xff] }
 0xf1e   :  { %7987 = vmatpush3.msra.mxu1 %v8773_v63  ;;  %7961 = vmatprep.subr.mxu0 %v9671_v57 }
 0xf1f   :  { %7988 = vmatprep.subr.mxu1 %v9667_v62  ;;  %7962 = vmatpush3.msra.mxu0 %v9671_v57 }
 0xf20   :  { %7989 = vmatpush3.msra.mxu1 %v9667_v62  ;;  %7963 = vmatprep.subr.mxu0 %v9672_v34 }
 0xf21   :  { %7990 = vmatprep.subr.mxu1 %v9668_v40  ;;  %7964 = vmatpush3.msra.mxu0 %v9672_v34 }
 0xf22   :  { %7991 = vmatpush3.msra.mxu1 %v9668_v40  ;;  %7965 = vmatprep.subr.mxu0 %v9673_v1 }
 0xf23   :  { %7993 = vmatmul.mubr.f32.vlgmr.msra.gmra.mxu1 %v6202_v60  ;;  %8014 = vmatprep.subr.mxu1 %v8730_v51 }
 0xf24   :  { %7966 = vmatpush3.msra.mxu0 %v9673_v1  ;;  %8015 = vmatpush3.msra.mxu1 %v8730_v51  ;;  %v9677_v51 = vld [vmem:[#allocation66_spill] sm:$0xff]  ;;  %v8103_v1 = vld [vmem:[%s9357_s2 + $0x7] ss:$0 sm:$0xff] }
 0xf25   :  { %8030 = vmatprep.mubr.f32.mxu1 %v6190_v13  ;;  %7967 = vmatprep.subr.mxu0 %v9674_v26 }
 0xf26   :  { %8016 = vmatprep.subr.mxu1 %v8738_v42  ;;  %7968 = vmatpush3.msra.mxu0 %v9674_v26 }
 0xf27   :  { %8017 = vmatpush3.msra.mxu1 %v8738_v42  ;;  %7969 = vmatprep.subr.mxu0 %v9675_v12  ;;  %v9678_v42 = vld [vmem:[#allocation70_spill] sm:$0xff] }
 0xf28   :  { %8018 = vmatprep.subr.mxu1 %v8757_v33  ;;  %7970 = vmatpush3.msra.mxu0 %v9675_v12 }
 0xf29   :  { %8019 = vmatpush3.msra.mxu1 %v8757_v33  ;;  %7971 = vmatprep.subr.mxu0 %v9676_v35  ;;  %v9679_v33 = vld [vmem:[#allocation78_spill] sm:$0xff] }
 0xf2a   :  { %8020 = vmatprep.subr.mxu1 %v8759_v29  ;;  %7972 = vmatpush3.msra.mxu0 %v9676_v35 }
 0xf2b   :  { %8021 = vmatpush3.msra.mxu1 %v8759_v29  ;;  %7974 = vmatmul.mubr.f32.vlgmr.msra.gmra.mxu0 %v6201_v24  ;;  %v9680_v29 = vld [vmem:[#allocation79_spill] sm:$0xff] }
 0xf2c   :  { %7995 = vmatprep.subr.mxu0 %v9677_v51  ;;  %8022 = vmatprep.subr.mxu1 %v8771_v49 }
 0xf2d   :  { %7996 = vmatpush3.msra.mxu0 %v9677_v51  ;;  %8011 = vmatprep.mubr.f32.mxu0 %v6190_v13 }
 0xf2e   :  { %8023 = vmatpush3.msra.mxu1 %v8771_v49  ;;  %7997 = vmatprep.subr.mxu0 %v9678_v42  ;;  %v9681_v49 = vld [vmem:[#allocation80_spill] sm:$0xff] }
 0xf2f   :  { %8024 = vmatprep.subr.mxu1 %v8773_v63  ;;  %7998 = vmatpush3.msra.mxu0 %v9678_v42 }
 0xf30   :  { %8025 = vmatpush3.msra.mxu1 %v8773_v63  ;;  %7999 = vmatprep.subr.mxu0 %v9679_v33  ;;  %v9682_v63 = vld [vmem:[#allocation81_spill] sm:$0xff] }
 0xf31   :  { %8026 = vmatprep.subr.mxu1 %v9667_v62  ;;  %8000 = vmatpush3.msra.mxu0 %v9679_v33 }
 0xf32   :  { %8027 = vmatpush3.msra.mxu1 %v9667_v62  ;;  %8001 = vmatprep.subr.mxu0 %v9680_v29  ;;  %v9684_v62 = vld [vmem:[#allocation86_spill] sm:$0xff] }
 0xf33   :  { %8028 = vmatprep.subr.mxu1 %v9668_v40  ;;  %8002 = vmatpush3.msra.mxu0 %v9680_v29 }
 0xf34   :  { %8029 = vmatpush3.msra.mxu1 %v9668_v40  ;;  %8003 = vmatprep.subr.mxu0 %v9681_v49 }
 0xf35   :  { %8031 = vmatmul.mubr.f32.vlgmr.msra.gmra.mxu1 %v9266_v30  ;;  %8004 = vmatpush3.msra.mxu0 %v9681_v49 }
 0xf36   :  { %8005 = vmatprep.subr.mxu0 %v9682_v63 }
 0xf37   :  { %8006 = vmatpush3.msra.mxu0 %v9682_v63 }
 0xf38   :  { %8007 = vmatprep.subr.mxu0 %v9683_v21 }
 0xf39   :  { %8008 = vmatpush3.msra.mxu0 %v9683_v21 }
 0xf3a   :  { %8009 = vmatprep.subr.mxu0 %v9684_v62 }
 0xf3b   :  { %8010 = vmatpush3.msra.mxu0 %v9684_v62 }
 0xf3c   :  { %8012 = vmatmul.mubr.f32.vlgmr.msra.gmra.mxu0 %v9266_v30 }
 0xfd2   :  { %v7956_v48 = vpop.f32.mrf.mxu1 }
 0xfd4   :  { %v6317_v44 = vpop.f32.mrf.mxu1 }
 0xfda   :  { %v7937_v40 = vpop.f32.mrf.mxu0 }
 0xfdb   :  { %v6207_v0 = vadd.f32 %v8101_v23, %v7937_v40 }
 0xfdc   :  { %v6196_v46 = vpop.f32.mrf.mxu0 }
 0xfdd   :  { %v6197_v31 = vadd.f32 %v8101_v23, %v6196_v46  ;;  %v6324_v27 = vadd.f32 %v7956_v48, %v6207_v0 }
 0xfdf   :  { %v6318_v2 = vadd.f32 %v6317_v44, %v6197_v31 }
 0xfe3   :  { %v7994_v5 = vpop.f32.mrf.mxu1 }
 0xfe5   :  { %v6499_v15 = vpop.f32.mrf.mxu1 }
 0xfeb   :  { %v7975_v53 = vpop.f32.mrf.mxu0 }
 0xfec   :  { %v6419_v61 = vadd.f32 %v7975_v53, %v6324_v27 }
 0xfed   :  { %v6411_v19 = vpop.f32.mrf.mxu0 }
 0xfee   :  { %v6412_v3 = vadd.f32 %v6411_v19, %v6318_v2  ;;  %v6508_v18 = vadd.f32 %v7994_v5, %v6419_v61 }
 0xff0   :  { %v6500_v50 = vadd.f32 %v6499_v15, %v6412_v3 }
 0xff5   :  { %v8032_v54 = vpop.f32.mrf.mxu1 }
 0xff7   :  { %v6687_v41 = vpop.f32.mrf.mxu1 }
 0xffc   :  { %v8013_v47 = vpop.f32.mrf.mxu0 }
 0xffd   :  { %v6609_v16 = vadd.f32 %v8013_v47, %v6508_v18 }
 0xffe   :  { %v6602_v17 = vpop.f32.mrf.mxu0 }
 0xfff   :  { %v6694_v52 = vadd.f32 %v8032_v54, %v6609_v16  ;;  %v6603_v10 = vadd.f32 %v6602_v17, %v6500_v50 }
0x1001   :  { %v6688_v55 = vadd.f32 %v6687_v41, %v6603_v10  ;;  %v6698_v43 = vadd.f32 %v6694_v52, %v9194_v28 }
0x1003   :  { %v6702_v58 = vsel %vm539_vm1, %v6698_v43, 0.0  ;;  %v6697_v11 = vadd.f32 %v6688_v55, %v9190_v14 }
0x1004   :  { %6703 = vadd.xlane.f32.xlu0 %v6702_v58 }
0x1005   :  { %v6699_v39 = vsel %vm539_vm1, %v6697_v11, 0.0 }
0x1006   :  { %6700 = vadd.xlane.f32.xlu1 %v6699_v39 }
0x108d   :  { %v6704_v22 = vpop.xlane.xlu0 %6703 }
0x108e   :  { %v6706_v8 = vmul.f32 0.03125, %v6704_v22 }
0x108f   :  { %v6701_v32 = vpop.xlane.xlu1 %6700 }
0x1090   :  { %v6708_v45 = vsub.f32 %v6698_v43, %v6706_v8  ;;  %v6705_v20 = vmul.f32 0.03125, %v6701_v32 }
0x1092   :  { %v6707_v4 = vsub.f32 %v6697_v11, %v6705_v20  ;;  %v6710_v6 = vmul.f32 %v6708_v45, %v6708_v45 }
0x1094   :  { %v6714_v30 = vsel %vm539_vm1, %v6710_v6, 0.0  ;;  %v6709_v59 = vmul.f32 %v6707_v4, %v6707_v4 }
0x1095   :  { %6715 = vadd.xlane.f32.xlu0 %v6714_v30 }
0x1096   :  { %v6711_v28 = vsel %vm539_vm1, %v6709_v59, 0.0 }
0x1097   :  { %6712 = vadd.xlane.f32.xlu1 %v6711_v28 }
0x111e   :  { %v6716_v13 = vpop.xlane.xlu0 %6715 }
0x111f   :  { %v6718_v14 = vmul.f32 0.03125, %v6716_v13 }
0x1120   :  { %v6713_v24 = vpop.xlane.xlu1 %6712 }
0x1121   :  { %v6720_v7 = vadd.f32 1e-12, %v6718_v14  ;;  %v6717_v60 = vmul.f32 0.03125, %v6713_v24 }
0x1123   :  { %8091 = vrsqrt.f32 %v6720_v7  ;;  %v6719_v9 = vadd.f32 1e-12, %v6717_v60 }
0x1125   :  { %8093 = vrsqrt.f32 %v6719_v9 }
0x1130   :  { %v8092_v37 = vpop.eup %8091 }
0x1131   :  { %v6724_v38 = vmul.f32 %v8092_v37, %v6708_v45 }
0x1132   :  { %v8094_v56 = vpop.eup %8093 }
0x1133   :  { %v6723_v36 = vmul.f32 %v8094_v56, %v6707_v4  ;;  %v6726_v57 = vmul.f32 %v8102_v25, %v6724_v38 }
0x1135   :  { %v6725_v34 = vmul.f32 %v8102_v25, %v6723_v36  ;;  %v6728_v26 = vadd.f32 %v8103_v1, %v6726_v57 }
0x1137   :  { %v6727_v12 = vadd.f32 %v8103_v1, %v6725_v34  ;;  %6730 = vst.msk [vmem:[#allocation2 + $0x8] sm:$0xff] %vm539_vm1, %v6728_v26 }
0x1139   :  { %6729 = vst.msk [vmem:[#allocation2] sm:$0xff] %vm539_vm1, %v6727_v12 }
0x113a   :  { %8115 = shalt.err (!%p8112_p4)
}
0x113b   :  { %s8130_s1 = smov 128   ;;  %s8131_s6 = smov 8  }
0x113c   :  { %6742 = dma.vmem_to_hbm [thread:$0]  %s6737_s29, 256, %s9358_s3, [#allocation3], %s8130_s1, %s8130_s1, %s8131_s6  }
0x113d   :  { %8124 = dma.done.wait [#allocation3], 256  }
0x113e   :  { %8125 = vsyncadd [#allocation3], 4294967040 }
0x113f   :  { %6746 = vsyncpa [#allocation3], 1 }

</bundles_post_ra>
